<compile_context>
chip_gen: v7x
topology: tpu7x:2x2x1
jax: 0.10.0
libtpu: 0.0.40
codegen_flags: <defaults>
</compile_context>

<pallas_src>
import functools

import jax
import jax.numpy as jnp
import numpy as np
from jax.experimental import pallas as pl
from jax.experimental.pallas import tpu as pltpu


def _leaky_relu(x, slope=0.1):
    return jnp.where(x > 0, x, slope * x)


def _phase_taps(ksize, stride, padding):
    """Static tap table.  For each output phase q = ph*s + pw, the list of
    (kh, kw, dh, dw): the tap's contribution to output-phase row j / col i
    reads the input at row j+dh / col i+dw (zero outside the input)."""
    s, K, p = stride, ksize, padding
    taps = []
    for ph in range(s):
        for pw in range(s):
            lst = []
            for kh in range(K):
                if (kh - p - ph) % s:
                    continue
                dh = (ph + p - kh) // s
                for kw in range(K):
                    if (kw - p - pw) % s:
                        continue
                    dw = (pw + p - kw) // s
                    lst.append((kh, kw, dh, dw))
            taps.append(lst)
    return taps


def _conv_transpose_kernel(x_ref, w_ref, b_ref, o_ref, *,
                           co, halo_h, halo_w, phase_shifts):
    """One (batch, H-row-block) tile per grid step.

    x_ref : (1, Hb+2*halo_h, W+2*halo_w, Ci)  bf16, halo rows/cols pre-padded
    w_ref : (Ci, total_taps*Co)               bf16, phase-major tap columns
    b_ref : (1, Co)                           f32 BN-folded bias
    o_ref : (1, Hb, W, s*s*Co)                phase slabs on the lane axis:
            dense out[n, s*j+ph, s*i+pw, c] == o[n, j, i, (ph*s+pw)*Co + c]
    """
    _, hp, wp, ci = x_ref.shape
    _, hb, wb, _ = o_ref.shape

    # Shared LHS for every per-phase MXU matmul (hoisted out of the loop).
    x2 = x_ref[...].reshape(hp * wp, ci)

    # Hoisted bias broadcast; reused as the accumulator seed of every phase.
    bias = jnp.broadcast_to(
        b_ref[...].astype(jnp.float32).reshape(1, 1, co), (hb, wb, co))

    col = 0
    for q, shifts in enumerate(phase_shifts):        # static s*s-way unroll
        tq = len(shifts)
        acc = bias
        if tq:
            w_phase = w_ref[:, col * co:(col + tq) * co]
            col += tq
            # Per-phase matmul: bf16 operands, f32 accumulation.
            y = jnp.dot(x2, w_phase, preferred_element_type=jnp.float32)
            y = y.reshape(hp, wp, tq * co)
            for t, (dh, dw) in enumerate(shifts):
                # Halo padding absorbs the boundary: the +-shift is folded into
                # a static window slice (no zero-fill concat, no masks).
                acc = acc + y[halo_h + dh:halo_h + dh + hb,
                              halo_w + dw:halo_w + dw + wb,
                              t * co:(t + 1) * co]
        # Lane-dense store: phase q is a contiguous Co-wide lane slab.
        o_ref[0, :, :, q * co:(q + 1) * co] = _leaky_relu(acc).astype(o_ref.dtype)


def conv_transpose_block(x_nchw, weight, gamma, beta, mean, var, *,
                         stride=2, padding=1, eps=1e-5, h_block=None,
                         compute_dtype=jnp.bfloat16):
    """ConvTranspose2d(bias=False) + eval-mode BatchNorm2d + LeakyReLU(0.1).

    x_nchw : (N, Ci, H, W) float32
    weight : (Ci, Co, K, K)   (PyTorch ConvTranspose2d layout)
    Returns (N, Co, OH, OW) with OH = (H-1)*stride - 2*padding + K.
    """
    N, Ci, H, W = x_nchw.shape
    wCi, Co, KH, KW = weight.shape
    assert wCi == Ci and KH == KW, "square kernels only"
    K = KH
    s, p = stride, padding
    OH = (H - 1) * s - 2 * p + K
    OW = (W - 1) * s - 2 * p + K
    assert OH == s * H and OW == s * W, "requires kernel_size == stride + 2*padding"

    taps = _phase_taps(K, s, p)
    halo_h = max((abs(dh) for lst in taps for _, _, dh, _ in lst), default=0)
    halo_w = max((abs(dw) for lst in taps for _, _, _, dw in lst), default=0)
    phase_shifts = [[(dh, dw) for _, _, dh, dw in lst] for lst in taps]
    total_taps = sum(len(lst) for lst in taps)

    # ---- one-time weight prep: fold eval-mode BN into the conv weights/bias,
    # group the tap columns by output phase (phase-major, tap-major, then Co).
    scale = gamma / jnp.sqrt(var + eps)                      # (Co,)
    bias = (beta - mean * scale).astype(jnp.float32)         # (Co,)
    w_f = weight * scale[None, :, None, None]                # (Ci, Co, K, K)
    w_cols = [w_f[:, :, kh, kw] for lst in taps for kh, kw, _, _ in lst]
    w_all = jnp.concatenate(w_cols, axis=1).astype(compute_dtype)   # (Ci, T*Co)

    # ---- spatial row-blocking with a materialised +-halo (layout plumbing) --
    if h_block is None:
        # Prefer several parallel spatial blocks (pipelining + v7x megacore);
        # sweep / bound by VMEM for production H, W, Co.
        h_block = H if H <= 8 else max(d for d in range(1, 9) if H % d == 0)
    assert H % h_block == 0
    n_hb = H // h_block
    hp = h_block + 2 * halo_h
    wp = W + 2 * halo_w

    x_nhwc = jnp.transpose(x_nchw, (0, 2, 3, 1))             # (N, H, W, Ci)
    xp = jnp.pad(x_nhwc, ((0, 0), (halo_h, halo_h), (halo_w, halo_w), (0, 0)))
    rows = jnp.arange(n_hb)[:, None] * h_block + jnp.arange(hp)[None, :]
    x_blocks = xp[:, rows]                                   # (N, n_hb, hp, wp, Ci)
    x_blocks = x_blocks.reshape(N * n_hb, hp, wp, Ci).astype(compute_dtype)

    kernel = functools.partial(_conv_transpose_kernel, co=Co,
                               halo_h=halo_h, halo_w=halo_w,
                               phase_shifts=phase_shifts)

    out_flat = pl.pallas_call(
        kernel,
        out_shape=jax.ShapeDtypeStruct((N * n_hb, h_block, W, s * s * Co),
                                       x_nchw.dtype),
        grid=(N * n_hb,),
        in_specs=[
            pl.BlockSpec((1, hp, wp, Ci), lambda i: (i, 0, 0, 0)),
            pl.BlockSpec((Ci, total_taps * Co), lambda i: (0, 0)),
            pl.BlockSpec((1, Co), lambda i: (0, 0)),
        ],
        out_specs=pl.BlockSpec((1, h_block, W, s * s * Co),
                               lambda i: (i, 0, 0, 0)),
        compiler_params=pltpu.CompilerParams(
            dimension_semantics=("parallel",)),
    )(x_blocks, w_all, bias[None, :])

    # Phase interleave + NCHW in a single fused transpose (layout plumbing).
    out = out_flat.reshape(N, H, W, s, s, Co)
    out = jnp.transpose(out, (0, 5, 1, 3, 2, 4)).reshape(N, Co, OH, OW)
    return out


def _reference(x_nchw, weight, gamma, beta, mean, var, *,
               stride=2, padding=1, eps=1e-5):
    """Pure-JAX reference: direct ConvTranspose2d scatter + BN + leaky_relu."""
    N, Ci, H, W = x_nchw.shape
    _, Co, KH, KW = weight.shape
    x = jnp.transpose(x_nchw, (0, 2, 3, 1)).astype(jnp.float32)
    full_h = (H - 1) * stride + KH
    full_w = (W - 1) * stride + KW
    out = jnp.zeros((N, full_h, full_w, Co), jnp.float32)
    for kh in range(KH):
        for kw in range(KW):
            contrib = jnp.einsum('nhwc,cd->nhwd', x, weight[:, :, kh, kw])
            out = out.at[:, kh:kh + (H - 1) * stride + 1:stride,
                            kw:kw + (W - 1) * stride + 1:stride, :].add(contrib)
    OH = full_h - 2 * padding
    OW = full_w - 2 * padding
    out = out[:, padding:padding + OH, padding:padding + OW, :]
    scale = gamma / jnp.sqrt(var + eps)
    out = out * scale + (beta - mean * scale)
    out = jnp.where(out > 0, out, 0.1 * out)
    return jnp.transpose(out, (0, 3, 1, 2))


if __name__ == "__main__":
    key = jax.random.PRNGKey(0)
    N, Ci, H, W = 2, 4, 16, 16           # batch=2, in_filters=4, spatial=16
    Co, K, stride, padding = 8, 4, 2, 1  # out_filters=8, k=4, s=2, p=1

    keys = jax.random.split(key, 6)
    x = jax.random.normal(keys[0], (N, Ci, H, W), jnp.float32)
    weight = jax.random.normal(keys[1], (Ci, Co, K, K), jnp.float32) * 0.1
    gamma = 1.0 + 0.1 * jax.random.normal(keys[2], (Co,), jnp.float32)
    beta = 0.1 * jax.random.normal(keys[3], (Co,), jnp.float32)
    mean = 0.1 * jax.random.normal(keys[4], (Co,), jnp.float32)
    var = jnp.abs(jax.random.normal(keys[5], (Co,), jnp.float32)) + 0.5

    out = conv_transpose_block(x, weight, gamma, beta, mean, var,
                               stride=stride, padding=padding)
    out = jax.block_until_ready(out)

    ref = _reference(x, weight, gamma, beta, mean, var,
                     stride=stride, padding=padding)
    # bf16 MXU operands with f32 accumulation -> loosened tolerance.
    np.testing.assert_allclose(np.asarray(out), np.asarray(ref),
                               rtol=2e-2, atol=2e-2)

    print("KERNEL_OK")
</pallas_src>

<mosaic_0001>
module attributes {stable_mosaic.version = 11 : i64} {
  func.func @_conv_transpose_kernel(%arg0: i32, %arg1: memref<1x10x18x4xbf16, #tpu.memory_space<vmem>>, %arg2: memref<4x128xbf16, #tpu.memory_space<vmem>>, %arg3: memref<1x8xf32, #tpu.memory_space<vmem>>, %arg4: memref<1x8x16x32xf32, #tpu.memory_space<vmem>>) attributes {dimension_semantics = [#tpu.dimension_semantics<parallel>], iteration_bounds = array<i64: 4>, scalar_prefetch = 0 : i64, scratch_operands = 0 : i64, tpu.core_type = #tpu.core_type<tc>, window_params = [{transform_indices = @transform_0, window_bounds = array<i64: 1, 10, 18, 4>}, {pipeline_mode = #tpu.pipeline_mode<synchronous>, transform_indices = @transform_1, window_bounds = array<i64: 4, 128>}, {pipeline_mode = #tpu.pipeline_mode<synchronous>, transform_indices = @transform_2, window_bounds = array<i64: 1, 8>}, {transform_indices = @transform_3, window_bounds = array<i64: 1, 8, 16, 32>}]} {
    %c0 = arith.constant 0 : index
    %c0_0 = arith.constant 0 : index
    %c0_1 = arith.constant 0 : index
    %c0_2 = arith.constant 0 : index
    %0 = vector.load %arg1[%c0, %c0_0, %c0_1, %c0_2] : memref<1x10x18x4xbf16, #tpu.memory_space<vmem>>, vector<1x10x18x4xbf16>
    %1 = vector.shape_cast %0 : vector<1x10x18x4xbf16> to vector<180x4xbf16>
    %c0_3 = arith.constant 0 : index
    %c0_4 = arith.constant 0 : index
    %2 = vector.load %arg3[%c0_3, %c0_4] : memref<1x8xf32, #tpu.memory_space<vmem>>, vector<1x8xf32>
    %3 = vector.shape_cast %2 : vector<1x8xf32> to vector<1x1x8xf32>
    %4 = vector.shape_cast %3 : vector<1x1x8xf32> to vector<1x1x8xf32>
    %5 = vector.broadcast %4 : vector<1x1x8xf32> to vector<8x16x8xf32>
    %c0_5 = arith.constant 0 : index
    %c0_6 = arith.constant 0 : index
    %6 = vector.load %arg2[%c0_5, %c0_6] : memref<4x128xbf16, #tpu.memory_space<vmem>>, vector<4x32xbf16>
    %cst = arith.constant dense<0.000000e+00> : vector<180x32xf32>
    %7 = tpu.matmul %1, %6, %cst {dimension_numbers = #tpu.dot_dimension_numbers<[1], [0], [0], [1], [0, 0, 1, 1], [], []>} : vector<180x4xbf16>, vector<4x32xbf16>, vector<180x32xf32> -> vector<180x32xf32>
    %8 = vector.shape_cast %7 : vector<180x32xf32> to vector<10x18x32xf32>
    %9 = vector.extract_strided_slice %8 {offsets = [1, 1, 0], sizes = [8, 16, 8], strides = [1, 1, 1]} : vector<10x18x32xf32> to vector<8x16x8xf32>
    %10 = arith.addf %5, %9 : vector<8x16x8xf32>
    %11 = vector.extract_strided_slice %8 {offsets = [1, 0, 8], sizes = [8, 16, 8], strides = [1, 1, 1]} : vector<10x18x32xf32> to vector<8x16x8xf32>
    %12 = arith.addf %10, %11 : vector<8x16x8xf32>
    %13 = vector.extract_strided_slice %8 {offsets = [0, 1, 16], sizes = [8, 16, 8], strides = [1, 1, 1]} : vector<10x18x32xf32> to vector<8x16x8xf32>
    %14 = arith.addf %12, %13 : vector<8x16x8xf32>
    %15 = vector.extract_strided_slice %8 {offsets = [0, 0, 24], sizes = [8, 16, 8], strides = [1, 1, 1]} : vector<10x18x32xf32> to vector<8x16x8xf32>
    %16 = arith.addf %14, %15 : vector<8x16x8xf32>
    %cst_7 = arith.constant 0.000000e+00 : f32
    %17 = vector.broadcast %cst_7 : f32 to vector<8x16x8xf32>
    %18 = arith.cmpf ogt, %16, %17 : vector<8x16x8xf32>
    %cst_8 = arith.constant 1.000000e-01 : f32
    %19 = vector.broadcast %cst_8 : f32 to vector<8x16x8xf32>
    %20 = arith.mulf %19, %16 : vector<8x16x8xf32>
    %21 = arith.select %18, %16, %20 : vector<8x16x8xi1>, vector<8x16x8xf32>
    %c0_9 = arith.constant 0 : index
    %c0_10 = arith.constant 0 : index
    %c0_11 = arith.constant 0 : index
    %c0_12 = arith.constant 0 : index
    %22 = vector.load %arg4[%c0_9, %c0_10, %c0_11, %c0_12] : memref<1x8x16x32xf32, #tpu.memory_space<vmem>>, vector<1x8x16x8xf32>
    %23 = vector.shape_cast %22 : vector<1x8x16x8xf32> to vector<8x16x8xf32>
    %24 = vector.shape_cast %21 : vector<8x16x8xf32> to vector<1x8x16x8xf32>
    tpu.vector_store %arg4[%c0_9, %c0_10, %c0_11, %c0_12], %24 {strides = array<i32>} : memref<1x8x16x32xf32, #tpu.memory_space<vmem>>, vector<1x8x16x8xf32>,
    %c0_13 = arith.constant 0 : index
    %c32 = arith.constant 32 : index
    %25 = vector.load %arg2[%c0_13, %c32] : memref<4x128xbf16, #tpu.memory_space<vmem>>, vector<4x32xbf16>
    %cst_14 = arith.constant dense<0.000000e+00> : vector<180x32xf32>
    %26 = tpu.matmul %1, %25, %cst_14 {dimension_numbers = #tpu.dot_dimension_numbers<[1], [0], [0], [1], [0, 0, 1, 1], [], []>} : vector<180x4xbf16>, vector<4x32xbf16>, vector<180x32xf32> -> vector<180x32xf32>
    %27 = vector.shape_cast %26 : vector<180x32xf32> to vector<10x18x32xf32>
    %28 = vector.extract_strided_slice %27 {offsets = [1, 2, 0], sizes = [8, 16, 8], strides = [1, 1, 1]} : vector<10x18x32xf32> to vector<8x16x8xf32>
    %29 = arith.addf %5, %28 : vector<8x16x8xf32>
    %30 = vector.extract_strided_slice %27 {offsets = [1, 1, 8], sizes = [8, 16, 8], strides = [1, 1, 1]} : vector<10x18x32xf32> to vector<8x16x8xf32>
    %31 = arith.addf %29, %30 : vector<8x16x8xf32>
    %32 = vector.extract_strided_slice %27 {offsets = [0, 2, 16], sizes = [8, 16, 8], strides = [1, 1, 1]} : vector<10x18x32xf32> to vector<8x16x8xf32>
    %33 = arith.addf %31, %32 : vector<8x16x8xf32>
    %34 = vector.extract_strided_slice %27 {offsets = [0, 1, 24], sizes = [8, 16, 8], strides = [1, 1, 1]} : vector<10x18x32xf32> to vector<8x16x8xf32>
    %35 = arith.addf %33, %34 : vector<8x16x8xf32>
    %cst_15 = arith.constant 0.000000e+00 : f32
    %36 = vector.broadcast %cst_15 : f32 to vector<8x16x8xf32>
    %37 = arith.cmpf ogt, %35, %36 : vector<8x16x8xf32>
    %cst_16 = arith.constant 1.000000e-01 : f32
    %38 = vector.broadcast %cst_16 : f32 to vector<8x16x8xf32>
    %39 = arith.mulf %38, %35 : vector<8x16x8xf32>
    %40 = arith.select %37, %35, %39 : vector<8x16x8xi1>, vector<8x16x8xf32>
    %c0_17 = arith.constant 0 : index
    %c0_18 = arith.constant 0 : index
    %c0_19 = arith.constant 0 : index
    %c8 = arith.constant 8 : index
    %41 = vector.load %arg4[%c0_17, %c0_18, %c0_19, %c8] : memref<1x8x16x32xf32, #tpu.memory_space<vmem>>, vector<1x8x16x8xf32>
    %42 = vector.shape_cast %41 : vector<1x8x16x8xf32> to vector<8x16x8xf32>
    %43 = vector.shape_cast %40 : vector<8x16x8xf32> to vector<1x8x16x8xf32>
    tpu.vector_store %arg4[%c0_17, %c0_18, %c0_19, %c8], %43 {strides = array<i32>} : memref<1x8x16x32xf32, #tpu.memory_space<vmem>>, vector<1x8x16x8xf32>,
    %c0_20 = arith.constant 0 : index
    %c64 = arith.constant 64 : index
    %44 = vector.load %arg2[%c0_20, %c64] : memref<4x128xbf16, #tpu.memory_space<vmem>>, vector<4x32xbf16>
    %cst_21 = arith.constant dense<0.000000e+00> : vector<180x32xf32>
    %45 = tpu.matmul %1, %44, %cst_21 {dimension_numbers = #tpu.dot_dimension_numbers<[1], [0], [0], [1], [0, 0, 1, 1], [], []>} : vector<180x4xbf16>, vector<4x32xbf16>, vector<180x32xf32> -> vector<180x32xf32>
    %46 = vector.shape_cast %45 : vector<180x32xf32> to vector<10x18x32xf32>
    %47 = vector.extract_strided_slice %46 {offsets = [2, 1, 0], sizes = [8, 16, 8], strides = [1, 1, 1]} : vector<10x18x32xf32> to vector<8x16x8xf32>
    %48 = arith.addf %5, %47 : vector<8x16x8xf32>
    %49 = vector.extract_strided_slice %46 {offsets = [2, 0, 8], sizes = [8, 16, 8], strides = [1, 1, 1]} : vector<10x18x32xf32> to vector<8x16x8xf32>
    %50 = arith.addf %48, %49 : vector<8x16x8xf32>
    %51 = vector.extract_strided_slice %46 {offsets = [1, 1, 16], sizes = [8, 16, 8], strides = [1, 1, 1]} : vector<10x18x32xf32> to vector<8x16x8xf32>
    %52 = arith.addf %50, %51 : vector<8x16x8xf32>
    %53 = vector.extract_strided_slice %46 {offsets = [1, 0, 24], sizes = [8, 16, 8], strides = [1, 1, 1]} : vector<10x18x32xf32> to vector<8x16x8xf32>
    %54 = arith.addf %52, %53 : vector<8x16x8xf32>
    %cst_22 = arith.constant 0.000000e+00 : f32
    %55 = vector.broadcast %cst_22 : f32 to vector<8x16x8xf32>
    %56 = arith.cmpf ogt, %54, %55 : vector<8x16x8xf32>
    %cst_23 = arith.constant 1.000000e-01 : f32
    %57 = vector.broadcast %cst_23 : f32 to vector<8x16x8xf32>
    %58 = arith.mulf %57, %54 : vector<8x16x8xf32>
    %59 = arith.select %56, %54, %58 : vector<8x16x8xi1>, vector<8x16x8xf32>
    %c0_24 = arith.constant 0 : index
    %c0_25 = arith.constant 0 : index
    %c0_26 = arith.constant 0 : index
    %c16 = arith.constant 16 : index
    %60 = vector.load %arg4[%c0_24, %c0_25, %c0_26, %c16] : memref<1x8x16x32xf32, #tpu.memory_space<vmem>>, vector<1x8x16x8xf32>
    %61 = vector.shape_cast %60 : vector<1x8x16x8xf32> to vector<8x16x8xf32>
    %62 = vector.shape_cast %59 : vector<8x16x8xf32> to vector<1x8x16x8xf32>
    tpu.vector_store %arg4[%c0_24, %c0_25, %c0_26, %c16], %62 {strides = array<i32>} : memref<1x8x16x32xf32, #tpu.memory_space<vmem>>, vector<1x8x16x8xf32>,
    %c0_27 = arith.constant 0 : index
    %c96 = arith.constant 96 : index
    %63 = vector.load %arg2[%c0_27, %c96] : memref<4x128xbf16, #tpu.memory_space<vmem>>, vector<4x32xbf16>
    %cst_28 = arith.constant dense<0.000000e+00> : vector<180x32xf32>
    %64 = tpu.matmul %1, %63, %cst_28 {dimension_numbers = #tpu.dot_dimension_numbers<[1], [0], [0], [1], [0, 0, 1, 1], [], []>} : vector<180x4xbf16>, vector<4x32xbf16>, vector<180x32xf32> -> vector<180x32xf32>
    %65 = vector.shape_cast %64 : vector<180x32xf32> to vector<10x18x32xf32>
    %66 = vector.extract_strided_slice %65 {offsets = [2, 2, 0], sizes = [8, 16, 8], strides = [1, 1, 1]} : vector<10x18x32xf32> to vector<8x16x8xf32>
    %67 = arith.addf %5, %66 : vector<8x16x8xf32>
    %68 = vector.extract_strided_slice %65 {offsets = [2, 1, 8], sizes = [8, 16, 8], strides = [1, 1, 1]} : vector<10x18x32xf32> to vector<8x16x8xf32>
    %69 = arith.addf %67, %68 : vector<8x16x8xf32>
    %70 = vector.extract_strided_slice %65 {offsets = [1, 2, 16], sizes = [8, 16, 8], strides = [1, 1, 1]} : vector<10x18x32xf32> to vector<8x16x8xf32>
    %71 = arith.addf %69, %70 : vector<8x16x8xf32>
    %72 = vector.extract_strided_slice %65 {offsets = [1, 1, 24], sizes = [8, 16, 8], strides = [1, 1, 1]} : vector<10x18x32xf32> to vector<8x16x8xf32>
    %73 = arith.addf %71, %72 : vector<8x16x8xf32>
    %cst_29 = arith.constant 0.000000e+00 : f32
    %74 = vector.broadcast %cst_29 : f32 to vector<8x16x8xf32>
    %75 = arith.cmpf ogt, %73, %74 : vector<8x16x8xf32>
    %cst_30 = arith.constant 1.000000e-01 : f32
    %76 = vector.broadcast %cst_30 : f32 to vector<8x16x8xf32>
    %77 = arith.mulf %76, %73 : vector<8x16x8xf32>
    %78 = arith.select %75, %73, %77 : vector<8x16x8xi1>, vector<8x16x8xf32>
    %c0_31 = arith.constant 0 : index
    %c0_32 = arith.constant 0 : index
    %c0_33 = arith.constant 0 : index
    %c24 = arith.constant 24 : index
    %79 = vector.load %arg4[%c0_31, %c0_32, %c0_33, %c24] : memref<1x8x16x32xf32, #tpu.memory_space<vmem>>, vector<1x8x16x8xf32>
    %80 = vector.shape_cast %79 : vector<1x8x16x8xf32> to vector<8x16x8xf32>
    %81 = vector.shape_cast %78 : vector<8x16x8xf32> to vector<1x8x16x8xf32>
    tpu.vector_store %arg4[%c0_31, %c0_32, %c0_33, %c24], %81 {strides = array<i32>} : memref<1x8x16x32xf32, #tpu.memory_space<vmem>>, vector<1x8x16x8xf32>,
    return
  }
  func.func @transform_0(%arg0: i32) -> (i32, i32, i32, i32) {
    %c0_i32 = arith.constant 0 : i32
    %c0_i32_0 = arith.constant 0 : i32
    %c0_i32_1 = arith.constant 0 : i32
    %c0_i32_2 = arith.constant 0 : i32
    return %arg0, %c0_i32, %c0_i32_0, %c0_i32_1 : i32, i32, i32, i32
  }
  func.func @transform_1(%arg0: i32) -> (i32, i32) {
    %c0_i32 = arith.constant 0 : i32
    %c0_i32_0 = arith.constant 0 : i32
    %c0_i32_1 = arith.constant 0 : i32
    return %c0_i32, %c0_i32_0 : i32, i32
  }
  func.func @transform_2(%arg0: i32) -> (i32, i32) {
    %c0_i32 = arith.constant 0 : i32
    %c0_i32_0 = arith.constant 0 : i32
    %c0_i32_1 = arith.constant 0 : i32
    return %c0_i32, %c0_i32_0 : i32, i32
  }
  func.func @transform_3(%arg0: i32) -> (i32, i32, i32, i32) {
    %c0_i32 = arith.constant 0 : i32
    %c0_i32_0 = arith.constant 0 : i32
    %c0_i32_1 = arith.constant 0 : i32
    %c0_i32_2 = arith.constant 0 : i32
    return %arg0, %c0_i32, %c0_i32_0, %c0_i32_1 : i32, i32, i32, i32
  }
}

</mosaic_0001>

<bundles_post_ra>
// kernel: tpu_custom_call.1
= control target key start
LH: loop header
LB: loop body
LE: loop exit
PB: predicated region body
PF: predicated region fallthrough
CT: control target
= control target key end

     0   :  { %8 = vsyncpa [#allocation3], 0  ;;  %s11038_s0 = inlined_call_operand.vmem [shape: bf16[4,10,18,4], index: 0, kind: input, shape index: {}]   ;;  %s11039_s1 = inlined_call_operand.vmem [shape: bf16[4,128], index: 1, kind: input, shape index: {}]   ;;  %s11040_s2 = inlined_call_operand.vmem [shape: f32[1,8], index: 2, kind: input, shape index: {}]   ;;  %s11041_s3 = inlined_call_operand.hbm [shape: f32[4,8,16,32], index: 3, kind: output, shape index: {}]  }
   0x1   :  { %10 = vsyncpa [#allocation3 + $0x1], 0  ;;  %s7581_s12 = smov 0   ;;  %s7583_s13 = smov 0  }
   0x2   :  { %s7585_s14 = smov 0   ;;  %s7587_s15 = smov 0  }
   0x3 LB: > { %s7602_s16 = sadd.s32 4294967295, %s7546_s15   ;;  %s7166_s17 = sadd.s32 4294967294, %s7546_s15   ;;  %s7546_s15 = sphi %s7587_s15, %s11473_s15   ;;  %s7542_s14 = sphi %s7585_s14, %s11472_s14   ;;  %s7538_s13 = sphi %s7583_s13, %s11471_s13   ;;  %s7534_s12 = sphi %s7581_s12, %s11470_s12  }
   0x4   : > { %s7606_s18 = sadd.s32 1, %s7546_s15   ;;  %s91_s19 = sadd.s32 1, %s7542_s14 }
   0x5   : > { %s88_s20 = ssub.s32 %s7546_s15, %s7606_s18  ;;  %p101_p0 = scmp.ne.s32.totalorder %s7542_s14, %s7538_s13 }
   0x6   : > { %p89_p1 = scmp.eq.s32.totalorder %s88_s20, 0  ;;  %p102_p2 = scmp.eq.s32.totalorder %s7602_s16, 3 }
   0x7   : > { %p107_p3 = scmp.ne.s32.totalorder %s7538_s13, %s7534_s12  ;;  %p108_p4 = scmp.eq.s32.totalorder %s7166_s17, 3 }
   0x8   : > { %s7617_s21 = scalar_select %p89_p1, %s7542_s14, %s91_s19  }
   0x9   : > { %p7619_p5 = por %p102_p2, %p101_p0  ;;  %p7623_p6 = por %p108_p4, %p107_p3 }
   0xa   : > { %p7169_p7 = scmp.ge.s32.totalorder %s7546_s15, 1  ;;  %p140_p8 = scmp.lt.s32.totalorder %s7546_s15, 5 }
   0xc   : > { %p141_p9 = pnand %p7169_p7, %p140_p8 }
   0xe   : > { %144 = sbr.rel (%p141_p9) target bundleno = 915 (0x393), region = 32 }
  0x15   : > { %v7238_v0 = vld.sshfl [vmem:[%s11039_s1] sm:$0x3 pattern:$0x76325410]  ;;  %v241_v1 = vlaneseq  ;;  %s7548_s26 = smov 64   ;;  %s7549_s27 = smov 96  }
  0x16   : > { %4241 = vrot.lane.b32.xlu1 %v7238_v0, %s7548_s26  ;;  %2660 = vrot.lane.b32.xlu0 %v7238_v0, %s7549_s27  ;;  %v857_v2 = vld [vmem:[%s11039_s1] sm:$0x3]  ;;  %vm1449_vm0 = vcmask 1041408   ;;  %p164_p10 = scmp.lt.s32.totalorder %s7602_s16, 3  ;;  %v7550_v4 = vmov 1966171168  }
  0x17   : > { %7426 = vmatprep.subr.msk.bf16.mxu0 %vm1449_vm0, %v857_v2  ;;  %v1451_v3 = vsel %vm1449_vm0, %v857_v2, 0  ;;  %v239_v5 = vunpack.c.l.s4 %v7550_v4  ;;  %v7638_v6 = vshrl.u32 %v241_v1, 7  ;;  %s7551_s8 = smov 32   ;;  %vm1412_vm1 = vcmask 31744   ;;  %s7553_s9 = smov 104  }
  0x18   : > { %7323 = vmatpush3.bf16.msra.mxu0 %v1451_v3  ;;  %s165_s30 = scalar_select %p164_p10, %s7602_s16, 3  ;;  %vm2275_vm2 = vcmask 1046528   ;;  %vm2634_vm7 = vcmask 64512  }
  0x19   : > { %v240_v7 = vunpack.c.0.s8 %v239_v5  ;;  %s7554_s10 = smov 120   ;;  %s7555_s11 = smov 112  }
  0x1a   : > { %s7430_s4 = smul.u32 120, %s165_s30  ;;  %5517 = vrot.lane.b32.xlu0 %v7238_v0, %s7551_s8  ;;  %s161_s20 = sand.u32 1, %s7538_s13  }
  0x1b   : > { %v7642_v8 = vsub.s32 %v240_v7, %v7638_v6  ;;  %s8826_s24 = sshll.u32 %s161_s20, 7  ;;  %s7556_s28 = smov 8  }
  0x1c   : > { %s7647_s7 = scalar_lea.vmem %s11038_s0, %s7430_s4  ;;  %s8868_s25 = scalar_lea.vmem [#allocation2], %s8826_s24 }
  0x1d   : > { %v7172_v9 = vld.sshfl [vmem:[%s7647_s7] sm:$0x33 pattern:$0x75316420]  ;;  %s7557_s29 = smov 16   ;;  %s7558_s30 = smov 24  }
  0x1e   : > { %v7173_v10 = vld.sshfl [vmem:[%s7647_s7 + $0x4] sm:$0x33 pattern:$0x75316420]  ;;  %v237_v11 = vcombine.high %v7172_v9, %v7172_v9  ;;  %v244_v12 = vrot.slane %v7172_v9, %v7642_v8  ;;  %s7269_s6 = sshll.u32 %s7602_s16, 11  ;;  %s7559_s17 = smov [#allocation2]  }
  0x1f   : > { %v261_v13 = vcombine.high %v7173_v10, %v7173_v10  ;;  %v268_v14 = vrot.slane %v7173_v10, %v7642_v8  ;;  %v7174_v15 = vld.sshfl [vmem:[%s7647_s7 + $0x8] sm:$0x1 pattern:$0x75316420]  ;;  %s7488_s19 = sshll.u32 %s7559_s17, 4  ;;  %s7489_s19 = int_to_ptr.vmem [resolvable:$false] %s7488_s19 }
  0x20   : > { %v251_v16 = vrot.slane %v237_v11, %v7642_v8  ;;  %v7175_v17 = vld.sshfl [vmem:[%s7647_s7 + $0xc] sm:$0x33 pattern:$0x75316420]  ;;  %v291_v20 = vrot.slane %v7174_v15, %v7642_v8  ;;  %s7490_s24 = scalar_lea.vmem %s7489_s19, 4096 }
  0x21   : > { %v275_v18 = vrot.slane %v261_v13, %v7642_v8  ;;  %v7176_v19 = vld.sshfl [vmem:[%s7647_s7 + $0x10] sm:$0x33 pattern:$0x75316420]  ;;  %v299_v21 = vcombine.high %v7175_v17, %v7175_v17  ;;  %v306_v22 = vrot.slane %v7175_v17, %v7642_v8 }
  0x22   : > { %v858_v23 = vcombine.low %v244_v12, %v251_v16  ;;  %v7203_v24 = vcombine.high %v244_v12, %v251_v16  ;;  %v323_v25 = vcombine.high %v7176_v19, %v7176_v19  ;;  %v330_v26 = vrot.slane %v7176_v19, %v7642_v8  ;;  %v7177_v35 = vld.sshfl [vmem:[%s7647_s7 + $0x14] sm:$0x1 pattern:$0x75316420] }
  0x23   : > { %v860_v27 = vcombine.low %v268_v14, %v275_v18  ;;  %v7204_v28 = vcombine.high %v268_v14, %v275_v18  ;;  %v313_v29 = vrot.slane %v299_v21, %v7642_v8  ;;  %v314_v30 = vcombine.high %v306_v22, %v306_v22  ;;  %v7178_v40 = vld.sshfl [vmem:[%s7647_s7 + $0x18] sm:$0x33 pattern:$0x75316420] }
  0x24   : > { %v868_v31 = vrot.slane %v858_v23, %v7642_v8  ;;  %v875_v32 = vrot.slane %v7203_v24, %v7642_v8  ;;  %v337_v33 = vrot.slane %v323_v25, %v7642_v8  ;;  %v338_v34 = vcombine.high %v330_v26, %v330_v26  ;;  %v7179_v44 = vld.sshfl [vmem:[%s7647_s7 + $0x1c] sm:$0x33 pattern:$0x75316420] }
  0x25   : > { %v882_v36 = vrot.slane %v860_v27, %v7642_v8  ;;  %v889_v37 = vrot.slane %v7204_v28, %v7642_v8  ;;  %v315_v38 = vcombine.high %v313_v29, %v313_v29  ;;  %v907_v39 = vcombine.low %v291_v20, %v306_v22  ;;  %v7180_v54 = vld.sshfl [vmem:[%s7647_s7 + $0x20] sm:$0x1 pattern:$0x75316420] }
  0x26   : > { %v890_v41 = vcombine.low %v868_v31, %v875_v32  ;;  %v908_v42 = vcombine.low %v313_v29, %v314_v30  ;;  %v910_v43 = vcombine.low %v337_v33, %v338_v34  ;;  %v339_v45 = vcombine.high %v337_v33, %v337_v33  ;;  %v7181_v63 = vld.sshfl [vmem:[%s7647_s7 + $0x24] sm:$0x33 pattern:$0x75316420] }
  0x27   : > { %v891_v46 = vcombine.low %v882_v36, %v889_v37  ;;  %v909_v47 = vcombine.low %v315_v38, %v330_v26  ;;  %v917_v48 = vrot.slane %v907_v39, %v7642_v8  ;;  %v353_v49 = vrot.slane %v7177_v35, %v7642_v8  ;;  %v7182_v3 = vld.sshfl [vmem:[%s7647_s7 + $0x28] sm:$0x33 pattern:$0x75316420] }
  0x28   : > { %v898_v50 = vrot.slane %v890_v41, %v7642_v8  ;;  %v924_v51 = vrot.slane %v908_v42, %v7642_v8  ;;  %v938_v52 = vrot.slane %v910_v43, %v7642_v8  ;;  %v361_v53 = vcombine.high %v7178_v40, %v7178_v40  ;;  %v7183_v23 = vld.sshfl [vmem:[%s7647_s7 + $0x2c] sm:$0x1 pattern:$0x75316420] }
  0x29   : > { %v905_v55 = vrot.slane %v891_v46, %v7642_v8  ;;  %v931_v56 = vrot.slane %v909_v47, %v7642_v8  ;;  %v368_v57 = vrot.slane %v7178_v40, %v7642_v8  ;;  %v385_v58 = vcombine.high %v7179_v44, %v7179_v44  ;;  %v7184_v27 = vld.sshfl [vmem:[%s7647_s7 + $0x30] sm:$0x33 pattern:$0x75316420] }
  0x2a   : > { %v939_v59 = vcombine.low %v917_v48, %v924_v51  ;;  %v375_v60 = vrot.slane %v361_v53, %v7642_v8  ;;  %v392_v61 = vrot.slane %v7179_v44, %v7642_v8  ;;  %v956_v62 = vcombine.low %v339_v45, %v353_v49  ;;  %v7185_v37 = vld.sshfl [vmem:[%s7647_s7 + $0x34] sm:$0x33 pattern:$0x75316420] }
  0x2b   : > { %v7682_v0 = vcombine.low %v898_v50, %v905_v55  ;;  %v940_v1 = vcombine.low %v931_v56, %v938_v52  ;;  %v399_v2 = vrot.slane %v385_v58, %v7642_v8  ;;  %v415_v4 = vrot.slane %v7180_v54, %v7642_v8  ;;  %v7186_v46 = vld.sshfl [vmem:[%s7647_s7 + $0x38] sm:$0x1 pattern:$0x75316420] }
  0x2c   : > { %v947_v5 = vrot.slane %v939_v59, %v7642_v8  ;;  %v957_v7 = vcombine.low %v368_v57, %v375_v60  ;;  %v7205_v9 = vcombine.high %v368_v57, %v375_v60  ;;  %v966_v10 = vrot.slane %v956_v62, %v7642_v8  ;;  %v7187_v50 = vld.sshfl [vmem:[%s7647_s7 + $0x3c] sm:$0x33 pattern:$0x75316420] }
  0x2d   : > { %7324 = vmatprep.mubr.msk.bf16.mxu0 %vm1412_vm1, %v7682_v0  ;;  %v954_v11 = vrot.slane %v940_v1, %v7642_v8  ;;  %v959_v12 = vcombine.low %v392_v61, %v399_v2  ;;  %v423_v13 = vcombine.high %v7181_v63, %v7181_v63  ;;  %v430_v14 = vrot.slane %v7181_v63, %v7642_v8 }
  0x2e   : > { %v973_v15 = vrot.slane %v957_v7, %v7642_v8  ;;  %v980_v16 = vrot.slane %v7205_v9, %v7642_v8  ;;  %v454_v17 = vrot.slane %v7182_v3, %v7642_v8  ;;  %v7206_v18 = vcombine.high %v392_v61, %v399_v2  ;;  %7350 = vmatprep.mubr.msk.bf16.mxu1 %vm1412_vm1, %v7682_v0 }
  0x2f   : > { %v7698_v19 = vcombine.low %v947_v5, %v954_v11  ;;  %v987_v20 = vrot.slane %v959_v12, %v7642_v8  ;;  %v437_v21 = vrot.slane %v423_v13, %v7642_v8  ;;  %v438_v22 = vcombine.high %v430_v14, %v430_v14  ;;  %v7188_v5 = vld.sshfl [vmem:[%s7647_s7 + $0x40] sm:$0x33 pattern:$0x75316420] }
  0x30   : > { %v988_v24 = vcombine.low %v966_v10, %v973_v15  ;;  %v1006_v25 = vcombine.low %v415_v4, %v430_v14  ;;  %v1015_v26 = vrot.slane %v7206_v18, %v7642_v8  ;;  %v447_v28 = vcombine.high %v7182_v3, %v7182_v3  ;;  %v7189_v12 = vld.sshfl [vmem:[%s7647_s7 + $0x44] sm:$0x1 pattern:$0x75316420] }
  0x31   : > { %7325 = vmatmul.mubr.msk.bf16.vlgmr.msra.gmra.mrb[0].mxu0 %vm1412_vm1, %v7698_v19  ;;  %v989_v29 = vcombine.low %v980_v16, %v987_v20  ;;  %v439_v30 = vcombine.high %v437_v21, %v437_v21  ;;  %v1007_v31 = vcombine.low %v437_v21, %v438_v22  ;;  %v462_v32 = vcombine.high %v454_v17, %v454_v17 }
  0x32   : > { %v996_v33 = vrot.slane %v988_v24, %v7642_v8  ;;  %v1022_v34 = vrot.slane %v1006_v25, %v7642_v8  ;;  %v461_v35 = vrot.slane %v447_v28, %v7642_v8  ;;  %v477_v36 = vrot.slane %v7183_v23, %v7642_v8 }
  0x33   : > { %v1003_v38 = vrot.slane %v989_v29, %v7642_v8  ;;  %v1008_v39 = vcombine.low %v439_v30, %v454_v17  ;;  %v1029_v40 = vrot.slane %v1007_v31, %v7642_v8  ;;  %v485_v41 = vcombine.high %v7184_v27, %v7184_v27  ;;  %v7190_v17 = vld.sshfl [vmem:[%s7647_s7 + $0x48] sm:$0x33 pattern:$0x75316420] }
  0x34   : > { %v1037_v42 = vcombine.low %v1015_v26, %v1022_v34  ;;  %v463_v43 = vcombine.high %v461_v35, %v461_v35  ;;  %v492_v44 = vrot.slane %v7184_v27, %v7642_v8  ;;  %v1054_v45 = vcombine.low %v461_v35, %v462_v32  ;;  %v7191_v31 = vld.sshfl [vmem:[%s7647_s7 + $0x4c] sm:$0x33 pattern:$0x75316420] }
  0x35   : > { %v7716_v47 = vcombine.low %v996_v33, %v1003_v38  ;;  %v1036_v48 = vrot.slane %v1008_v39, %v7642_v8  ;;  %v499_v49 = vrot.slane %v485_v41, %v7642_v8  ;;  %v509_v51 = vcombine.high %v7185_v37, %v7185_v37  ;;  %v7193_v41 = vld.sshfl [vmem:[%s7647_s7 + $0x54] sm:$0x33 pattern:$0x75316420] }
  0x36   : > { %v1045_v52 = vrot.slane %v1037_v42, %v7642_v8  ;;  %v1055_v53 = vcombine.low %v463_v43, %v477_v36  ;;  %v1064_v54 = vrot.slane %v1054_v45, %v7642_v8  ;;  %v516_v55 = vrot.slane %v7185_v37, %v7642_v8  ;;  %v7192_v36 = vld.sshfl [vmem:[%s7647_s7 + $0x50] sm:$0x1 pattern:$0x75316420] }
  0x37   : > { %7328 = vmatprep.mubr.msk.bf16.mxu0 %vm1412_vm1, %v7716_v47  ;;  %v1038_v56 = vcombine.low %v1029_v40, %v1036_v48  ;;  %v1056_v57 = vcombine.low %v492_v44, %v499_v49  ;;  %v7207_v58 = vcombine.high %v492_v44, %v499_v49  ;;  %v523_v59 = vrot.slane %v509_v51, %v7642_v8 }
  0x38   : > { %v1071_v60 = vrot.slane %v1055_v53, %v7642_v8  ;;  %v539_v61 = vrot.slane %v7186_v46, %v7642_v8  ;;  %v547_v62 = vcombine.high %v7187_v50, %v7187_v50  ;;  %v554_v63 = vrot.slane %v7187_v50, %v7642_v8 }
  0x39   : > { %v1052_v1 = vrot.slane %v1038_v56, %v7642_v8  ;;  %v1078_v2 = vrot.slane %v1056_v57, %v7642_v8  ;;  %v1085_v3 = vrot.slane %v7207_v58, %v7642_v8  ;;  %v1103_v4 = vcombine.low %v516_v55, %v523_v59 }
  0x3a   : > { %v1086_v7 = vcombine.low %v1064_v54, %v1071_v60  ;;  %v561_v9 = vrot.slane %v547_v62, %v7642_v8  ;;  %v562_v10 = vcombine.high %v554_v63, %v554_v63  ;;  %v7208_v11 = vcombine.high %v516_v55, %v523_v59 }
  0x3b   : > { %v7736_v13 = vcombine.low %v1045_v52, %v1052_v1  ;;  %v1087_v14 = vcombine.low %v1078_v2, %v1085_v3  ;;  %v1105_v15 = vcombine.low %v539_v61, %v554_v63  ;;  %v1113_v16 = vrot.slane %v1103_v4, %v7642_v8  ;;  %v7194_v63 = vld.sshfl [vmem:[%s7647_s7 + $0x58] sm:$0x33 pattern:$0x75316420] }
  0x3c   : > { %v1094_v18 = vrot.slane %v1086_v7, %v7642_v8  ;;  %v1106_v20 = vcombine.low %v561_v9, %v562_v10  ;;  %v1120_v21 = vrot.slane %v7208_v11, %v7642_v8  ;;  %v563_v22 = vcombine.high %v561_v9, %v561_v9  ;;  %v7195_v3 = vld.sshfl [vmem:[%s7647_s7 + $0x5c] sm:$0x1 pattern:$0x75316420] }
  0x3d   : > { %7329 = vmatmul.mubr.msk.bf16.gmra.mrb[4].mxu0 %vm1412_vm1, %v7736_v13  ;;  %v1101_v23 = vrot.slane %v1087_v14, %v7642_v8  ;;  %v1127_v24 = vrot.slane %v1105_v15, %v7642_v8  ;;  %v571_v25 = vcombine.high %v7188_v5, %v7188_v5  ;;  %v578_v26 = vrot.slane %v7188_v5, %v7642_v8 }
  0x3e   : > { %v1134_v27 = vrot.slane %v1106_v20, %v7642_v8  ;;  %v1135_v28 = vcombine.low %v1113_v16, %v1120_v21  ;;  %v601_v29 = vrot.slane %v7189_v12, %v7642_v8  ;;  %v609_v30 = vcombine.high %v7190_v17, %v7190_v17 }
  0x3f   : > { %v7750_v32 = vcombine.low %v1094_v18, %v1101_v23  ;;  %v585_v33 = vrot.slane %v571_v25, %v7642_v8  ;;  %v586_v34 = vcombine.high %v578_v26, %v578_v26  ;;  %v616_v35 = vrot.slane %v7190_v17, %v7642_v8  ;;  %v7196_v17 = vld.sshfl [vmem:[%s7647_s7 + $0x60] sm:$0x33 pattern:$0x75316420] }
  0x40   : > { %v1136_v37 = vcombine.low %v1127_v24, %v1134_v27  ;;  %v1143_v38 = vrot.slane %v1135_v28, %v7642_v8  ;;  %v623_v39 = vrot.slane %v609_v30, %v7642_v8  ;;  %v1152_v40 = vcombine.low %v563_v22, %v578_v26  ;;  %v7197_v27 = vld.sshfl [vmem:[%s7647_s7 + $0x64] sm:$0x33 pattern:$0x75316420] }
  0x41   : > { %7332 = vmatprep.mubr.msk.bf16.mxu0 %vm1412_vm1, %v7750_v32  ;;  %v587_v42 = vcombine.high %v585_v33, %v585_v33  ;;  %v1153_v43 = vcombine.low %v585_v33, %v586_v34  ;;  %v633_v44 = vcombine.high %v7191_v31, %v7191_v31  ;;  %v640_v45 = vrot.slane %v7191_v31, %v7642_v8 }
  0x42   : > { %v1150_v46 = vrot.slane %v1136_v37, %v7642_v8  ;;  %v1155_v48 = vcombine.low %v616_v35, %v623_v39  ;;  %v1162_v49 = vrot.slane %v1152_v40, %v7642_v8  ;;  %v663_v50 = vrot.slane %v7192_v36, %v7642_v8  ;;  %v7198_v37 = vld.sshfl [vmem:[%s7647_s7 + $0x68] sm:$0x1 pattern:$0x75316420] }
  0x43   : > { %v1154_v51 = vcombine.low %v587_v42, %v601_v29  ;;  %v1169_v52 = vrot.slane %v1153_v43, %v7642_v8  ;;  %v647_v53 = vrot.slane %v633_v44, %v7642_v8  ;;  %v678_v54 = vrot.slane %v7193_v41, %v7642_v8  ;;  %v7199_v42 = vld.sshfl [vmem:[%s7647_s7 + $0x6c] sm:$0x33 pattern:$0x75316420] }
  0x44   : > { %v7767_v55 = vcombine.low %v1143_v38, %v1150_v46  ;;  %v1183_v56 = vrot.slane %v1155_v48, %v7642_v8  ;;  %v7209_v57 = vcombine.high %v616_v35, %v623_v39  ;;  %v671_v58 = vcombine.high %v7193_v41, %v7193_v41 }
  0x45   : > { %v1176_v59 = vrot.slane %v1154_v51, %v7642_v8  ;;  %v1184_v60 = vcombine.low %v1162_v49, %v1169_v52  ;;  %v1202_v61 = vcombine.low %v640_v45, %v647_v53  ;;  %v7210_v62 = vcombine.high %v640_v45, %v647_v53  ;;  %v7200_v51 = vld.sshfl [vmem:[%s7647_s7 + $0x70] sm:$0x33 pattern:$0x75316420] }
  0x46   : > { %7333 = vmatmul.mubr.msk.bf16.gmra.mrb[8].mxu0 %vm1412_vm1, %v7767_v55  ;;  %v1204_v1 = vcombine.low %v663_v50, %v678_v54  ;;  %v1211_v2 = vrot.slane %v7209_v57, %v7642_v8  ;;  %v685_v4 = vrot.slane %v671_v58, %v7642_v8  ;;  %v686_v5 = vcombine.high %v678_v54, %v678_v54 }
  0x47   : > { %v1185_v7 = vcombine.low %v1176_v59, %v1183_v56  ;;  %v1192_v9 = vrot.slane %v1184_v60, %v7642_v8  ;;  %v1218_v10 = vrot.slane %v1202_v61, %v7642_v8  ;;  %v1225_v11 = vrot.slane %v7210_v62, %v7642_v8 }
  0x48   : > { %v1232_v12 = vrot.slane %v1204_v1, %v7642_v8  ;;  %v687_v14 = vcombine.high %v685_v4, %v685_v4  ;;  %v695_v15 = vcombine.high %v7194_v63, %v7194_v63  ;;  %v702_v16 = vrot.slane %v7194_v63, %v7642_v8 }
  0x49   : > { %v1199_v18 = vrot.slane %v1185_v7, %v7642_v8  ;;  %v1233_v20 = vcombine.low %v1211_v2, %v1218_v10  ;;  %v725_v21 = vrot.slane %v7195_v3, %v7642_v8  ;;  %v1250_v22 = vcombine.low %v685_v4, %v686_v5 }
  0x4a   : > { %v1234_v23 = vcombine.low %v1225_v11, %v1232_v12  ;;  %v709_v24 = vrot.slane %v695_v15, %v7642_v8  ;;  %v710_v25 = vcombine.high %v702_v16, %v702_v16  ;;  %v1251_v26 = vcombine.low %v687_v14, %v702_v16  ;;  %v7201_v14 = vld.sshfl [vmem:[%s7647_s7 + $0x74] sm:$0x1 pattern:$0x75316420]  ;;  %s7104_s7 = sshll.u32 %s8868_s25, 4  ;;  %s10990_s7 = int_to_ptr.vmem [resolvable:$true] %s7104_s7 }
  0x4b   : > { %v7787_v28 = vcombine.low %v1192_v9, %v1199_v18  ;;  %v1241_v29 = vrot.slane %v1233_v20, %v7642_v8  ;;  %v1260_v30 = vrot.slane %v1250_v22, %v7642_v8  ;;  %v733_v31 = vcombine.high %v7196_v17, %v7196_v17  ;;  %s7484_s16 = scalar_lea.vmem %s10990_s7, 2048  ;;  %p7491_p0 = scmp.lt.s32.totalorder %s10990_s7, %s7489_s19 }
  0x4c   : > { %v1248_v33 = vrot.slane %v1234_v23, %v7642_v8  ;;  %v711_v34 = vcombine.high %v709_v24, %v709_v24  ;;  %v1252_v35 = vcombine.low %v709_v24, %v710_v25  ;;  %v1267_v36 = vrot.slane %v1251_v26, %v7642_v8  ;;  %p7485_p11 = scmp.ne.s32.totalorder %s10990_s7, %s7484_s16  ;;  %p7492_p1 = scmp.lt.s32.totalorder %s7490_s24, %s7484_s16 }
  0x4d   : > { %7336 = vmatprep.mubr.msk.bf16.mxu0 %vm1412_vm1, %v7787_v28  ;;  %v740_v38 = vrot.slane %v7196_v17, %v7642_v8  ;;  %v747_v39 = vrot.slane %v733_v31, %v7642_v8  ;;  %v757_v40 = vcombine.high %v7197_v27, %v7197_v27  ;;  %v764_v41 = vrot.slane %v7197_v27, %v7642_v8 }
  0x4e   : > { %v7800_v43 = vcombine.low %v1241_v29, %v1248_v33  ;;  %v1253_v44 = vcombine.low %v711_v34, %v725_v21  ;;  %v1274_v45 = vrot.slane %v1252_v35, %v7642_v8  ;;  %v1282_v46 = vcombine.low %v1260_v30, %v1267_v36  ;;  %p7486_p12 = pnand %p7485_p11, %p7619_p5  ;;  %p7493_p2 = por %p7492_p1, %p7491_p0 }
  0x4f   : > { %v771_v48 = vrot.slane %v757_v40, %v7642_v8  ;;  %v1299_v49 = vcombine.low %v740_v38, %v747_v39  ;;  %v7211_v50 = vcombine.high %v740_v38, %v747_v39  ;;  %v787_v52 = vrot.slane %v7198_v37, %v7642_v8 }
  0x50   : > { %7337 = vmatmul.mubr.msk.bf16.gmra.mrb[12].mxu0 %vm1412_vm1, %v7800_v43  ;;  %v1281_v53 = vrot.slane %v1253_v44, %v7642_v8  ;;  %v1290_v54 = vrot.slane %v1282_v46, %v7642_v8  ;;  %v795_v56 = vcombine.high %v7199_v42, %v7199_v42  ;;  %v802_v57 = vrot.slane %v7199_v42, %v7642_v8  ;;  %p7487_p13 = pneg %p7486_p12 }
  0x51   : > { %v1301_v58 = vcombine.low %v764_v41, %v771_v48  ;;  %v7212_v59 = vcombine.high %v764_v41, %v771_v48  ;;  %v1309_v60 = vrot.slane %v1299_v49, %v7642_v8  ;;  %v1316_v61 = vrot.slane %v7211_v50, %v7642_v8 }
  0x52   : > { %v1283_v62 = vcombine.low %v1274_v45, %v1281_v53  ;;  %v809_v63 = vrot.slane %v795_v56, %v7642_v8  ;;  %v810_v1 = vcombine.high %v802_v57, %v802_v57  ;;  %v819_v2 = vcombine.high %v7200_v51, %v7200_v51  ;;  %p7494_p3 = pnand %p7493_p2, %p7487_p13 }
  0x53   : > { %v1323_v3 = vrot.slane %v1301_v58, %v7642_v8  ;;  %v1330_v4 = vrot.slane %v7212_v59, %v7642_v8  ;;  %v1331_v5 = vcombine.low %v1309_v60, %v1316_v61  ;;  %v826_v7 = vrot.slane %v7200_v51, %v7642_v8 }
  0x54   : > { %v1297_v9 = vrot.slane %v1283_v62, %v7642_v8  ;;  %v811_v10 = vcombine.high %v809_v63, %v809_v63  ;;  %v833_v11 = vrot.slane %v819_v2, %v7642_v8  ;;  %v1348_v12 = vcombine.low %v787_v52, %v802_v57 }
  0x55   : > { %v1332_v15 = vcombine.low %v1323_v3, %v1330_v4  ;;  %v1339_v16 = vrot.slane %v1331_v5, %v7642_v8  ;;  %v834_v17 = vcombine.high %v826_v7, %v826_v7  ;;  %v1349_v18 = vcombine.low %v809_v63, %v810_v1 }
  0x56   : > { %v7821_v20 = vcombine.low %v1290_v54, %v1297_v9  ;;  %v1350_v21 = vcombine.low %v811_v10, %v826_v7  ;;  %v1358_v22 = vrot.slane %v1348_v12, %v7642_v8  ;;  %v835_v23 = vcombine.high %v833_v11, %v833_v11 }
  0x57   : > { %v1346_v24 = vrot.slane %v1332_v15, %v7642_v8  ;;  %v1351_v25 = vcombine.low %v833_v11, %v834_v17  ;;  %v1365_v26 = vrot.slane %v1349_v18, %v7642_v8  ;;  %v849_v27 = vrot.slane %v7201_v14, %v7642_v8 }
  0x58   : > { %7340 = vmatprep.mubr.msk.bf16.mxu0 %vm1412_vm1, %v7821_v20  ;;  %v1372_v29 = vrot.slane %v1350_v21, %v7642_v8 }
  0x59   : > { %v1347_v30 = vcombine.low %v1339_v16, %v1346_v24  ;;  %v1379_v31 = vrot.slane %v1351_v25, %v7642_v8  ;;  %v1380_v33 = vcombine.low %v1358_v22, %v1365_v26  ;;  %v1397_v34 = vcombine.low %v835_v23, %v849_v27 }
  0x5b   : > { %7341 = vmatmul.mubr.msk.bf16.gmra.mrb[16].mxu0 %vm1412_vm1, %v1347_v30  ;;  %v1381_v35 = vcombine.low %v1372_v29, %v1379_v31  ;;  %v1388_v36 = vrot.slane %v1380_v33, %v7642_v8  ;;  %v1404_v37 = vrot.slane %v1397_v34, %v7642_v8 }
  0x5d   : > { %v1395_v38 = vrot.slane %v1381_v35, %v7642_v8  ;;  %v1411_v40 = vrot.slane %v1404_v37, %v7642_v8 }
  0x5f   : > { %v1396_v39 = vcombine.low %v1388_v36, %v1395_v38 }
  0x61   : > { %7344 = vmatprep.mubr.msk.bf16.mxu0 %vm1412_vm1, %v1396_v39 }
  0x63   : > { %7345 = vmatmul.mubr.msk.bf16.gmra.mrb[20].mxu0 %vm1412_vm1, %v1411_v40 }
  0x64   : > { %7376 = vmatprep.mubr.msk.bf16.mxu0 %vm1412_vm1, %v7682_v0 }
  0x88   : > { %v4242_v41 = vpop.permute.xlu1 %4241  ;;  %v2661_v42 = vpop.permute.xlu0 %2660 }
  0x89   : > { %7427 = vmatprep.subr.msk.bf16.mxu1 %vm1449_vm0, %v2661_v42  ;;  %7428 = vmatprep.subr.msk.bf16.mxu0 %vm1449_vm0, %v4242_v41  ;;  %v2663_v44 = vsel %vm1449_vm0, %v2661_v42, 0  ;;  %v4244_v45 = vsel %vm1449_vm0, %v4242_v41, 0 }
  0x8a   : > { %7349 = vmatpush3.bf16.msra.mxu1 %v2663_v44  ;;  %7375 = vmatpush3.bf16.msra.mxu0 %v4244_v45 }
  0x8c   : > { %v5518_v8 = vpop.permute.xlu0 %5517 }
  0x8d   : > { %7351 = vmatmul.mubr.msk.bf16.vlgmr.msra.gmra.mrb[0].mxu1 %vm1412_vm1, %v7698_v19  ;;  %7377 = vmatmul.mubr.msk.bf16.vlgmr.msra.gmra.mrb[24].mxu0 %vm1412_vm1, %v7698_v19  ;;  %v5520_v46 = vsel %vm1449_vm0, %v5518_v8, 0 }
  0x8e   : > { %7380 = vmatprep.mubr.msk.bf16.mxu0 %vm1412_vm1, %v7716_v47  ;;  %7354 = vmatprep.mubr.msk.bf16.mxu1 %vm1412_vm1, %v7716_v47 }
  0x8f   : > { %7429 = vmatprep.subr.msk.bf16.mxu1 %vm1449_vm0, %v5518_v8 }
  0x90   : > { %7401 = vmatpush3.bf16.msra.mxu1 %v5520_v46 }
  0x95   : > { %7381 = vmatmul.mubr.msk.bf16.gmra.mrb[28].mxu0 %vm1412_vm1, %v7736_v13  ;;  %7355 = vmatmul.mubr.msk.bf16.gmra.mrb[4].mxu1 %vm1412_vm1, %v7736_v13 }
  0x96   : > { %7384 = vmatprep.mubr.msk.bf16.mxu0 %vm1412_vm1, %v7750_v32  ;;  %7358 = vmatprep.mubr.msk.bf16.mxu1 %vm1412_vm1, %v7750_v32 }
  0x9d   : > { %7385 = vmatmul.mubr.msk.bf16.gmra.mrb[32].mxu0 %vm1412_vm1, %v7767_v55  ;;  %7359 = vmatmul.mubr.msk.bf16.gmra.mrb[8].mxu1 %vm1412_vm1, %v7767_v55 }
  0x9e   : > { %7388 = vmatprep.mubr.msk.bf16.mxu0 %vm1412_vm1, %v7787_v28  ;;  %7362 = vmatprep.mubr.msk.bf16.mxu1 %vm1412_vm1, %v7787_v28 }
  0xa5   : > { %7389 = vmatmul.mubr.msk.bf16.gmra.mrb[36].mxu0 %vm1412_vm1, %v7800_v43  ;;  %7363 = vmatmul.mubr.msk.bf16.gmra.mrb[12].mxu1 %vm1412_vm1, %v7800_v43 }
  0xa6   : > { %7392 = vmatprep.mubr.msk.bf16.mxu0 %vm1412_vm1, %v7821_v20  ;;  %7366 = vmatprep.mubr.msk.bf16.mxu1 %vm1412_vm1, %v7821_v20 }
  0xad   : > { %7393 = vmatmul.mubr.msk.bf16.gmra.mrb[40].mxu0 %vm1412_vm1, %v1347_v30  ;;  %7367 = vmatmul.mubr.msk.bf16.gmra.mrb[16].mxu1 %vm1412_vm1, %v1347_v30 }
  0xae   : > { %7370 = vmatprep.mubr.msk.bf16.mxu1 %vm1412_vm1, %v1396_v39  ;;  %7396 = vmatprep.mubr.msk.bf16.mxu0 %vm1412_vm1, %v1396_v39 }
  0xb5   : > { %7371 = vmatmul.mubr.msk.bf16.gmra.mrb[20].mxu1 %vm1412_vm1, %v1411_v40  ;;  %7397 = vmatmul.mubr.msk.bf16.gmra.mrb[44].mxu0 %vm1412_vm1, %v1411_v40 }
  0xb6   : > { %7402 = vmatprep.mubr.msk.bf16.mxu1 %vm1412_vm1, %v7682_v0  ;;  %v7552_v0 = vmov 1983009808  }
  0xbd   : > { %7403 = vmatmul.mubr.msk.bf16.vlgmr.msra.gmra.mrb[24].mxu1 %vm1412_vm1, %v7698_v19  ;;  %v1602_v19 = vunpack.c.l.s4 %v7552_v0 }
  0xbe   : > { %7406 = vmatprep.mubr.msk.bf16.mxu1 %vm1412_vm1, %v7716_v47 }
  0xbf   : > { %v1603_v47 = vunpack.c.0.s8 %v1602_v19 }
  0xc5   : > { %7407 = vmatmul.mubr.msk.bf16.gmra.mrb[28].mxu1 %vm1412_vm1, %v7736_v13  ;;  %v7906_v13 = vsub.s32 %v1603_v47, %v7638_v6 }
  0xc6   : > { %7410 = vmatprep.mubr.msk.bf16.mxu1 %vm1412_vm1, %v7750_v32 }
  0xcd   : > { %7411 = vmatmul.mubr.msk.bf16.gmra.mrb[32].mxu1 %vm1412_vm1, %v7767_v55 }
  0xce   : > { %7414 = vmatprep.mubr.msk.bf16.mxu1 %vm1412_vm1, %v7787_v28 }
  0xd5   : > { %7415 = vmatmul.mubr.msk.bf16.gmra.mrb[36].mxu1 %vm1412_vm1, %v7800_v43 }
  0xd6   : > { %7418 = vmatprep.mubr.msk.bf16.mxu1 %vm1412_vm1, %v7821_v20 }
  0xdd   : > { %7419 = vmatmul.mubr.msk.bf16.gmra.mrb[40].mxu1 %vm1412_vm1, %v1347_v30 }
  0xde   : > { %7422 = vmatprep.mubr.msk.bf16.mxu1 %vm1412_vm1, %v1396_v39 }
  0xe5   : > { %7423 = vmatmul.mubr.msk.bf16.gmra.mrb[44].mxu1 %vm1412_vm1, %v1411_v40 }
 0x104   : > { %v7326_v32 = vpop.f32.mrb[0].mxu0 }
 0x105   : > { %v1634_v55 = vcombine.high %v7326_v32, %v7326_v32  ;;  %v1641_v28 = vrot.slane %v7326_v32, %v7906_v13  ;;  %v1487_v43 = vpop.f32.mrb[1].mxu0 }
 0x106   : > { %v1600_v48 = vcombine.high %v1487_v43, %v1487_v43  ;;  %v1607_v49 = vrot.slane %v1487_v43, %v7906_v13  ;;  %v7327_v50 = vpop.f32.mrb[2].mxu0 }
 0x107   : > { %v1648_v51 = vrot.slane %v1634_v55, %v7906_v13  ;;  %v1649_v52 = vcombine.high %v1641_v28, %v1641_v28  ;;  %v1651_v53 = vcombine.high %v7327_v50, %v7327_v50  ;;  %v1490_v54 = vpop.f32.mrb[3].mxu0  ;;  %v1658_v6 = vrot.slane %v7327_v50, %v7906_v13 }
 0x108   : > { %v1614_v56 = vrot.slane %v1600_v48, %v7906_v13  ;;  %v1615_v57 = vcombine.high %v1607_v49, %v1607_v49  ;;  %v1617_v58 = vcombine.high %v1490_v54, %v1490_v54  ;;  %v1624_v2 = vrot.slane %v1490_v54, %v7906_v13 }
 0x109   : > { %v1947_v59 = vcombine.low %v1649_v52, %v1648_v51  ;;  %v1650_v60 = vcombine.high %v1648_v51, %v1648_v51  ;;  %v1665_v61 = vrot.slane %v1651_v53, %v7906_v13  ;;  %v1666_v1 = vcombine.high %v1658_v6, %v1658_v6 }
 0x10a   : > { %v1616_v62 = vcombine.high %v1614_v56, %v1614_v56  ;;  %v2412_v63 = vcombine.low %v1607_v49, %v1615_v57  ;;  %v1631_v4 = vrot.slane %v1617_v58, %v7906_v13  ;;  %v1632_v9 = vcombine.high %v1624_v2, %v1624_v2 }
 0x10b   : > { %v1948_v3 = vcombine.low %v1650_v60, %v1658_v6  ;;  %v1955_v5 = vrot.slane %v1947_v59, %v7906_v13  ;;  %v2452_v10 = vrot.slane %v1641_v28, %v7906_v13  ;;  %v1964_v15 = vcombine.low %v1666_v1, %v1665_v61 }
 0x10c   : > { %v2413_v7 = vcombine.low %v1614_v56, %v1616_v62  ;;  %v1633_v12 = vcombine.high %v1631_v4, %v1631_v4  ;;  %v2420_v14 = vrot.slane %v2412_v63, %v7906_v13  ;;  %v2429_v16 = vcombine.low %v1624_v2, %v1632_v9 }
 0x10d   : > { %v1962_v11 = vrot.slane %v1948_v3, %v7906_v13  ;;  %v2456_v24 = vrot.slane %v2452_v10, 1  ;;  %v1667_v30 = vcombine.high %v1665_v61, %v1665_v61  ;;  %v1972_v35 = vrot.slane %v1964_v15, %v7906_v13 }
 0x10e   : > { %v2427_v17 = vrot.slane %v2413_v7, %v7906_v13  ;;  %v2430_v18 = vcombine.low %v1631_v4, %v1633_v12  ;;  %v2437_v21 = vrot.slane %v2429_v16, %v7906_v13 }
 0x10f   : > { %v7921_v20 = vcombine.low %v1955_v5, %v1962_v11 }
 0x110   : > { %v7330_v22 = vpop.f32.mrb[4].mxu0  ;;  %v2428_v23 = vcombine.low %v2420_v14, %v2427_v17  ;;  %v2444_v29 = vrot.slane %v2430_v18, %v7906_v13 }
 0x111   : > { %v1702_v25 = vcombine.high %v7330_v22, %v7330_v22  ;;  %v1709_v26 = vrot.slane %v7330_v22, %v7906_v13  ;;  %v1503_v27 = vpop.f32.mrb[5].mxu0  ;;  %2526 = vrot.lane.b32.xlu1 %v7921_v20, %s7553_s9  ;;  %2348 = vrot.lane.b32.xlu0 %v7921_v20, %s7554_s10  ;;  %v2276_v19 = vrot.slane %v7921_v20, 1 }
 0x112   : > { %v1668_v31 = vcombine.high %v1503_v27, %v1503_v27  ;;  %v1675_v33 = vrot.slane %v1503_v27, %v7906_v13  ;;  %v7331_v34 = vpop.f32.mrb[6].mxu0  ;;  %v2445_v38 = vcombine.low %v2437_v21, %v2444_v29  ;;  %v2453_v8 = vrot.slane %v2428_v23, 1 }
 0x113   : > { %v7933_v36 = vrot.slane %v1702_v25, %v7906_v13  ;;  %v1717_v37 = vcombine.high %v1709_v26, %v1709_v26  ;;  %v1719_v39 = vcombine.high %v7331_v34, %v7331_v34  ;;  %v1506_v40 = vpop.f32.mrb[7].mxu0  ;;  %v1726_v45 = vrot.slane %v7331_v34, %v7906_v13 }
 0x114   : > { %v1682_v41 = vrot.slane %v1668_v31, %v7906_v13  ;;  %v1683_v42 = vcombine.high %v1675_v33, %v1675_v33  ;;  %v1965_v44 = vcombine.low %v1667_v30, %v1675_v33  ;;  %v2454_v46 = vrot.slane %v2445_v38, 1 }
 0x115   : > { %2522 = vrot.lane.b32.xlu1 %v2428_v23, %s7553_s9  ;;  %2524 = vrot.lane.b32.xlu0 %v2445_v38, %s7553_s9  ;;  %v1718_v0 = vcombine.high %v7933_v36, %v7933_v36  ;;  %v2006_v47 = vcombine.low %v1709_v26, %v1717_v37  ;;  %v1733_v28 = vrot.slane %v1719_v39, %v7906_v13 }
 0x116   : > { %v1979_v32 = vrot.slane %v1965_v44, %v7906_v13  ;;  %v1987_v55 = vrot.slane %v1683_v42, %v7906_v13  ;;  %v1684_v43 = vcombine.high %v1682_v41, %v1682_v41  ;;  %v1734_v48 = vcombine.high %v1726_v45, %v1726_v45 }
 0x117   : > { %v2029_v49 = vcombine.low %v1718_v0, %v1726_v45  ;;  %v1685_v50 = vcombine.high %v1506_v40, %v1506_v40  ;;  %v2028_v51 = vrot.slane %v7933_v36, %v7906_v13  ;;  %v1692_v52 = vrot.slane %v1506_v40, %v7906_v13 }
 0x118   : > { %v1980_v53 = vcombine.low %v1972_v35, %v1979_v32  ;;  %v2457_v54 = vsel %vm2275_vm2, %v2454_v46, %v2456_v24  ;;  %v2030_v56 = vcombine.low %v1734_v48, %v1733_v28  ;;  %v2455_v58 = vsel %vm2275_vm2, %v2453_v8, %v2454_v46 }
 0x119   : > { %v2037_v57 = vrot.slane %v2029_v49, %v7906_v13  ;;  %v1699_v6 = vrot.slane %v1685_v50, %v7906_v13  ;;  %v7334_v59 = vpop.f32.mrb[8].mxu0  ;;  %v1700_v60 = vcombine.high %v1692_v52, %v1692_v52  ;;  %v2279_v62 = vrot.slane %v1987_v55, 1 }
 0x11a   : > { %2528 = vrot.lane.b32.xlu0 %v1980_v53, %s7553_s9  ;;  %2350 = vrot.lane.b32.xlu1 %v1980_v53, %s7554_s10  ;;  %v2277_v61 = vrot.slane %v1980_v53, 1  ;;  %v1770_v63 = vcombine.high %v7334_v59, %v7334_v59  ;;  %v1519_v1 = vpop.f32.mrb[9].mxu0  ;;  %v1988_v2 = vcombine.low %v1682_v41, %v1684_v43  ;;  %v2044_v4 = vrot.slane %v2030_v56, %v7906_v13 }
 0x11b   : > { %v1701_v3 = vcombine.high %v1699_v6, %v1699_v6  ;;  %v1777_v5 = vrot.slane %v7334_v59, %v7906_v13  ;;  %v7335_v7 = vpop.f32.mrb[10].mxu0  ;;  %v1989_v9 = vcombine.low %v1692_v52, %v1700_v60  ;;  %v2020_v15 = vrot.slane %v2006_v47, %v7906_v13 }
 0x11c   : > { %v7957_v10 = vsel %vm2275_vm2, %v2277_v61, %v2279_v62  ;;  %v7960_v11 = vsel %vm2275_vm2, %v2276_v19, %v2277_v61  ;;  %v1784_v12 = vrot.slane %v1770_v63, %v7906_v13  ;;  %v1522_v14 = vpop.f32.mrb[11].mxu0  ;;  %v7964_v17 = vcombine.low %v2037_v57, %v2044_v4 }
 0x11d   : > { %v2005_v16 = vcombine.low %v1699_v6, %v1701_v3  ;;  %v1735_v18 = vcombine.high %v1733_v28, %v1733_v28  ;;  %v2003_v20 = vrot.slane %v1989_v9, %v7906_v13  ;;  %v1785_v21 = vcombine.high %v1777_v5, %v1777_v5 }
 0x11e   : > { %2460 = vrot.lane.b32.xlu0 %v2457_v54, %s7555_s11  ;;  %2458 = vrot.lane.b32.xlu1 %v2455_v58, %s7555_s11  ;;  %v1786_v22 = vcombine.high %v1784_v12, %v1784_v12  ;;  %v1736_v24 = vcombine.high %v1519_v1, %v1519_v1  ;;  %v1743_v25 = vrot.slane %v1519_v1, %v7906_v13  ;;  %v2284_v38 = vrot.slane %v2028_v51, 1 }
 0x11f   : > { %v2013_v23 = vrot.slane %v2005_v16, %v7906_v13  ;;  %v1996_v26 = vrot.slane %v1988_v2, %v7906_v13  ;;  %v2087_v27 = vcombine.low %v1777_v5, %v1785_v21  ;;  %v1787_v30 = vcombine.high %v7335_v7, %v7335_v7 }
 0x120   : > { %v2088_v29 = vcombine.low %v1784_v12, %v1786_v22  ;;  %v1794_v31 = vrot.slane %v7335_v7, %v7906_v13  ;;  %v7974_v34 = vrot.slane %v1736_v24, %v7906_v13  ;;  %v1751_v35 = vcombine.high %v1743_v25, %v1743_v25 }
 0x121   : > { %v2021_v33 = vcombine.low %v2013_v23, %v2020_v15  ;;  %v2046_v36 = vcombine.low %v1735_v18, %v1743_v25  ;;  %v7980_v37 = vcombine.low %v1996_v26, %v2003_v20  ;;  %v2095_v39 = vrot.slane %v2087_v27, %v7906_v13 }
 0x122   : > { %2464 = vrot.lane.b32.xlu0 %v7957_v10, %s7555_s11  ;;  %2356 = vrot.lane.b32.xlu1 %v7964_v17, %s7554_s10  ;;  %v2047_v40 = vcombine.low %v1751_v35, %v7974_v34  ;;  %v1801_v45 = vrot.slane %v1787_v30, %v7906_v13  ;;  %v1802_v8 = vcombine.high %v1794_v31, %v1794_v31  ;;  %v2286_v51 = vrot.slane %v7964_v17, 1 }
 0x123   : > { %v2054_v41 = vrot.slane %v2046_v36, %v7906_v13  ;;  %v2282_v42 = vrot.slane %v2021_v33, 1  ;;  %v7338_v44 = vpop.f32.mrb[12].mxu0  ;;  %v1753_v46 = vcombine.high %v1522_v14, %v1522_v14  ;;  %v1760_v0 = vrot.slane %v1522_v14, %v7906_v13 }
 0x124   : > { %v1535_v19 = vpop.f32.mrb[13].mxu0  ;;  %v2061_v32 = vrot.slane %v2047_v40, %v7906_v13  ;;  %v2281_v55 = vrot.slane %v7980_v37, 1  ;;  %v2102_v28 = vrot.slane %v2088_v29, %v7906_v13  ;;  %v1752_v48 = vcombine.high %v7974_v34, %v7974_v34 }
 0x125   : > { %v7988_v47 = vsel %vm2275_vm2, %v2282_v42, %v2284_v38  ;;  %v7339_v43 = vpop.f32.mrb[14].mxu0  ;;  %v2110_v49 = vrot.slane %v1794_v31, %v7906_v13  ;;  %v1767_v50 = vrot.slane %v1753_v46, %v7906_v13  ;;  %v2111_v53 = vcombine.low %v1802_v8, %v1801_v45 }
 0x126   : > { %11118 = vst [vmem:[#allocation5_spill] sm:$0xff] %v7988_v47  ;;  %2462 = vrot.lane.b32.xlu1 %v7960_v11, %s7555_s11  ;;  %2354 = vrot.lane.b32.xlu0 %v2021_v33, %s7554_s10  ;;  %v1538_v52 = vpop.f32.mrb[15].mxu0  ;;  %v1768_v54 = vcombine.high %v1760_v0, %v1760_v0  ;;  %v8001_v56 = vcombine.low %v2054_v41, %v2061_v32 }
 0x127   : > { %v8004_v57 = vsel %vm2275_vm2, %v2281_v55, %v2282_v42  ;;  %v1769_v6 = vcombine.high %v1767_v50, %v1767_v50  ;;  %v8006_v58 = vcombine.low %v2095_v39, %v2102_v28  ;;  %v1838_v59 = vcombine.high %v7338_v44, %v7338_v44 }
 0x128   : > { %11119 = vst [vmem:[#allocation6_spill] sm:$0xff] %v8004_v57  ;;  %v1845_v60 = vrot.slane %v7338_v44, %v7906_v13  ;;  %v2070_v61 = vcombine.low %v1760_v0, %v1768_v54  ;;  %v2287_v62 = vrot.slane %v8001_v56, 1  ;;  %v1803_v63 = vcombine.high %v1801_v45, %v1801_v45 }
 0x129   : > { %v1804_v1 = vcombine.high %v1535_v19, %v1535_v19  ;;  %v2071_v2 = vcombine.low %v1767_v50, %v1769_v6  ;;  %v1852_v3 = vrot.slane %v1838_v59, %v7906_v13  ;;  %v2294_v5 = vrot.slane %v2110_v49, 1 }
 0x12a   : > { %2534 = vrot.lane.b32.xlu1 %v7964_v17, %s7553_s9  ;;  %2532 = vrot.lane.b32.xlu0 %v2021_v33, %s7553_s9  ;;  %v1853_v4 = vcombine.high %v1845_v60, %v1845_v60  ;;  %v2078_v7 = vrot.slane %v2070_v61, %v7906_v13  ;;  %v8016_v9 = vsel %vm2275_vm2, %v2286_v51, %v2287_v62  ;;  %v2292_v17 = vrot.slane %v8006_v58, 1 }
 0x12b   : > { %v1811_v12 = vrot.slane %v1535_v19, %v7906_v13  ;;  %v1854_v14 = vcombine.high %v1852_v3, %v1852_v3  ;;  %v1818_v15 = vrot.slane %v1804_v1, %v7906_v13  ;;  %v2085_v16 = vrot.slane %v2071_v2, %v7906_v13 }
 0x12c   : > { %v1855_v21 = vcombine.high %v7339_v43, %v7339_v43  ;;  %v1862_v22 = vrot.slane %v7339_v43, %v7906_v13  ;;  %v2153_v23 = vcombine.low %v1845_v60, %v1853_v4  ;;  %v2069_v33 = vrot.slane %v1752_v48, %v7906_v13 }
 0x12d   : > { %v1819_v18 = vcombine.high %v1811_v12, %v1811_v12  ;;  %v2112_v20 = vcombine.low %v1803_v63, %v1811_v12  ;;  %v2169_v24 = vcombine.low %v1852_v3, %v1854_v14  ;;  %v8028_v27 = vcombine.low %v2078_v7, %v2085_v16 }
 0x12e   : > { %2352 = vrot.lane.b32.xlu1 %v7980_v37, %s7554_s10  ;;  %2468 = vrot.lane.b32.xlu0 %v7988_v47, %s7555_s11  ;;  %v7342_v25 = vpop.f32.mrb[16].mxu0  ;;  %v1869_v29 = vrot.slane %v1855_v21, %v7906_v13  ;;  %v1870_v30 = vcombine.high %v1862_v22, %v1862_v22  ;;  %v1820_v34 = vcombine.high %v1818_v15, %v1818_v15  ;;  %v2289_v45 = vrot.slane %v2069_v33, 1 }
 0x12f   : > { %v2126_v26 = vrot.slane %v2112_v20, %v7906_v13  ;;  %v1551_v31 = vpop.f32.mrb[17].mxu0  ;;  %v1821_v35 = vcombine.high %v1538_v52, %v1538_v52  ;;  %v1828_v36 = vrot.slane %v1538_v52, %v7906_v13  ;;  %v2128_v39 = vcombine.low %v1819_v18, %v1818_v15 }
 0x130   : > { %v7343_v38 = vpop.f32.mrb[18].mxu0  ;;  %v2170_v40 = vcombine.low %v1862_v22, %v1870_v30  ;;  %v8034_v41 = vsel %vm2275_vm2, %v2292_v17, %v2294_v5  ;;  %v2119_v42 = vrot.slane %v2111_v53, %v7906_v13  ;;  %v2167_v0 = vrot.slane %v2153_v23, %v7906_v13 }
 0x131   : > { %v1554_v44 = vpop.f32.mrb[19].mxu0  ;;  %v1835_v8 = vrot.slane %v1821_v35, %v7906_v13  ;;  %v2129_v46 = vcombine.low %v1820_v34, %v1828_v36  ;;  %v2177_v55 = vrot.slane %v2169_v24, %v7906_v13  ;;  %v2192_v28 = vrot.slane %v1869_v29, %v7906_v13 }
 0x132   : > { %2530 = vrot.lane.b32.xlu1 %v7980_v37, %s7553_s9  ;;  %2358 = vrot.lane.b32.xlu0 %v8001_v56, %s7554_s10  ;;  %v2184_v19 = vrot.slane %v2170_v40, %v7906_v13  ;;  %v8044_v32 = vcombine.low %v2119_v42, %v2126_v26  ;;  %v8049_v43 = vsel %vm2275_vm2, %v2287_v62, %v2289_v45  ;;  %v2291_v51 = vrot.slane %v8028_v27, 1 }
 0x133   : > { %11120 = vst [vmem:[#allocation7_spill] sm:$0xff] %v8049_v43  ;;  %v1837_v37 = vcombine.high %v1835_v8, %v1835_v8  ;;  %v2143_v48 = vrot.slane %v2129_v46, %v7906_v13  ;;  %v1836_v49 = vcombine.high %v1828_v36, %v1828_v36  ;;  %v2136_v52 = vrot.slane %v2128_v39, %v7906_v13 }
 0x134   : > { %v8052_v50 = vcombine.low %v2177_v55, %v2184_v19  ;;  %v1906_v54 = vcombine.high %v7342_v25, %v7342_v25  ;;  %v1913_v6 = vrot.slane %v7342_v25, %v7906_v13  ;;  %v8062_v60 = vsel %vm2275_vm2, %v2291_v51, %v2292_v17 }
 0x135   : > { %v2152_v53 = vcombine.low %v1835_v8, %v1837_v37  ;;  %11121 = vst [vmem:[#allocation8_spill] sm:$0xff] %v8062_v60  ;;  %v8064_v61 = vcombine.low %v2136_v52, %v2143_v48  ;;  %v1871_v62 = vcombine.high %v1869_v29, %v1869_v29  ;;  %v1872_v63 = vcombine.high %v1551_v31, %v1551_v31 }
 0x136   : > { %2466 = vrot.lane.b32.xlu1 %v8004_v57, %s7555_s11  ;;  %2536 = vrot.lane.b32.xlu0 %v8001_v56, %s7553_s9  ;;  %v7346_v59 = vpop.f32.mrb[20].mxu0  ;;  %v1920_v3 = vrot.slane %v1906_v54, %v7906_v13  ;;  %v1921_v4 = vcombine.high %v1913_v6, %v1913_v6  ;;  %v2304_v5 = vrot.slane %v2192_v28, 1  ;;  %v1879_v7 = vrot.slane %v1551_v31, %v7906_v13 }
 0x137   : > { %v1567_v1 = vpop.f32.mrb[21].mxu0  ;;  %v2160_v2 = vrot.slane %v2152_v53, %v7906_v13  ;;  %v1886_v12 = vrot.slane %v1872_v63, %v7906_v13  ;;  %v1923_v14 = vcombine.high %v7343_v38, %v7343_v38  ;;  %v1930_v15 = vrot.slane %v7343_v38, %v7906_v13 }
 0x138   : > { %v7347_v56 = vpop.f32.mrb[22].mxu0  ;;  %v1922_v18 = vcombine.high %v1920_v3, %v1920_v3  ;;  %v2234_v20 = vcombine.low %v1913_v6, %v1921_v4  ;;  %v2302_v21 = vrot.slane %v8052_v50, 1  ;;  %v1887_v22 = vcombine.high %v1879_v7, %v1879_v7 }
 0x139   : > { %v1570_v16 = vpop.f32.mrb[23].mxu0  ;;  %v8075_v17 = vcombine.low %v2160_v2, %v2167_v0  ;;  %v2193_v23 = vcombine.low %v1871_v62, %v1879_v7  ;;  %v1937_v24 = vrot.slane %v1923_v14, %v7906_v13  ;;  %v1938_v25 = vcombine.high %v1930_v15, %v1930_v15 }
 0x13a   : > { %2362 = vrot.lane.b32.xlu0 %v8006_v58, %s7554_s10  ;;  %2470 = vrot.lane.b32.xlu1 %v8016_v9, %s7555_s11  ;;  %v2151_v26 = vrot.slane %v1836_v49, %v7906_v13  ;;  %v1888_v29 = vcombine.high %v1886_v12, %v1886_v12  ;;  %v1889_v30 = vcombine.high %v1554_v44, %v1554_v44  ;;  %v2296_v40 = vrot.slane %v8044_v32, 1 }
 0x13b   : > { %v2235_v31 = vcombine.low %v1920_v3, %v1922_v18  ;;  %v2194_v33 = vcombine.low %v1887_v22, %v1886_v12  ;;  %v1939_v34 = vcombine.high %v1937_v24, %v1937_v24  ;;  %v2251_v35 = vcombine.low %v1930_v15, %v1938_v25 }
 0x13c   : > { %v1896_v36 = vrot.slane %v1554_v44, %v7906_v13  ;;  %v1903_v38 = vrot.slane %v1889_v30, %v7906_v13  ;;  %v8087_v39 = vsel %vm2275_vm2, %v2302_v21, %v2304_v5  ;;  %v2242_v42 = vrot.slane %v2234_v20, %v7906_v13 }
 0x13d   : > { %v2201_v45 = vrot.slane %v2193_v23, %v7906_v13  ;;  %v2252_v8 = vcombine.low %v1937_v24, %v1939_v34  ;;  %v2297_v46 = vrot.slane %v8064_v61, 1  ;;  %v2299_v55 = vrot.slane %v2151_v26, 1 }
 0x13e   : > { %2540 = vrot.lane.b32.xlu0 %v8006_v58, %s7553_s9  ;;  %2360 = vrot.lane.b32.xlu1 %v8028_v27, %s7554_s10  ;;  %v1904_v58 = vcombine.high %v1896_v36, %v1896_v36  ;;  %v1905_v0 = vcombine.high %v1903_v38, %v1903_v38  ;;  %v2210_v19 = vcombine.low %v1888_v29, %v1896_v36  ;;  %v2301_v28 = vrot.slane %v8075_v17, 1 }
 0x13f   : > { %v8094_v44 = vsel %vm2275_vm2, %v2296_v40, %v2297_v46  ;;  %v2208_v37 = vrot.slane %v2194_v33, %v7906_v13  ;;  %v1946_v48 = vrot.slane %v1567_v1, %v7906_v13  ;;  %v2259_v49 = vrot.slane %v2251_v35, %v7906_v13 }
 0x140   : > { %v2211_v51 = vcombine.low %v1904_v58, %v1903_v38  ;;  %v2218_v52 = vrot.slane %v2210_v19, %v7906_v13  ;;  %v8106_v53 = vsel %vm2275_vm2, %v2297_v46, %v2299_v55  ;;  %v8109_v54 = vsel %vm2275_vm2, %v2301_v28, %v2302_v21 }
 0x141   : > { %11122 = vst [vmem:[#allocation9_spill] sm:$0xff] %v8106_v53  ;;  %v2209_v6 = vcombine.low %v2201_v45, %v2208_v37  ;;  %v2274_v59 = vrot.slane %v1946_v48, %v7906_v13  ;;  %v2249_v63 = vrot.slane %v2235_v31, %v7906_v13  ;;  %v2233_v1 = vrot.slane %v1905_v0, %v7906_v13 }
 0x142   : > { %2472 = vrot.lane.b32.xlu0 %v8049_v43, %s7555_s11  ;;  %2538 = vrot.lane.b32.xlu1 %v8028_v27, %s7553_s9  ;;  %v2225_v62 = vrot.slane %v2211_v51, %v7906_v13  ;;  %v2266_v27 = vrot.slane %v2252_v8, %v7906_v13 }
 0x143   : > { %v2250_v3 = vcombine.low %v2242_v42, %v2249_v63  ;;  %v2306_v4 = vrot.slane %v2209_v6, 1  ;;  %v2314_v5 = vrot.slane %v2274_v59, 1  ;;  %v2309_v7 = vrot.slane %v2233_v1, 1 }
 0x144   : > { %v2226_v2 = vcombine.low %v2218_v52, %v2225_v62  ;;  %v2267_v56 = vcombine.low %v2259_v49, %v2266_v27 }
 0x145   : > { %v2311_v12 = vrot.slane %v2250_v3, 1 }
 0x146   : > { %2476 = vrot.lane.b32.xlu0 %v8034_v41, %s7555_s11  ;;  %2364 = vrot.lane.b32.xlu1 %v8044_v32, %s7554_s10  ;;  %v2307_v14 = vrot.slane %v2226_v2, 1  ;;  %v2312_v15 = vrot.slane %v2267_v56, 1 }
 0x148   : > { %v8125_v16 = vsel %vm2275_vm2, %v2306_v4, %v2307_v14  ;;  %v8128_v18 = vsel %vm2275_vm2, %v2307_v14, %v2309_v7  ;;  %v8131_v20 = vsel %vm2275_vm2, %v2311_v12, %v2312_v15  ;;  %v8134_v21 = vsel %vm2275_vm2, %v2312_v15, %v2314_v5 }
 0x149   : > { %11123 = vst [vmem:[#allocation10_spill] sm:$0xff] %v8125_v16  ;;  %11124 = vst [vmem:[#allocation11_spill] sm:$0xff] %v8128_v18 }
 0x14a   : > { %2542 = vrot.lane.b32.xlu1 %v8044_v32, %s7553_s9  ;;  %2370 = vrot.lane.b32.xlu0 %v8052_v50, %s7554_s10  ;;  %11125 = vst [vmem:[#allocation12_spill] sm:$0xff] %v8131_v20  ;;  %11126 = vst [vmem:[#allocation13_spill] sm:$0xff] %v8134_v21 }
 0x14e   : > { %2474 = vrot.lane.b32.xlu1 %v8062_v60, %s7555_s11  ;;  %2548 = vrot.lane.b32.xlu0 %v8052_v50, %s7553_s9 }
 0x152   : > { %2366 = vrot.lane.b32.xlu0 %v8064_v61, %s7554_s10  ;;  %2368 = vrot.lane.b32.xlu1 %v8075_v17, %s7554_s10 }
 0x156   : > { %2544 = vrot.lane.b32.xlu0 %v8064_v61, %s7553_s9  ;;  %2546 = vrot.lane.b32.xlu1 %v8075_v17, %s7553_s9 }
 0x15a   : > { %2484 = vrot.lane.b32.xlu0 %v8087_v39, %s7555_s11  ;;  %2478 = vrot.lane.b32.xlu1 %v8094_v44, %s7555_s11 }
 0x15e   : > { %2480 = vrot.lane.b32.xlu0 %v8106_v53, %s7555_s11  ;;  %2482 = vrot.lane.b32.xlu1 %v8109_v54, %s7555_s11 }
 0x160   : > { %v7352_v32 = vpop.f32.mrb[0].mxu1  ;;  %v7378_v50 = vpop.f32.mrb[24].mxu0 }
 0x161   : > { %v2846_v22 = vcombine.high %v7352_v32, %v7352_v32  ;;  %v2699_v23 = vpop.f32.mrb[1].mxu1  ;;  %v4280_v61 = vpop.f32.mrb[25].mxu0  ;;  %v4393_v35 = vcombine.high %v7378_v50, %v7378_v50  ;;  %v8180_v45 = vrot.slane %v7352_v32, %v7906_v13  ;;  %v4400_v49 = vrot.slane %v7378_v50, %v7906_v13 }
 0x162   : > { %2372 = vrot.lane.b32.xlu1 %v2209_v6, %s7554_s10  ;;  %2374 = vrot.lane.b32.xlu0 %v2226_v2, %s7554_s10  ;;  %v2812_v17 = vcombine.high %v2699_v23, %v2699_v23  ;;  %v7353_v24 = vpop.f32.mrb[2].mxu1  ;;  %v7379_v25 = vpop.f32.mrb[26].mxu0  ;;  %v2819_v31 = vrot.slane %v2699_v23, %v7906_v13 }
 0x163   : > { %v8159_v26 = vrot.slane %v2846_v22, %v7906_v13  ;;  %v2702_v29 = vpop.f32.mrb[3].mxu1  ;;  %v4282_v30 = vpop.f32.mrb[27].mxu0  ;;  %v2870_v34 = vrot.slane %v7353_v24, %v7906_v13  ;;  %v2863_v8 = vcombine.high %v7353_v24, %v7353_v24  ;;  %v4407_v55 = vrot.slane %v4393_v35, %v7906_v13 }
 0x164   : > { %v8163_v33 = vrot.slane %v2812_v17, %v7906_v13  ;;  %v2829_v38 = vcombine.high %v2702_v29, %v2702_v29  ;;  %v8177_v42 = vrot.slane %v2702_v29, %v7906_v13  ;;  %v8183_v58 = vcombine.high %v2819_v31, %v2819_v31 }
 0x165   : > { %v8168_v36 = vcombine.high %v8159_v26, %v8159_v26  ;;  %v8185_v0 = vcombine.high %v2870_v34, %v2870_v34  ;;  %v4409_v59 = vcombine.high %v4407_v55, %v4407_v55  ;;  %v2861_v27 = vcombine.high %v8180_v45, %v8180_v45 }
 0x166   : > { %v8172_v40 = vcombine.high %v8163_v33, %v8163_v33  ;;  %2550 = vrot.lane.b32.xlu1 %v2209_v6, %s7553_s9  ;;  %2552 = vrot.lane.b32.xlu0 %v2226_v2, %s7553_s9  ;;  %v8193_v48 = vrot.slane %v2829_v38, %v7906_v13  ;;  %v8202_v6 = vcombine.high %v8177_v42, %v8177_v42 }
 0x167   : > { %v3464_v46 = vcombine.low %v8168_v36, %v2870_v34  ;;  %v4410_v1 = vcombine.high %v7379_v25, %v7379_v25  ;;  %v4417_v2 = vrot.slane %v7379_v25, %v7906_v13  ;;  %v8221_v7 = vrot.slane %v2863_v8, %v7906_v13 }
 0x168   : > { %v7382_v28 = vpop.f32.mrb[28].mxu0  ;;  %v8190_v37 = vpop.f32.mrb[4].mxu1  ;;  %v3160_v12 = vcombine.low %v2870_v34, %v8185_v0  ;;  %v8226_v14 = vcombine.high %v8193_v48, %v8193_v48  ;;  %v4408_v15 = vcombine.high %v4400_v49, %v4400_v49  ;;  %v4010_v22 = vcombine.low %v8177_v42, %v8202_v6 }
 0x169   : > { %v8196_v51 = vpop.f32.mrb[29].mxu0  ;;  %v8198_v52 = vpop.f32.mrb[5].mxu1  ;;  %v4424_v32 = vrot.slane %v4410_v1, %v7906_v13  ;;  %v5206_v50 = vcombine.low %v4409_v59, %v4417_v2  ;;  %v4425_v23 = vcombine.high %v4417_v2, %v4417_v2  ;;  %v8240_v17 = vcombine.low %v2861_v27, %v8159_v26 }
 0x16a   : > { %2376 = vrot.lane.b32.xlu1 %v2250_v3, %s7554_s10  ;;  %2378 = vrot.lane.b32.xlu0 %v2267_v56, %s7554_s10  ;;  %v8206_v62 = vpop.f32.mrb[30].mxu0  ;;  %v8208_v63 = vpop.f32.mrb[6].mxu1  ;;  %v3993_v56 = vcombine.low %v2819_v31, %v8183_v58  ;;  %v8237_v61 = vrot.slane %v8196_v51, %v7906_v13  ;;  %v3895_v24 = vcombine.low %v8183_v58, %v8163_v33 }
 0x16b   : > { %v8213_v4 = vpop.f32.mrb[7].mxu1  ;;  %v8215_v5 = vpop.f32.mrb[31].mxu0  ;;  %v3994_v25 = vcombine.low %v8163_v33, %v8172_v40  ;;  %v4426_v29 = vcombine.high %v4424_v32, %v4424_v32  ;;  %v8250_v31 = vrot.slane %v3464_v46, %v7906_v13  ;;  %v4461_v34 = vcombine.high %v7382_v28, %v7382_v28 }
 0x16c   : > { %v8247_v30 = vrot.slane %v3993_v56, %v7906_v13  ;;  %v3159_v35 = vcombine.low %v8159_v26, %v8168_v36  ;;  %v5205_v49 = vcombine.low %v4408_v15, %v4407_v55  ;;  %v3174_v59 = vrot.slane %v3160_v12, %v7906_v13 }
 0x16d   : > { %v5223_v33 = vcombine.low %v4426_v29, %v8237_v61  ;;  %v4011_v1 = vcombine.low %v8193_v48, %v8226_v14  ;;  %v4018_v26 = vrot.slane %v4010_v22, %v7906_v13  ;;  %v5222_v36 = vcombine.low %v4425_v23, %v4424_v32 }
 0x16e   : > { %2486 = vrot.lane.b32.xlu1 %v8125_v16, %s7555_s11  ;;  %2488 = vrot.lane.b32.xlu0 %v8128_v18, %s7555_s11  ;;  %v3167_v2 = vrot.slane %v3159_v35, %v7906_v13  ;;  %v5220_v55 = vrot.slane %v5206_v50, %v7906_v13  ;;  %v8276_v12 = vrot.slane %v7382_v28, %v7906_v13 }
 0x16f   : > { %v4427_v15 = vcombine.high %v8196_v51, %v8196_v51  ;;  %v3912_v29 = vcombine.low %v8202_v6, %v8193_v48  ;;  %v8287_v22 = vrot.slane %v4461_v34, %v7906_v13  ;;  %v5237_v23 = vrot.slane %v5223_v33, %v7906_v13 }
 0x170   : > { %v8254_v38 = vpop.f32.mrb[32].mxu0  ;;  %v8256_v8 = vpop.f32.mrb[8].mxu1  ;;  %v8290_v35 = vcombine.low %v3167_v2, %v3174_v59  ;;  %v3913_v28 = vcombine.low %v8226_v14, %v8180_v45  ;;  %v2879_v51 = vcombine.high %v8221_v7, %v8221_v7  ;;  %v2880_v48 = vcombine.high %v8198_v52, %v8198_v52 }
 0x171   : > { %v8262_v27 = vpop.f32.mrb[33].mxu0  ;;  %v8264_v46 = vpop.f32.mrb[9].mxu1  ;;  %v2887_v6 = vrot.slane %v8198_v52, %v7906_v13  ;;  %v5213_v50 = vrot.slane %v5205_v49, %v7906_v13  ;;  %v2914_v34 = vcombine.high %v8190_v37, %v8190_v37  ;;  %v3920_v33 = vrot.slane %v3912_v29, %v7906_v13 }
 0x172   : > { %v8270_v56 = vpop.f32.mrb[10].mxu1  ;;  %v8272_v58 = vpop.f32.mrb[34].mxu0  ;;  %11127 = vst [vmem:[#allocation14_spill] sm:$0xff] %v8290_v35  ;;  %3933 = vrot.lane.b32.xlu1 %v8290_v35, %s7555_s11  ;;  %v3927_v14 = vrot.slane %v3913_v28, %v7906_v13  ;;  %v5230_v59 = vrot.slane %v5222_v36, %v7906_v13  ;;  %v8309_v2 = vrot.slane %v4427_v15, %v7906_v13 }
 0x173   : > { %v8282_v3 = vpop.f32.mrb[11].mxu1  ;;  %v8284_v32 = vpop.f32.mrb[35].mxu0  ;;  %v8311_v19 = vcombine.high %v2887_v6, %v2887_v6  ;;  %v3481_v52 = vcombine.low %v2879_v51, %v2887_v6  ;;  %v8313_v18 = vcombine.low %v5213_v50, %v5220_v55  ;;  %v3903_v35 = vrot.slane %v3895_v24, %v7906_v13 }
 0x174   : > { %v3928_v49 = vcombine.low %v3920_v33, %v3927_v14  ;;  %v8315_v16 = vcombine.low %v5230_v59, %v5237_v23  ;;  %v11128_v29 = vcombine.low %v8172_v40, %v8177_v42  ;;  %v4442_v15 = vcombine.high %v8237_v61, %v8237_v61 }
 0x175   : > { %v8329_v55 = vrot.slane %v2880_v48, %v7906_v13  ;;  %v3177_v23 = vcombine.low %v2887_v6, %v8311_v19  ;;  %v4025_v50 = vrot.slane %v4011_v1, %v7906_v13  ;;  %v8338_v40 = vrot.slane %v2914_v34, %v7906_v13 }
 0x176   : > { %v3910_v28 = vrot.slane %v11128_v29, %v7906_v13  ;;  %3931 = vrot.lane.b32.xlu0 %v3928_v49, %s7555_s11  ;;  %5315 = vrot.lane.b32.xlu1 %v8313_v18, %s7553_s9  ;;  %v11131_v61 = vrot.slane %v8180_v45, %v7906_v13  ;;  %v4008_v6 = vrot.slane %v3994_v25, %v7906_v13 }
 0x177   : > { %v4026_v59 = vcombine.low %v4018_v26, %v4025_v50  ;;  %v4477_v34 = vcombine.high %v8287_v22, %v8287_v22  ;;  %v4478_v49 = vcombine.high %v8206_v62, %v8206_v62  ;;  %v3495_v25 = vrot.slane %v3481_v52, %v7906_v13 }
 0x178   : > { %v8322_v53 = vpop.f32.mrb[36].mxu0  ;;  %v8324_v36 = vpop.f32.mrb[12].mxu1  ;;  %v3911_v42 = vcombine.low %v3903_v35, %v3910_v28  ;;  %v4037_v48 = vrot.slane %v11131_v61, 1  ;;  %v4485_v35 = vrot.slane %v8206_v62, %v7906_v13  ;;  %v4009_v28 = vcombine.low %v8247_v30, %v4008_v6 }
 0x179   : > { %11129 = vst [vmem:[#allocation15_spill] sm:$0xff] %v8324_v36  ;;  %v8333_v24 = vpop.f32.mrb[37].mxu0  ;;  %v8335_v33 = vpop.f32.mrb[13].mxu1  ;;  %v3176_v61 = vcombine.low %v8221_v7, %v2879_v51  ;;  %v3191_v26 = vrot.slane %v3177_v23, %v7906_v13  ;;  %v8367_v50 = vrot.slane %v8190_v37, %v7906_v13  ;;  %v8371_v60 = vcombine.high %v8329_v55, %v8329_v55 }
 0x17a   : > { %11130 = vst [vmem:[#allocation16_spill] sm:$0xff] %v8335_v33  ;;  %v8347_v1 = vpop.f32.mrb[38].mxu0  ;;  %v8349_v14 = vpop.f32.mrb[14].mxu1  ;;  %v4035_v62 = vrot.slane %v4026_v59, 1  ;;  %v8373_v43 = vcombine.low %v4477_v34, %v4485_v35  ;;  %5317 = vrot.lane.b32.xlu0 %v8315_v16, %s7553_s9  ;;  %3929 = vrot.lane.b32.xlu1 %v3911_v42, %s7555_s11  ;;  %v4034_v30 = vrot.slane %v4009_v28, 1  ;;  %v3471_v52 = vrot.slane %v8240_v17, %v7906_v13 }
 0x17b   : > { %11132 = vst [vmem:[#allocation17_spill] sm:$0xff] %v8349_v14  ;;  %v8357_v29 = vpop.f32.mrb[39].mxu0  ;;  %v8359_v45 = vpop.f32.mrb[15].mxu1  ;;  %v3184_v51 = vrot.slane %v3176_v61, %v7906_v13  ;;  %v11134_v37 = vcombine.low %v8185_v0, %v8221_v7  ;;  %v8387_v59 = vrot.slane %v4478_v49, %v7906_v13  ;;  %v4493_v34 = vcombine.high %v4485_v35, %v4485_v35 }
 0x17c   : > { %11133 = vst [vmem:[#allocation18_spill] sm:$0xff] %v8359_v45  ;;  %v4038_v6 = vsel %vm2275_vm2, %v4035_v62, %v4037_v48  ;;  %v2930_v42 = vcombine.high %v8338_v40, %v8338_v40  ;;  %v4036_v28 = vsel %vm2275_vm2, %v4034_v30, %v4035_v62  ;;  %v3479_v17 = vcombine.low %v3471_v52, %v8250_v31 }
 0x17d   : > { %v3488_v23 = vrot.slane %v11134_v37, %v7906_v13  ;;  %v8392_v61 = vcombine.low %v3184_v51, %v3191_v26  ;;  %v5245_v7 = vrot.slane %v4442_v15, %v7906_v13  ;;  %v8402_v48 = vrot.slane %v8208_v63, %v7906_v13 }
 0x17e   : > { %v2897_v49 = vcombine.high %v8213_v4, %v8213_v4  ;;  %v8408_v35 = vrot.slane %v8213_v4, %v7906_v13  ;;  %4041 = vrot.lane.b32.xlu0 %v4038_v6, %s7553_s9  ;;  %4039 = vrot.lane.b32.xlu1 %v4036_v28, %s7553_s9  ;;  %v3791_v15 = vrot.slane %v3479_v17, 1  ;;  %v3503_v62 = vrot.slane %v8311_v19, %v7906_v13 }
 0x17f   : > { %11135 = vst [vmem:[#allocation19_spill] sm:$0xff] %v8392_v61  ;;  %v3496_v57 = vcombine.low %v3488_v23, %v3495_v25  ;;  %v4444_v30 = vcombine.high %v8215_v5, %v8215_v5  ;;  %v5247_v52 = vrot.slane %v8315_v16, 1  ;;  %v4783_v37 = vcombine.low %v4493_v34, %v8387_v59 }
 0x180   : > { %v8395_v47 = vpop.f32.mrb[40].mxu0  ;;  %v8397_v0 = vpop.f32.mrb[16].mxu1  ;;  %v8427_v23 = vcombine.low %v2930_v42, %v8402_v48  ;;  %v8430_v6 = vrot.slane %v2897_v49, %v7906_v13  ;;  %v4476_v28 = vcombine.high %v8276_v12, %v8276_v12  ;;  %v4443_v17 = vcombine.high %v8309_v2, %v8309_v2 }
 0x181   : > { %11136 = vst [vmem:[#allocation20_spill] sm:$0xff] %v8395_v47  ;;  %11137 = vst [vmem:[#allocation21_spill] sm:$0xff] %v8397_v0  ;;  %v8410_v26 = vpop.f32.mrb[41].mxu0  ;;  %v8412_v31 = vpop.f32.mrb[17].mxu1  ;;  %v3792_v25 = vrot.slane %v3496_v57, 1  ;;  %v3193_v34 = vcombine.low %v8371_v60, %v8408_v35  ;;  %v2929_v49 = vcombine.high %v8367_v50, %v8367_v50  ;;  %v4451_v47 = vrot.slane %v8215_v5, %v7906_v13 }
 0x182   : > { %11138 = vst [vmem:[#allocation22_spill] sm:$0xff] %v8410_v26  ;;  %11139 = vst [vmem:[#allocation23_spill] sm:$0xff] %v8412_v31  ;;  %v8420_v51 = vpop.f32.mrb[42].mxu0  ;;  %v8422_v4 = vpop.f32.mrb[18].mxu1  ;;  %v2913_v31 = vcombine.high %v8430_v6, %v8430_v6  ;;  %3935 = vrot.lane.b32.xlu0 %v8392_v61, %s7555_s11  ;;  %v5249_v26 = vrot.slane %v5245_v7, 1  ;;  %v4759_v21 = vcombine.low %v8276_v12, %v4476_v28 }
 0x183   : > { %11140 = vst [vmem:[#allocation24_spill] sm:$0xff] %v8420_v51  ;;  %11141 = vst [vmem:[#allocation25_spill] sm:$0xff] %v8422_v4  ;;  %v8432_v57 = vpop.permute.xlu1 %2526  ;;  %v8434_v19 = vpop.permute.xlu0 %2348  ;;  %v3793_v16 = vsel %vm2275_vm2, %v3791_v15, %v3792_v25  ;;  %v4790_v4 = vrot.slane %v8373_v43, %v7906_v13  ;;  %v8459_v15 = vcombine.high %v8408_v35, %v8408_v35 }
 0x184   : > { %11142 = vst [vmem:[#allocation26_spill] sm:$0xff] %v8432_v57  ;;  %v8443_v42 = vpop.f32.mrb[43].mxu0  ;;  %v8445_v51 = vpop.f32.mrb[19].mxu1  ;;  %v5246_v57 = vrot.slane %v8313_v18, 1  ;;  %3831 = vrot.lane.b32.xlu1 %v3793_v16, %s7554_s10  ;;  %v4458_v18 = vrot.slane %v4444_v30, %v7906_v13  ;;  %v4459_v45 = vcombine.high %v4451_v47, %v4451_v47  ;;  %v5250_v5 = vsel %vm2275_vm2, %v5247_v52, %v5249_v26 }
 0x185   : > { %11143 = vst [vmem:[#allocation27_spill] sm:$0xff] %v8443_v42  ;;  %11144 = vst [vmem:[#allocation28_spill] sm:$0xff] %v8445_v51  ;;  %v3794_v51 = vrot.slane %v3503_v62, 1  ;;  %v4797_v42 = vrot.slane %v4783_v37, %v7906_v13  ;;  %v3210_v30 = vcombine.low %v2913_v31, %v8367_v50  ;;  %v3211_v36 = vcombine.low %v2929_v49, %v8338_v40 }
 0x186   : > { %v5248_v61 = vsel %vm2275_vm2, %v5246_v57, %v5247_v52  ;;  %v4460_v62 = vcombine.high %v4458_v18, %v4458_v18  ;;  %v4741_v37 = vcombine.low %v8309_v2, %v4443_v17  ;;  %v3194_v7 = vcombine.low %v8459_v15, %v8430_v6 }
 0x187   : > { %v8464_v0 = vpop.permute.xlu1 %2522  ;;  %v8466_v43 = vpop.permute.xlu0 %2524  ;;  %v3795_v20 = vsel %vm2275_vm2, %v3792_v25, %v3794_v51  ;;  %v8472_v33 = vcombine.low %v4790_v4, %v4797_v42  ;;  %v4742_v25 = vcombine.low %v4451_v47, %v4459_v45  ;;  %v3225_v51 = vrot.slane %v3211_v36, %v7906_v13 }
 0x188   : > { %v7372_v14 = vpop.f32.mrb[20].mxu1  ;;  %3833 = vrot.lane.b32.xlu0 %v3795_v20, %s7554_s10  ;;  %4043 = vrot.lane.b32.xlu1 %v3793_v16, %s7553_s9  ;;  %v4758_v12 = vcombine.low %v4458_v18, %v4460_v62  ;;  %v3201_v26 = vrot.slane %v3193_v34, %v7906_v13  ;;  %v4773_v4 = vrot.slane %v4759_v21, %v7906_v13 }
 0x189   : > { %v3218_v14 = vrot.slane %v3210_v30, %v7906_v13  ;;  %v3208_v28 = vrot.slane %v3194_v7, %v7906_v13  ;;  %v3522_v47 = vcombine.low %v8367_v50, %v2929_v49  ;;  %v3521_v45 = vcombine.low %v8430_v6, %v2913_v31 }
 0x18a   : > { %v4766_v57 = vrot.slane %v4758_v12, %v7906_v13  ;;  %v4756_v16 = vrot.slane %v4742_v25, %v7906_v13  ;;  %v4502_v34 = vrot.slane %v8262_v27, %v7906_v13  ;;  %v4749_v42 = vrot.slane %v4741_v37, %v7906_v13 }
 0x18b   : > { %v8492_v17 = vcombine.low %v3218_v14, %v3225_v51  ;;  %v8500_v21 = vcombine.low %v3201_v26, %v3208_v28  ;;  %v2931_v50 = vcombine.high %v8208_v63, %v8208_v63  ;;  %v4494_v18 = vcombine.high %v8387_v59, %v8387_v59 }
 0x18c   : > { %v8486_v52 = vpop.permute.xlu0 %2528  ;;  %v8488_v2 = vpop.permute.xlu1 %2350  ;;  %4045 = vrot.lane.b32.xlu0 %v3795_v20, %s7553_s9  ;;  %5145 = vrot.lane.b32.xlu1 %v8472_v33, %s7554_s10  ;;  %v8498_v36 = vcombine.low %v4766_v57, %v4773_v4  ;;  %v3504_v31 = vcombine.low %v8329_v55, %v8371_v60  ;;  %v3536_v62 = vrot.slane %v3522_v47, %v7906_v13 }
 0x18d   : > { %11145 = vst [vmem:[#allocation29_spill] sm:$0xff] %v8486_v52  ;;  %11146 = vst [vmem:[#allocation30_spill] sm:$0xff] %v8492_v17  ;;  %v8519_v6 = vcombine.low %v4494_v18, %v4502_v34  ;;  %v4495_v63 = vcombine.high %v8262_v27, %v8262_v27  ;;  %v8524_v30 = vcombine.low %v4749_v42, %v4756_v16 }
 0x18e   : > { %11147 = vst [vmem:[#allocation31_spill] sm:$0xff] %v8500_v21  ;;  %v3529_v37 = vrot.slane %v3521_v45, %v7906_v13  ;;  %v8528_v59 = vrot.slane %v2931_v50, %v7906_v13  ;;  %v3505_v60 = vcombine.low %v8408_v35, %v8459_v15  ;;  %v3512_v12 = vrot.slane %v3504_v31, %v7906_v13  ;;  %v8548_v35 = vld [vmem:[%s11040_s2] ss:$0 sm:$0xff] }
 0x18f   : > { %v2982_v27 = vcombine.high %v8256_v8, %v8256_v8  ;;  %v8551_v15 = vrot.slane %v4495_v63, %v7906_v13  ;;  %v3544_v25 = vrot.slane %v8338_v40, %v7906_v13  ;;  %v2946_v14 = vcombine.high %v8402_v48, %v8402_v48 }
 0x190   : > { %v8509_v20 = vpop.permute.xlu0 %2460  ;;  %v8511_v49 = vpop.permute.xlu1 %2458  ;;  %5253 = vrot.lane.b32.xlu0 %v5250_v5, %s7555_s11  ;;  %5251 = vrot.lane.b32.xlu1 %v5248_v61, %s7555_s11  ;;  %v4781_v5 = vrot.slane %v8287_v22, %v7906_v13  ;;  %v4510_v22 = vcombine.high %v4502_v34, %v4502_v34  ;;  %v3537_v7 = vcombine.low %v3529_v37, %v3536_v62  ;;  %v5070_v28 = vrot.slane %v8498_v36, 1 }
 0x191   : > { %v3519_v51 = vrot.slane %v3505_v60, %v7906_v13  ;;  %v2947_v57 = vcombine.high %v8528_v59, %v8528_v59  ;;  %v3799_v45 = vrot.slane %v3544_v25, 1  ;;  %v8567_v16 = vrot.slane %v8264_v46, %v7906_v13 }
 0x192   : > { %v3797_v47 = vrot.slane %v3537_v7, 1  ;;  %v2332_v40 = vadd.f32 %v8548_v35, %v7960_v11  ;;  %v8576_v34 = vrot.slane %v2982_v27, %v7906_v13  ;;  %v5072_v42 = vrot.slane %v4781_v5, 1 }
 0x193   : > { %v4800_v50 = vcombine.low %v4510_v22, %v8551_v15  ;;  %v2948_v31 = vcombine.high %v8264_v46, %v8264_v46  ;;  %v3562_v62 = vcombine.low %v2947_v57, %v8567_v16  ;;  %v3227_v11 = vcombine.low %v8402_v48, %v2946_v14 }
 0x194   : > { %v8532_v55 = vpop.permute.xlu0 %2464  ;;  %v8534_v61 = vpop.permute.xlu1 %2356  ;;  %3939 = vrot.lane.b32.xlu0 %v8492_v17, %s7555_s11  ;;  %5323 = vrot.lane.b32.xlu1 %v8472_v33, %s7553_s9  ;;  %v3800_v18 = vsel %vm2275_vm2, %v3797_v47, %v3799_v45  ;;  %v3228_v60 = vcombine.low %v8528_v59, %v2947_v57  ;;  %v8590_v27 = vsel %vm2275_vm2, %v5070_v28, %v5072_v42 }
 0x195   : > { %11148 = vst [vmem:[#allocation32_spill] sm:$0xff] %v8532_v55  ;;  %11153 = vst [vmem:[#allocation37_spill] sm:$0xff] %v8590_v27  ;;  %v3520_v5 = vcombine.low %v3512_v12, %v3519_v51  ;;  %v2333_v22 = vadd.f32 %v8548_v35, %v7957_v10  ;;  %v3546_v7 = vcombine.low %v2946_v14, %v8528_v59 }
 0x196   : > { %v2396_v46 = vadd.f32 %v8434_v19, %v2332_v40  ;;  %v8598_v48 = vrot.slane %v8256_v8, %v7906_v13  ;;  %v4807_v25 = vrot.slane %v8519_v6, %v7906_v13  ;;  %v8608_v10 = vcombine.high %v8576_v34, %v8576_v34 }
 0x197   : > { %v3796_v59 = vrot.slane %v3520_v5, 1  ;;  %v5069_v19 = vrot.slane %v8524_v30, 1  ;;  %v8612_v12 = vrot.slane %v2948_v31, %v7906_v13  ;;  %v8616_v8 = vcombine.high %v8567_v16, %v8567_v16 }
 0x198   : > { %v8558_v26 = vpop.permute.xlu1 %2462  ;;  %v8560_v4 = vpop.permute.xlu0 %2354  ;;  %5143 = vrot.lane.b32.xlu0 %v8498_v36, %s7554_s10  ;;  %3937 = vrot.lane.b32.xlu1 %v8500_v21, %s7555_s11  ;;  %v4814_v6 = vrot.slane %v4800_v50, %v7906_v13  ;;  %v3235_v57 = vrot.slane %v3227_v11, %v7906_v13  ;;  %v3242_v45 = vrot.slane %v3228_v60, %v7906_v13 }
 0x199   : > { %11149 = vst [vmem:[#allocation33_spill] sm:$0xff] %v8558_v26  ;;  %11150 = vst [vmem:[#allocation34_spill] sm:$0xff] %v8560_v4  ;;  %v8630_v40 = vsel %vm2275_vm2, %v3796_v59, %v3797_v47  ;;  %v8633_v42 = vsel %vm2275_vm2, %v5069_v19, %v5070_v28  ;;  %v2397_v31 = vadd.f32 %v8488_v2, %v2333_v22 }
 0x19a   : > { %11156 = vst [vmem:[#allocation40_spill] sm:$0xff] %v8633_v42  ;;  %v4529_v5 = vcombine.high %v8254_v38, %v8254_v38  ;;  %v4536_v50 = vrot.slane %v8254_v38, %v7906_v13  ;;  %v3553_v11 = vrot.slane %v8427_v23, %v7906_v13  ;;  %v8646_v47 = vcombine.high %v8598_v48, %v8598_v48 }
 0x19b   : > { %v8651_v2 = vcombine.low %v4807_v25, %v4814_v6  ;;  %v2507_v28 = vadd.f32 %v8509_v20, %v2397_v31  ;;  %v2506_v38 = vadd.f32 %v8511_v49, %v2396_v46  ;;  %v3563_v60 = vcombine.low %v8616_v8, %v8612_v12 }
 0x19c   : > { %v8584_v63 = vpop.permute.xlu1 %2534  ;;  %v8586_v37 = vpop.permute.xlu0 %2532  ;;  %5321 = vrot.lane.b32.xlu0 %v8498_v36, %s7553_s9  ;;  %5141 = vrot.lane.b32.xlu1 %v8524_v30, %s7554_s10  ;;  %v8620_v36 = vrot.slane %v8270_v56, %v7906_v13  ;;  %v8657_v22 = vcombine.low %v3235_v57, %v3242_v45  ;;  %v3278_v19 = vcombine.low %v8646_v47, %v8576_v34 }
 0x19d   : > { %11151 = vst [vmem:[#allocation35_spill] sm:$0xff] %v8584_v63  ;;  %11152 = vst [vmem:[#allocation36_spill] sm:$0xff] %v8586_v37  ;;  %v3560_v25 = vrot.slane %v3546_v7, %v7906_v13  ;;  %v4543_v20 = vrot.slane %v4529_v5, %v7906_v13  ;;  %v4544_v6 = vcombine.high %v4536_v50, %v4536_v50  ;;  %v8687_v5 = vpop.f32.mrb[44].mxu0 }
 0x19e   : > { %v3279_v21 = vcombine.low %v8608_v10, %v8620_v36  ;;  %11157 = vst [vmem:[#allocation41_spill] sm:$0xff] %v8657_v22  ;;  %v3570_v49 = vrot.slane %v3562_v62, %v7906_v13  ;;  %v2965_v46 = vcombine.high %v8282_v3, %v8282_v3  ;;  %v8676_v57 = vrot.slane %v8282_v3, %v7906_v13 }
 0x19f   : > { %v3561_v7 = vcombine.low %v3553_v11, %v3560_v25  ;;  %v2336_v45 = vadd.f32 %v8548_v35, %v8016_v9  ;;  %v8683_v62 = vadd.f32 %v8548_v35, %v8034_v41  ;;  %v2571_v31 = vadd.f32 %v8466_v43, %v2507_v28  ;;  %v8711_v25 = vpop.f32.mrb[45].mxu0 }
 0x1a0   : > { %v8623_v14 = vpop.permute.xlu1 %2352  ;;  %v8625_v51 = vpop.permute.xlu0 %2468  ;;  %3837 = vrot.lane.b32.xlu0 %v3800_v18, %s7554_s10  ;;  %5319 = vrot.lane.b32.xlu1 %v8524_v30, %s7553_s9  ;;  %v3293_v30 = vrot.slane %v3279_v21, %v7906_v13  ;;  %v3286_v21 = vrot.slane %v3278_v19, %v7906_v13  ;;  %v8693_v3 = vadd.f32 %v8548_v35, %v8087_v39 }
 0x1a1   : > { %11154 = vst [vmem:[#allocation38_spill] sm:$0xff] %v8623_v14  ;;  %11155 = vst [vmem:[#allocation39_spill] sm:$0xff] %v8625_v51  ;;  %v8697_v11 = vadd.f32 %v8548_v35, %v8094_v44  ;;  %v3577_v43 = vrot.slane %v3563_v60, %v7906_v13  ;;  %v2400_v28 = vadd.f32 %v8534_v61, %v2336_v45  ;;  %vm2587_vm3 = vcmp.gt.f32.partialorder %v2571_v31, 0.0 }
 0x1a2   : > { %v8701_v41 = vcombine.low %v3286_v21, %v3293_v30  ;;  %v8709_v39 = vcombine.low %v4536_v50, %v4544_v6  ;;  %v8718_v60 = vrot.slane %v2965_v46, %v7906_v13  ;;  %v7399_v50 = vpop.f32.mrb[46].mxu0  ;;  %v2603_v6 = vmul.f32 0.1, %v2571_v31 }
 0x1a3   : > { %v3578_v61 = vcombine.low %v3570_v49, %v3577_v43 }
 0x1a4   : > { %v8659_v23 = vpop.permute.xlu1 %2530  ;;  %v8661_v59 = vpop.permute.xlu0 %2358  ;;  %4049 = vrot.lane.b32.xlu0 %v3800_v18, %s7553_s9  ;;  %3941 = vrot.lane.b32.xlu1 %v8657_v22, %s7555_s11  ;;  %v2570_v18 = vadd.f32 %v8464_v0, %v2506_v38  ;;  %11159 = vst [vmem:[#allocation43_spill] sm:$0xff] %v8701_v41  ;;  %v8706_v0 = vadd.f32 %v8548_v35, %v8109_v54 }
 0x1a5   : > { %11158 = vst [vmem:[#allocation42_spill] sm:$0xff] %v8661_v59  ;;  %v8689_v22 = vpop.f32.mrb[21].mxu1  ;;  %v4545_v38 = vcombine.high %v4543_v20, %v4543_v20  ;;  %v8722_v54 = vcombine.high %v8676_v57, %v8676_v57  ;;  %v8728_v46 = vrot.slane %v3578_v61, 1  ;;  %v4848_v49 = vrot.slane %v8709_v39, %v7906_v13 }
 0x1a6   : > { %v7373_v44 = vpop.f32.mrb[22].mxu1  ;;  %v2602_v21 = vmul.f32 0.1, %v2570_v18  ;;  %vm2586_vm4 = vcmp.gt.f32.partialorder %v2570_v18, 0.0  ;;  %v8757_v61 = vsel %vm2587_vm3, %v2571_v31, %v2603_v6 }
 0x1a7   : > { %v2782_v30 = vpop.f32.mrb[23].mxu1  ;;  %v4841_v52 = vcombine.low %v4543_v20, %v4545_v38  ;;  %v8745_v20 = vcombine.high %v8718_v60, %v8718_v60  ;;  %2636 = vst.msk [vmem:[%s8868_s25 + $0x8] sm:$0xff] %vm2634_vm7, %v8757_v61  ;;  %v3586_v61 = vcombine.low %v8676_v57, %v8722_v54  ;;  %v4621_v57 = vrot.slane %v8347_v1, %v7906_v13 }
 0x1a8   : > { %v2467_v9 = vpop.permute.xlu1 %2466  ;;  %v8699_v19 = vpop.permute.xlu0 %2536  ;;  %5257 = vrot.lane.b32.xlu0 %v8590_v27, %s7555_s11  ;;  %3835 = vrot.lane.b32.xlu1 %v8630_v40, %s7554_s10  ;;  %v3801_v27 = vrot.slane %v3561_v7, 1  ;;  %v3261_v7 = vcombine.low %v8722_v54, %v8718_v60 }
 0x1a9   : > { %v2510_v45 = vadd.f32 %v2467_v9, %v2400_v28  ;;  %v8724_v44 = vpop.f32.mrb[24].mxu1  ;;  %v3603_v9 = vcombine.low %v8598_v48, %v8646_v47  ;;  %v8737_v28 = vpop.f32.mrb[47].mxu0  ;;  %v5074_v47 = vrot.slane %v8472_v33, 1  ;;  %v2964_v33 = vcombine.high %v8612_v12, %v8612_v12 }
 0x1aa   : > { %v5556_v30 = vpop.f32.mrb[25].mxu1  ;;  %v8751_v38 = vsel %vm2275_vm2, %v3801_v27, %v8728_v46  ;;  %v8789_v27 = vrot.slane %v8272_v58, %v7906_v13 }
 0x1ab   : > { %v8754_v39 = vpop.f32.mrb[26].mxu1  ;;  %v2574_v50 = vadd.f32 %v8659_v23, %v2510_v45  ;;  %v4546_v30 = vcombine.high %v8272_v58, %v8272_v58  ;;  %v11163_v23 = vrot.slane %v8651_v2, 1  ;;  %v3244_v45 = vcombine.low %v8567_v16, %v8616_v8 }
 0x1ac   : > { %v2363_v17 = vpop.permute.xlu0 %2362  ;;  %v8726_v63 = vpop.permute.xlu1 %2470  ;;  %5147 = vrot.lane.b32.xlu0 %v8651_v2, %s7554_s10  ;;  %4047 = vrot.lane.b32.xlu1 %v8630_v40, %s7553_s9  ;;  %v8760_v40 = vsel %vm2586_vm4, %v2570_v18, %v2602_v21  ;;  %v4512_v18 = vcombine.high %v8284_v32, %v8284_v32  ;;  %v8781_v21 = vrot.slane %v3603_v9, %v7906_v13 }
 0x1ad   : > { %11160 = vst [vmem:[#allocation44_spill] sm:$0xff] %v8726_v63  ;;  %v5558_v43 = vpop.f32.mrb[27].mxu1  ;;  %v8778_v6 = vsel %vm2275_vm2, %v5074_v47, %v11163_v23  ;;  %v4855_v9 = vrot.slane %v4841_v52, %v7906_v13  ;;  %v3262_v16 = vcombine.low %v8745_v20, %v8598_v48  ;;  %v3269_v8 = vrot.slane %v3261_v7, %v7906_v13 }
 0x1ae   : > { %11164 = vst [vmem:[#allocation47_spill] sm:$0xff] %v8778_v6  ;;  %v2999_v43 = vcombine.high %v8270_v56, %v8270_v56  ;;  %vm2590_vm5 = vcmp.gt.f32.partialorder %v2574_v50, 0.0  ;;  %v2606_v58 = vmul.f32 0.1, %v2574_v50  ;;  %v2403_v47 = vadd.f32 %v2363_v17, %v8683_v62  ;;  %2635 = vst.msk [vmem:[%s8868_s25] sm:$0xff] %vm2634_vm7, %v8760_v40 }
 0x1af   : > { %v4560_v23 = vrot.slane %v4546_v30, %v7906_v13  ;;  %v4519_v52 = vrot.slane %v8284_v32, %v7906_v13  ;;  %v4526_v48 = vrot.slane %v4512_v18, %v7906_v13  ;;  %v3276_v7 = vrot.slane %v3262_v16, %v7906_v13 }
 0x1b0   : > { %v8769_v37 = vpop.permute.xlu0 %2540  ;;  %v8771_v31 = vpop.permute.xlu1 %2360  ;;  %5325 = vrot.lane.b32.xlu0 %v8651_v2, %s7553_s9  ;;  %5255 = vrot.lane.b32.xlu1 %v8633_v42, %s7555_s11  ;;  %v3585_v26 = vrot.slane %v2964_v33, %v7906_v13  ;;  %v3014_v17 = vcombine.high %v8620_v36, %v8620_v36  ;;  %v4561_v32 = vcombine.high %v8789_v27, %v8789_v27 }
 0x1b1   : > { %11161 = vst [vmem:[#allocation45_spill] sm:$0xff] %v8769_v37  ;;  %11162 = vst [vmem:[#allocation46_spill] sm:$0xff] %v8771_v31  ;;  %v8791_v37 = vpop.f32.mrb[28].mxu1  ;;  %v8816_v31 = vrot.slane %v2999_v43, %v7906_v13  ;;  %v8834_v18 = vcombine.low %v4848_v49, %v4855_v9  ;;  %v8836_v43 = vcombine.low %v3269_v8, %v3276_v7 }
 0x1b2   : > { %v8801_v56 = vpop.f32.mrb[29].mxu1  ;;  %v3804_v16 = vrot.slane %v3585_v26, 1  ;;  %v3245_v62 = vcombine.low %v8612_v12, %v2964_v33  ;;  %v4562_v59 = vcombine.high %v4560_v23, %v4560_v23  ;;  %v4527_v14 = vcombine.high %v4519_v52, %v4519_v52 }
 0x1b3   : > { %v8806_v63 = vpop.f32.mrb[30].mxu1  ;;  %11167 = vst [vmem:[#allocation50_spill] sm:$0xff] %v8836_v43  ;;  %v4563_v26 = vcombine.high %v8333_v24, %v8333_v24  ;;  %v8853_v12 = vrot.slane %v8333_v24, %v7906_v13  ;;  %v4864_v33 = vcombine.low %v4561_v32, %v4560_v23  ;;  %v4604_v40 = vrot.slane %v8322_v53, %v7906_v13 }
 0x1b4   : > { %11165 = vst [vmem:[#allocation48_spill] sm:$0xff] %v8806_v63  ;;  %v2473_v42 = vpop.permute.xlu0 %2472  ;;  %v8808_v51 = vpop.permute.xlu1 %2538  ;;  %3947 = vrot.lane.b32.xlu0 %v8701_v41, %s7555_s11  ;;  %3839 = vrot.lane.b32.xlu1 %v8751_v38, %s7554_s10  ;;  %v4528_v41 = vcombine.high %v4526_v48, %v4526_v48  ;;  %v8845_v63 = vsel %vm2275_vm2, %v8728_v46, %v3804_v16 }
 0x1b5   : > { %v2513_v30 = vadd.f32 %v2473_v42, %v2403_v47  ;;  %v8822_v55 = vpop.f32.mrb[31].mxu1  ;;  %v2622_v42 = vsel %vm2590_vm5, %v2574_v50, %v2606_v58  ;;  %v8857_v50 = vcombine.high %v8816_v31, %v8816_v31  ;;  %v3252_v46 = vrot.slane %v3244_v45, %v7906_v13 }
 0x1b6   : > { %11166 = vst [vmem:[#allocation49_spill] sm:$0xff] %v8822_v55  ;;  %v3259_v8 = vrot.slane %v3245_v62, %v7906_v13  ;;  %v4577_v24 = vrot.slane %v4563_v26, %v7906_v13  ;;  %v4865_v58 = vcombine.low %v4562_v59, %v8853_v12  ;;  %2639 = vst.msk [vmem:[%s8868_s25 + $0x20] sm:$0xff] %vm2634_vm7, %v2622_v42  ;;  %v11172_v26 = vrot.slane %v8651_v2, 1 }
 0x1b7   : > { %v2577_v47 = vadd.f32 %v8699_v19, %v2513_v30  ;;  %v4597_v19 = vcombine.high %v8322_v53, %v8322_v53  ;;  %v4823_v45 = vcombine.low %v4519_v52, %v4527_v14  ;;  %v4824_v23 = vcombine.low %v4526_v48, %v4528_v41 }
 0x1b8   : > { %v8841_v4 = vpop.permute.xlu0 %2476  ;;  %v2365_v55 = vpop.permute.xlu1 %2364  ;;  %5151 = vrot.lane.b32.xlu0 %v8834_v18, %s7554_s10  ;;  %4051 = vrot.lane.b32.xlu1 %v8751_v38, %s7553_s9  ;;  %v8879_v38 = vcombine.low %v3014_v17, %v8816_v31  ;;  %v11169_v62 = vcombine.high %v8551_v15, %v8551_v15  ;;  %v4879_v41 = vrot.slane %v4865_v58, %v7906_v13 }
 0x1b9   : > { %11168 = vst [vmem:[#allocation51_spill] sm:$0xff] %v8841_v4  ;;  %vm2593_vm6 = vcmp.gt.f32.partialorder %v2577_v47, 0.0  ;;  %v2609_v49 = vmul.f32 0.1, %v2577_v47  ;;  %v4611_v14 = vrot.slane %v4597_v19, %v7906_v13  ;;  %v3587_v52 = vcombine.low %v8718_v60, %v8745_v20  ;;  %v8913_v20 = vpop.f32.mrb[32].mxu1 }
 0x1ba   : > { %v4822_v30 = vrot.slane %v11169_v62, %v7906_v13  ;;  %v4872_v54 = vrot.slane %v4864_v33, %v7906_v13  ;;  %v2404_v53 = vadd.f32 %v2365_v55, %v8697_v11  ;;  %v8907_v48 = vcombine.low %v3252_v46, %v3259_v8  ;;  %v11174_v62 = vld [vmem:[#allocation15_spill] sm:$0xff] }
 0x1bb   : > { %v2625_v9 = vsel %vm2593_vm6, %v2577_v47, %v2609_v49  ;;  %v4579_v17 = vcombine.high %v4577_v24, %v4577_v24  ;;  %v8911_v60 = vrot.slane %v8357_v29, %v7906_v13  ;;  %v4831_v32 = vrot.slane %v4823_v45, %v7906_v13 }
 0x1bc   : > { %v8881_v59 = vpop.permute.xlu1 %2542  ;;  %v8883_v7 = vpop.permute.xlu0 %2370  ;;  %2642 = vst.msk [vmem:[%s8868_s25 + $0x38] sm:$0xff] %vm2634_vm7, %v2625_v9  ;;  %5329 = vrot.lane.b32.xlu0 %v8834_v18, %s7553_s9  ;;  %5259 = vrot.lane.b32.xlu1 %v8778_v6, %s7555_s11  ;;  %v5077_v15 = vrot.slane %v4822_v30, 1  ;;  %11170 = vst [vmem:[#allocation52_spill] sm:$0xff] %v8907_v48  ;;  %v4838_v47 = vrot.slane %v4824_v23, %v7906_v13  ;;  %v8924_v11 = vcombine.low %v4872_v54, %v4879_v41 }
 0x1bd   : > { %v4612_v33 = vcombine.high %v4604_v40, %v4604_v40  ;;  %v4613_v46 = vcombine.high %v4611_v14, %v4611_v14  ;;  %v4578_v2 = vcombine.high %v8853_v12, %v8853_v12  ;;  %v4629_v9 = vcombine.high %v4621_v57, %v4621_v57  ;;  %v8943_v41 = vpop.f32.mrb[33].mxu1 }
 0x1be   : > { %v8922_v55 = vsel %vm2275_vm2, %v11172_v26, %v5077_v15  ;;  %v8935_v8 = vcombine.low %v4579_v17, %v8911_v60  ;;  %v3594_v58 = vrot.slane %v3586_v61, %v7906_v13  ;;  %v4580_v23 = vcombine.high %v8357_v29, %v8357_v29  ;;  %v11176_v17 = vld [vmem:[#allocation16_spill] sm:$0xff] }
 0x1bf   : > { %11173 = vst [vmem:[#allocation54_spill] sm:$0xff] %v8922_v55  ;;  %v3050_v30 = vcombine.high %v11174_v62, %v11174_v62  ;;  %v3601_v15 = vrot.slane %v3587_v52, %v7906_v13  ;;  %v4863_v12 = vrot.slane %v8789_v27, %v7906_v13  ;;  %v8948_v54 = vcombine.low %v4831_v32, %v4838_v47 }
 0x1c0   : > { %v2475_v16 = vpop.permute.xlu1 %2474  ;;  %v8916_v42 = vpop.permute.xlu0 %2548  ;;  %3943 = vrot.lane.b32.xlu0 %v8907_v48, %s7555_s11  ;;  %3945 = vrot.lane.b32.xlu1 %v8836_v43, %s7555_s11  ;;  %v8956_v26 = vcombine.low %v4611_v14, %v4613_v46  ;;  %v8962_v27 = vcombine.low %v4578_v2, %v4577_v24  ;;  %v8966_v32 = vcombine.low %v4621_v57, %v4629_v9 }
 0x1c1   : > { %11171 = vst [vmem:[#allocation53_spill] sm:$0xff] %v8916_v42  ;;  %v2514_v19 = vadd.f32 %v2475_v16, %v2404_v53  ;;  %v8954_v16 = vcombine.low %v4604_v40, %v4612_v33  ;;  %v4594_v40 = vrot.slane %v4580_v23, %v7906_v13  ;;  %v8970_v14 = vrot.slane %v3050_v30, %v7906_v13 }
 0x1c2   : > { %v3602_v33 = vcombine.low %v3594_v58, %v3601_v15  ;;  %v5082_v46 = vrot.slane %v4863_v12, 1  ;;  %v11178_v57 = vrot.slane %v8620_v36, %v7906_v13  ;;  %v2407_v15 = vadd.f32 %v8883_v7, %v8693_v3  ;;  %v11182_v12 = vld [vmem:[#allocation18_spill] sm:$0xff] }
 0x1c3   : > { %v2578_v45 = vadd.f32 %v8808_v51, %v2514_v19  ;;  %v3016_v51 = vcombine.high %v11176_v17, %v11176_v17  ;;  %v8974_v19 = vrot.slane %v11176_v17, %v7906_v13  ;;  %v9012_v3 = vrot.slane %v11174_v62, %v7906_v13 }
 0x1c4   : > { %v8950_v53 = vpop.permute.xlu0 %2366  ;;  %v2369_v61 = vpop.permute.xlu1 %2368  ;;  %3841 = vrot.lane.b32.xlu0 %v8845_v63, %s7554_s10  ;;  %5149 = vrot.lane.b32.xlu1 %v8948_v54, %s7554_s10  ;;  %v3809_v9 = vrot.slane %v11178_v57, 1  ;;  %v3033_v30 = vcombine.high %v11182_v12, %v11182_v12  ;;  %v3040_v17 = vrot.slane %v11182_v12, %v7906_v13  ;;  %v4896_v42 = vrot.slane %v8935_v8, %v7906_v13 }
 0x1c5   : > { %11175 = vst [vmem:[#allocation15_spill] sm:$0xff] %v8950_v53  ;;  %vm2594_vm8 = vcmp.gt.f32.partialorder %v2578_v45, 0.0  ;;  %v2610_v29 = vmul.f32 0.1, %v2578_v45  ;;  %v8981_v2 = vrot.slane %v3016_v51, %v7906_v13  ;;  %v9007_v51 = vpop.f32.mrb[34].mxu1  ;;  %v9022_v36 = vcombine.high %v8974_v19, %v8974_v19 }
 0x1c6   : > { %v9042_v43 = vpop.f32.mrb[35].mxu1 }
 0x1c7   : > { %v2626_v47 = vsel %vm2594_vm8, %v2578_v45, %v2610_v29  ;;  %v2406_v29 = vadd.f32 %v2369_v61, %v8706_v0  ;;  %v9026_v45 = vcombine.high %v8981_v2, %v8981_v2  ;;  %v11180_v0 = vcombine.low %v8576_v34, %v8608_v10  ;;  %v11181_v61 = vld [vmem:[#allocation17_spill] sm:$0xff] }
 0x1c8   : > { %v8976_v52 = vpop.permute.xlu0 %2544  ;;  %v8978_v24 = vpop.permute.xlu1 %2546  ;;  %2643 = vst.msk [vmem:[%s8868_s25 + $0x40] sm:$0xff] %vm2634_vm7, %v2626_v47  ;;  %4053 = vrot.lane.b32.xlu0 %v8845_v63, %s7553_s9  ;;  %5327 = vrot.lane.b32.xlu1 %v8948_v54, %s7553_s9  ;;  %v4596_v47 = vcombine.high %v4594_v40, %v4594_v40  ;;  %v9016_v63 = vcombine.high %v8970_v14, %v8970_v14  ;;  %11183 = vst [vmem:[#allocation17_spill] sm:$0xff] %v9042_v43 }
 0x1c9   : > { %11177 = vst [vmem:[#allocation16_spill] sm:$0xff] %v8978_v24  ;;  %v3618_v62 = vrot.slane %v11180_v0, %v7906_v13  ;;  %v3067_v23 = vcombine.high %v11181_v61, %v11181_v61  ;;  %v9036_v58 = vrot.slane %v11181_v61, %v7906_v13 }
 0x1ca   : > { %v4905_v12 = vcombine.low %v4594_v40, %v4596_v47  ;;  %v3645_v40 = vcombine.low %v9026_v45, %v3040_v17 }
 0x1cb   : > { %v3619_v34 = vcombine.low %v8781_v21, %v3618_v62  ;;  %v9050_v10 = vrot.slane %v3067_v23, %v7906_v13  ;;  %v3346_v48 = vcombine.low %v9016_v63, %v9036_v58  ;;  %v9065_v21 = vcombine.high %v9036_v58, %v9036_v58 }
 0x1cc   : > { %v9018_v7 = vpop.permute.xlu0 %2484  ;;  %v2479_v57 = vpop.permute.xlu1 %2478  ;;  %5261 = vrot.lane.b32.xlu0 %v8922_v55, %s7555_s11  ;;  %5153 = vrot.lane.b32.xlu1 %v8924_v11, %s7554_s10  ;;  %v9061_v55 = vrot.slane %v3033_v30, %v7906_v13  ;;  %v9069_v62 = vcombine.high %v3040_v17, %v3040_v17 }
 0x1cd   : > { %11179 = vst [vmem:[#allocation55_spill] sm:$0xff] %v9018_v7  ;;  %v2516_v49 = vadd.f32 %v2479_v57, %v2406_v29  ;;  %v3806_v29 = vrot.slane %v3602_v33, 1  ;;  %v11184_v57 = vrot.slane %v8834_v18, 1  ;;  %v3807_v6 = vrot.slane %v3619_v34, 1 }
 0x1ce   : > { %v3347_v47 = vcombine.low %v9065_v21, %v9050_v10  ;;  %v5079_v7 = vrot.slane %v8948_v54, 1  ;;  %v3354_v4 = vrot.slane %v3346_v48, %v7906_v13  ;;  %v3312_v54 = vcombine.low %v8981_v2, %v9026_v45 }
 0x1cf   : > { %v9055_v0 = vsel %vm2275_vm2, %v11184_v57, %v5082_v46  ;;  %v2580_v61 = vadd.f32 %v8881_v59, %v2516_v49  ;;  %v9074_v59 = vcombine.high %v9012_v3, %v9012_v3  ;;  %v3296_v46 = vcombine.low %v8974_v19, %v9022_v36 }
 0x1d0   : > { %11185 = vst [vmem:[#allocation18_spill] sm:$0xff] %v9055_v0  ;;  %v2481_v33 = vpop.permute.xlu0 %2480  ;;  %v9067_v23 = vpop.permute.xlu1 %2482  ;;  %v3810_v30 = vsel %vm2275_vm2, %v3807_v6, %v3809_v9  ;;  %5331 = vrot.lane.b32.xlu1 %v8924_v11, %s7553_s9  ;;  %v9085_v57 = vcombine.high %v9061_v55, %v9061_v55  ;;  %v3313_v9 = vcombine.low %v3040_v17, %v9069_v62 }
 0x1d1   : > { %11186 = vst [vmem:[#allocation56_spill] sm:$0xff] %v9067_v23  ;;  %vm2596_vm9 = vcmp.gt.f32.partialorder %v2580_v61, 0.0  ;;  %v2612_v49 = vmul.f32 0.1, %v2580_v61  ;;  %v2517_v34 = vadd.f32 %v2481_v33, %v2407_v15  ;;  %3845 = vrot.lane.b32.xlu0 %v3810_v30, %s7554_s10  ;;  %v4913_v23 = vrot.slane %v4905_v12, %v7906_v13 }
 0x1d2   : > { %v3329_v33 = vcombine.low %v9085_v57, %v9012_v3  ;;  %v3330_v8 = vcombine.low %v9074_v59, %v8970_v14  ;;  %v3644_v48 = vcombine.low %v9022_v36, %v8981_v2  ;;  %v3310_v17 = vrot.slane %v3296_v46, %v7906_v13 }
 0x1d3   : > { %v2628_v24 = vsel %vm2596_vm9, %v2580_v61, %v2612_v49  ;;  %v2581_v15 = vadd.f32 %v8976_v52, %v2517_v34  ;;  %v3808_v52 = vsel %vm2275_vm2, %v3806_v29, %v3807_v6  ;;  %v3361_v61 = vrot.slane %v3347_v47, %v7906_v13 }
 0x1d4   : > { %v9097_v53 = vpop.permute.xlu1 %2372  ;;  %v9099_v43 = vpop.permute.xlu0 %2374  ;;  %2645 = vst.msk [vmem:[%s8868_s25 + $0x50] sm:$0xff] %vm2634_vm7, %v2628_v24  ;;  %3843 = vrot.lane.b32.xlu1 %v3808_v52, %s7554_s10  ;;  %v11189_v24 = vcombine.low %v8857_v50, %v8974_v19  ;;  %v3327_v45 = vrot.slane %v3313_v9, %v7906_v13  ;;  %v11190_v6 = vrot.slane %v8834_v18, 1  ;;  %v11192_v36 = vrot.slane %v8966_v32, %v7906_v13 }
 0x1d5   : > { %11187 = vst [vmem:[#allocation57_spill] sm:$0xff] %v9097_v53  ;;  %11188 = vst [vmem:[#allocation58_spill] sm:$0xff] %v9099_v43  ;;  %vm2597_vm10 = vcmp.gt.f32.partialorder %v2581_v15, 0.0  ;;  %v2613_v12 = vmul.f32 0.1, %v2581_v15  ;;  %4057 = vrot.lane.b32.xlu0 %v3810_v30, %s7553_s9  ;;  %v11193_v29 = vrot.slane %v8956_v26, %v7906_v13  ;;  %v9132_v19 = vpop.f32.mrb[36].mxu1  ;;  %v11195_v18 = vcombine.low %v8816_v31, %v8857_v50 }
 0x1d6   : > { %v3642_v49 = vrot.slane %v11189_v24, %v7906_v13  ;;  %v9122_v2 = vsel %vm2275_vm2, %v5079_v7, %v11190_v6  ;;  %v9134_v24 = vcombine.low %v3354_v4, %v3361_v61  ;;  %v3337_v30 = vrot.slane %v3329_v33, %v7906_v13  ;;  %v11202_v61 = vld [vmem:[#allocation12_spill] sm:$0xff] }
 0x1d7   : > { %11191 = vst [vmem:[#allocation59_spill] sm:$0xff] %v9122_v2  ;;  %v9130_v46 = vcombine.low %v11193_v29, %v11192_v36  ;;  %v2629_v47 = vsel %vm2597_vm10, %v2581_v15, %v2613_v12  ;;  %v3303_v7 = vrot.slane %v11195_v18, %v7906_v13  ;;  %v3652_v32 = vrot.slane %v3644_v48, %v7906_v13  ;;  %v9145_v15 = vpop.f32.mrb[37].mxu1 }
 0x1d8   : > { %v2551_v34 = vpop.permute.xlu1 %2550  ;;  %v2553_v9 = vpop.permute.xlu0 %2552  ;;  %11194 = vst [vmem:[#allocation60_spill] sm:$0xff] %v9134_v24  ;;  %v3659_v26 = vrot.slane %v3645_v40, %v7906_v13  ;;  %v3344_v6 = vrot.slane %v3330_v8, %v7906_v13  ;;  %v3320_v36 = vrot.slane %v3312_v54, %v7906_v13  ;;  %2646 = vst.msk [vmem:[%s8868_s25 + $0x58] sm:$0xff] %vm2634_vm7, %v2629_v47  ;;  %4055 = vrot.lane.b32.xlu1 %v3808_v52, %s7553_s9 }
 0x1d9   : > { %v11196_v4 = vcombine.high %v8347_v1, %v8347_v1  ;;  %v9154_v50 = vcombine.low %v3303_v7, %v3310_v17  ;;  %v11198_v40 = vrot.slane %v8954_v16, %v7906_v13  ;;  %v11199_v8 = vrot.slane %v8962_v27, %v7906_v13  ;;  %v9166_v48 = vpop.f32.mrb[38].mxu1  ;;  %5265 = vrot.lane.b32.xlu0 %v9055_v0, %s7555_s11 }
 0x1da   : > { %v9170_v52 = vcombine.low %v3337_v30, %v3344_v6  ;;  %v9172_v17 = vcombine.low %v3320_v36, %v3327_v45  ;;  %v2346_v16 = vadd.f32 %v8548_v35, %v11202_v61  ;;  %v3660_v47 = vcombine.low %v3652_v32, %v3659_v26  ;;  %v9181_v18 = vpop.f32.mrb[39].mxu1  ;;  %v11206_v6 = vld [vmem:[#allocation22_spill] sm:$0xff] }
 0x1db   : > { %v4628_v31 = vrot.slane %v11196_v4, %v7906_v13  ;;  %11197 = vst [vmem:[#allocation61_spill] sm:$0xff] %v9154_v50  ;;  %v9159_v33 = vcombine.low %v4913_v23, %v11198_v40  ;;  %v9164_v54 = vcombine.low %v11199_v8, %v4896_v42  ;;  %v11203_v23 = vld [vmem:[#allocation13_spill] sm:$0xff]  ;;  %v11204_v42 = vrot.slane %v8879_v38, %v7906_v13 }
 0x1dc   : > { %v2377_v1 = vpop.permute.xlu1 %2376  ;;  %v2379_v12 = vpop.permute.xlu0 %2378  ;;  %11200 = vst [vmem:[#allocation62_spill] sm:$0xff] %v9170_v52  ;;  %11201 = vst [vmem:[#allocation63_spill] sm:$0xff] %v9172_v17  ;;  %v2347_v29 = vadd.f32 %v8548_v35, %v11203_v23  ;;  %v3685_v7 = vcombine.low %v8970_v14, %v9016_v63  ;;  %v3686_v45 = vcombine.low %v9036_v58, %v9065_v21  ;;  %5263 = vrot.lane.b32.xlu1 %v9122_v2, %s7555_s11 }
 0x1dd   : > { %v3643_v27 = vcombine.low %v11204_v42, %v3642_v49  ;;  %11205 = vst [vmem:[#allocation12_spill] sm:$0xff] %v9181_v18  ;;  %v4630_v30 = vcombine.high %v4628_v31, %v4628_v31  ;;  %v4631_v35 = vcombine.high %v11206_v6, %v11206_v6  ;;  %3955 = vrot.lane.b32.xlu0 %v9134_v24, %s7555_s11  ;;  %v9193_v26 = vrot.slane %v3660_v47, 1 }
 0x1de   : > { %v2410_v38 = vadd.f32 %v2377_v1, %v2346_v16  ;;  %v2411_v49 = vadd.f32 %v2379_v12, %v2347_v29  ;;  %v4595_v14 = vcombine.high %v8911_v60, %v8911_v60  ;;  %v9199_v21 = vrot.slane %v11206_v6, %v7906_v13 }
 0x1df   : > { %v3811_v32 = vrot.slane %v3643_v27, 1  ;;  %v9202_v36 = vrot.slane %v4631_v35, %v7906_v13  ;;  %v3693_v1 = vrot.slane %v3685_v7, %v7906_v13  ;;  %v3700_v12 = vrot.slane %v3686_v45, %v7906_v13 }
 0x1e0   : > { %v2487_v63 = vpop.permute.xlu1 %2486  ;;  %v2489_v58 = vpop.permute.xlu0 %2488  ;;  %3949 = vrot.lane.b32.xlu1 %v9154_v50, %s7555_s11  ;;  %v9211_v60 = vcombine.low %v4630_v30, %v9199_v21  ;;  %v4945_v23 = vrot.slane %v4628_v31, %v7906_v13  ;;  %v9219_v29 = vrot.slane %v4595_v14, %v7906_v13  ;;  %v3708_v42 = vrot.slane %v9050_v10, %v7906_v13 }
 0x1e1   : > { %v2520_v4 = vadd.f32 %v2487_v63, %v2410_v38  ;;  %v2521_v40 = vadd.f32 %v2489_v58, %v2411_v49  ;;  %v9206_v8 = vsel %vm2275_vm2, %v3811_v32, %v9193_v26  ;;  %5159 = vrot.lane.b32.xlu0 %v9130_v46, %s7554_s10  ;;  %v4647_v27 = vcombine.high %v9202_v36, %v9202_v36 }
 0x1e2   : > { %v3701_v30 = vcombine.low %v3693_v1, %v3700_v12  ;;  %v9231_v6 = vrot.slane %v4945_v23, 1  ;;  %v3819_v63 = vrot.slane %v3708_v42, 1  ;;  %v5084_v58 = vrot.slane %v8924_v11, 1  ;;  %v11209_v1 = vld [vmem:[#allocation21_spill] sm:$0xff]  ;;  %v11210_v11 = vld [vmem:[#allocation20_spill] sm:$0xff] }
 0x1e3   : > { %v2584_v61 = vadd.f32 %v2551_v34, %v2520_v4  ;;  %v2585_v16 = vadd.f32 %v2553_v9, %v2521_v40  ;;  %v11207_v34 = vld [vmem:[#allocation27_spill] sm:$0xff]  ;;  %v3669_v4 = vcombine.low %v9012_v3, %v9074_v59  ;;  %v3668_v40 = vcombine.low %v9061_v55, %v9085_v57 }
 0x1e4   : > { %3953 = vrot.lane.b32.xlu1 %v9170_v52, %s7555_s11  ;;  %v4655_v9 = vrot.slane %v11207_v34, %v7906_v13  ;;  %v9234_v38 = vpop.permute.xlu1 %3933  ;;  %v4648_v32 = vcombine.high %v11207_v34, %v11207_v34  ;;  %v9244_v14 = vrot.slane %v3701_v30, 1  ;;  %v3118_v12 = vcombine.high %v11209_v1, %v11209_v1 }
 0x1e5   : > { %vm2600_vm11 = vcmp.gt.f32.partialorder %v2584_v61, 0.0  ;;  %v2616_v47 = vmul.f32 0.1, %v2584_v61  ;;  %vm2601_vm12 = vcmp.gt.f32.partialorder %v2585_v16, 0.0  ;;  %v2617_v7 = vmul.f32 0.1, %v2585_v16  ;;  %5337 = vrot.lane.b32.xlu0 %v9130_v46, %s7553_s9 }
 0x1e6   : > { %11208 = vst [vmem:[#allocation13_spill] sm:$0xff] %v9234_v38  ;;  %v9236_v49 = vcombine.low %v4647_v27, %v4655_v9  ;;  %v9265_v3 = vsel %vm2275_vm2, %v9244_v14, %v3819_v63  ;;  %v11076_v55 = vrot.slane %v9164_v54, 1  ;;  %v3083_v59 = vcombine.high %v9050_v10, %v9050_v10  ;;  %v11222_v38 = vld [vmem:[#allocation24_spill] sm:$0xff] }
 0x1e7   : > { %v2632_v31 = vsel %vm2600_vm11, %v2584_v61, %v2616_v47  ;;  %v2633_v45 = vsel %vm2601_vm12, %v2585_v16, %v2617_v7  ;;  %v9257_v61 = vrot.slane %v11209_v1, %v7906_v13  ;;  %v4665_v16 = vcombine.high %v11210_v11, %v11210_v11  ;;  %v11213_v7 = vld [vmem:[#allocation23_spill] sm:$0xff]  ;;  %v9324_v1 = vpop.f32.mrb[40].mxu1 }
 0x1e8   : > { %2649 = vst.msk [vmem:[%s8868_s25 + $0x70] sm:$0xff] %vm2634_vm7, %v2632_v31  ;;  %2650 = vst.msk [vmem:[%s8868_s25 + $0x78] sm:$0xff] %vm2634_vm7, %v2633_v45  ;;  %5157 = vrot.lane.b32.xlu1 %v9159_v33, %s7554_s10  ;;  %v9270_v57 = vpop.permute.xlu0 %3931  ;;  %v9272_v23 = vpop.permute.xlu1 %5315  ;;  %v4646_v42 = vcombine.high %v9199_v21, %v9199_v21  ;;  %v9277_v27 = vrot.slane %v3118_v12, %v7906_v13  ;;  %v3084_v34 = vcombine.high %v11213_v7, %v11213_v7  ;;  %v11215_v45 = vld [vmem:[#allocation25_spill] sm:$0xff] }
 0x1e9   : > { %3951 = vrot.lane.b32.xlu0 %v9172_v17, %s7555_s11  ;;  %11211 = vst [vmem:[#allocation22_spill] sm:$0xff] %v9270_v57  ;;  %11212 = vst [vmem:[#allocation27_spill] sm:$0xff] %v9272_v23  ;;  %v9281_v47 = vcombine.high %v9257_v61, %v9257_v61  ;;  %v9286_v31 = vrot.slane %v4648_v32, %v7906_v13  ;;  %v9291_v10 = vsel %vm2275_vm2, %v5084_v58, %v11076_v55  ;;  %v11219_v17 = vld [vmem:[#allocation28_spill] sm:$0xff]  ;;  %v9351_v0 = vpop.f32.mrb[41].mxu1 }
 0x1ea   : > { %11214 = vst [vmem:[#allocation21_spill] sm:$0xff] %v9291_v10  ;;  %v9295_v21 = vrot.slane %v11213_v7, %v7906_v13  ;;  %v3135_v30 = vcombine.high %v11215_v45, %v11215_v45  ;;  %v4663_v63 = vcombine.high %v4655_v9, %v4655_v9  ;;  %v9303_v32 = vcombine.high %v9277_v27, %v9277_v27 }
 0x1eb   : > { %v9308_v58 = vrot.slane %v3084_v34, %v7906_v13  ;;  %v3683_v12 = vrot.slane %v3669_v4, %v7906_v13  ;;  %v9315_v7 = vrot.slane %v11210_v11, %v7906_v13  ;;  %v9322_v55 = vrot.slane %v11215_v45, %v7906_v13  ;;  %11216 = vst [vmem:[#allocation20_spill] sm:$0xff] %v9324_v1 }
 0x1ec   : > { %5335 = vrot.lane.b32.xlu1 %v9159_v33, %s7553_s9  ;;  %v9318_v9 = vcombine.low %v3083_v59, %v9295_v21  ;;  %v3667_v34 = vrot.slane %v9069_v62, %v7906_v13  ;;  %v9328_v4 = vpop.permute.xlu0 %5317  ;;  %v9330_v35 = vpop.permute.xlu1 %3929  ;;  %v9334_v11 = vcombine.high %v9295_v21, %v9295_v21  ;;  %v3101_v45 = vcombine.high %v11219_v17, %v11219_v17 }
 0x1ed   : > { %5155 = vrot.lane.b32.xlu0 %v9164_v54, %s7554_s10  ;;  %11217 = vst [vmem:[#allocation23_spill] sm:$0xff] %v9328_v4  ;;  %11218 = vst [vmem:[#allocation25_spill] sm:$0xff] %v9330_v35  ;;  %v9338_v59 = vcombine.high %v9308_v58, %v9308_v58  ;;  %v3676_v52 = vrot.slane %v3668_v40, %v7906_v13  ;;  %v4947_v24 = vcombine.low %v4646_v42, %v9202_v36  ;;  %v9363_v42 = vpop.f32.mrb[42].mxu1 }
 0x1ee   : > { %v9345_v62 = vrot.slane %v3135_v30, %v7906_v13  ;;  %v9349_v50 = vcombine.high %v9322_v55, %v9322_v55  ;;  %11220 = vst [vmem:[#allocation28_spill] sm:$0xff] %v9351_v0  ;;  %v4679_v2 = vrot.slane %v4665_v16, %v7906_v13  ;;  %v4964_v4 = vcombine.low %v4663_v63, %v9286_v31  ;;  %v9375_v23 = vpop.f32.mrb[43].mxu1 }
 0x1ef   : > { %v9361_v36 = vrot.slane %v11219_v17, %v7906_v13  ;;  %11221 = vst [vmem:[#allocation64_spill] sm:$0xff] %v9363_v42  ;;  %v4680_v16 = vcombine.high %v9315_v7, %v9315_v7  ;;  %v4954_v30 = vrot.slane %v9211_v60, %v7906_v13  ;;  %v4682_v63 = vcombine.high %v11222_v38, %v11222_v38 }
 0x1f0   : > { %3847 = vrot.lane.b32.xlu1 %v9206_v8, %s7554_s10  ;;  %11223 = vst [vmem:[#allocation24_spill] sm:$0xff] %v9375_v23  ;;  %v9377_v17 = vpop.permute.xlu0 %4041  ;;  %v9379_v57 = vpop.permute.xlu1 %4039  ;;  %v3710_v35 = vcombine.low %v9334_v11, %v9308_v58  ;;  %v9384_v43 = vrot.slane %v3101_v45, %v7906_v13  ;;  %v4961_v40 = vrot.slane %v4947_v24, %v7906_v13  ;;  %v5090_v23 = vrot.slane %v9130_v46, 1 }
 0x1f1   : > { %5333 = vrot.lane.b32.xlu0 %v9164_v54, %s7553_s9  ;;  %11224 = vst [vmem:[#allocation65_spill] sm:$0xff] %v9377_v17  ;;  %11225 = vst [vmem:[#allocation66_spill] sm:$0xff] %v9379_v57  ;;  %v9388_v60 = vcombine.high %v9361_v36, %v9361_v36  ;;  %v3726_v53 = vcombine.low %v9338_v59, %v9361_v36  ;;  %v3684_v17 = vcombine.low %v3676_v52, %v3683_v12 }
 0x1f2   : > { %v3814_v42 = vrot.slane %v3667_v34, 1  ;;  %v4971_v57 = vrot.slane %v9236_v49, %v7906_v13  ;;  %v4978_v0 = vrot.slane %v4964_v4, %v7906_v13  ;;  %v3717_v45 = vrot.slane %v9318_v9, %v7906_v13 }
 0x1f3   : > { %v3727_v1 = vcombine.low %v9388_v60, %v9384_v43  ;;  %v9407_v46 = vsel %vm2275_vm2, %v5090_v23, %v9231_v6  ;;  %v3816_v24 = vrot.slane %v3684_v17, 1  ;;  %v3724_v9 = vrot.slane %v3710_v35, %v7906_v13 }
 0x1f4   : > { %4059 = vrot.lane.b32.xlu1 %v9206_v8, %s7553_s9  ;;  %11226 = vst [vmem:[#allocation67_spill] sm:$0xff] %v9407_v46  ;;  %v9411_v52 = vsel %vm2275_vm2, %v9193_v26, %v3814_v42  ;;  %v5089_v8 = vrot.slane %v9159_v33, 1  ;;  %v9414_v49 = vpop.permute.xlu0 %3935  ;;  %v3734_v34 = vrot.slane %v3726_v53, %v7906_v13  ;;  %v11229_v6 = vrot.slane %v9219_v29, 1 }
 0x1f5   : > { %3853 = vrot.lane.b32.xlu0 %v9265_v3, %s7554_s10  ;;  %11227 = vst [vmem:[#allocation68_spill] sm:$0xff] %v9414_v49  ;;  %v3741_v4 = vrot.slane %v3727_v1, %v7906_v13  ;;  %v11230_v17 = vrot.slane %v9164_v54, 1  ;;  %v4681_v26 = vcombine.high %v4679_v2, %v4679_v2  ;;  %v3818_v33 = vsel %vm2275_vm2, %v3816_v24, %v9244_v14 }
 0x1f6   : > { %v9416_v12 = vpop.permute.xlu1 %3831  ;;  %v9431_v42 = vsel %vm2275_vm2, %v5089_v8, %v5090_v23  ;;  %v9433_v49 = vcombine.low %v4954_v30, %v4961_v40  ;;  %v4689_v53 = vrot.slane %v11222_v38, %v7906_v13  ;;  %v9441_v54 = vcombine.high %v9384_v43, %v9384_v43 }
 0x1f7   : > { %11228 = vst [vmem:[#allocation69_spill] sm:$0xff] %v9416_v12  ;;  %v9426_v18 = vsel %vm2275_vm2, %v11230_v17, %v11229_v6  ;;  %11232 = vst [vmem:[#allocation71_spill] sm:$0xff] %v9431_v42  ;;  %v9443_v29 = vcombine.low %v4971_v57, %v4978_v0  ;;  %v4696_v35 = vrot.slane %v4682_v63, %v7906_v13 }
 0x1f8   : > { %11231 = vst [vmem:[#allocation70_spill] sm:$0xff] %v9426_v18  ;;  %5267 = vrot.lane.b32.xlu1 %v9291_v10, %s7555_s11  ;;  %v3725_v1 = vcombine.low %v3717_v45, %v3724_v9  ;;  %v3742_v38 = vcombine.low %v3734_v34, %v3741_v4  ;;  %v3749_v40 = vrot.slane %v9441_v54, %v7906_v13 }
 0x1f9   : > { %4065 = vrot.lane.b32.xlu0 %v9265_v3, %s7553_s9  ;;  %v9455_v30 = vcombine.low %v9315_v7, %v4680_v16  ;;  %v9457_v24 = vcombine.low %v4679_v2, %v4681_v26  ;;  %v4697_v0 = vcombine.high %v4689_v53, %v4689_v53  ;;  %v4664_v8 = vcombine.high %v9286_v31, %v9286_v31 }
 0x1fa   : > { %v9448_v14 = vpop.permute.xlu0 %3833  ;;  %v9450_v23 = vpop.permute.xlu1 %4043  ;;  %v3821_v3 = vrot.slane %v3725_v1, 1  ;;  %v3822_v57 = vrot.slane %v3742_v38, 1  ;;  %v3824_v63 = vrot.slane %v3749_v40, 1  ;;  %v9466_v45 = vcombine.high %v9345_v62, %v9345_v62 }
 0x1fb   : > { %11233 = vst [vmem:[#allocation72_spill] sm:$0xff] %v9448_v14  ;;  %11234 = vst [vmem:[#allocation73_spill] sm:$0xff] %v9450_v23  ;;  %v9470_v2 = vrot.slane %v8689_v22, %v7906_v13  ;;  %v4699_v7 = vcombine.high %v8711_v25, %v8711_v25  ;;  %v4698_v16 = vcombine.high %v4696_v35, %v4696_v35  ;;  %v9494_v1 = vpop.f32.mrb[44].mxu1  ;;  %v5095_v10 = vrot.slane %v9443_v29, 1 }
 0x1fc   : > { %3851 = vrot.lane.b32.xlu1 %v3818_v33, %s7554_s10  ;;  %v9479_v31 = vsel %vm2275_vm2, %v3821_v3, %v3822_v57  ;;  %v9482_v4 = vsel %vm2275_vm2, %v3822_v57, %v3824_v63  ;;  %v9486_v6 = vrot.slane %v8711_v25, %v7906_v13  ;;  %v3750_v22 = vcombine.low %v9257_v61, %v9281_v47 }
 0x1fd   : > { %5273 = vrot.lane.b32.xlu0 %v9407_v46, %s7555_s11  ;;  %v3751_v17 = vcombine.low %v9277_v27, %v9303_v32  ;;  %v4995_v38 = vrot.slane %v9455_v30, %v7906_v13  ;;  %v3767_v40 = vcombine.low %v9322_v55, %v9349_v50  ;;  %v4713_v25 = vrot.slane %v4699_v7, %v7906_v13 }
 0x1fe   : > { %v9474_v9 = vpop.permute.xlu0 %4045  ;;  %v9476_v34 = vpop.permute.xlu1 %5145  ;;  %v4714_v61 = vcombine.high %v9486_v6, %v9486_v6  ;;  %v5002_v3 = vrot.slane %v9457_v24, %v7906_v13  ;;  %v4986_v57 = vrot.slane %v4664_v8, %v7906_v13  ;;  %v3768_v30 = vcombine.low %v9345_v62, %v9466_v45 }
 0x1ff   : > { %11235 = vst [vmem:[#allocation74_spill] sm:$0xff] %v9474_v9  ;;  %11236 = vst [vmem:[#allocation75_spill] sm:$0xff] %v9476_v34  ;;  %v5094_v63 = vrot.slane %v9433_v49, 1  ;;  %v5004_v26 = vcombine.low %v4689_v53, %v4697_v0  ;;  %v5669_v24 = vcombine.high %v8724_v44, %v8724_v44  ;;  %v3758_v8 = vrot.slane %v3750_v22, %v7906_v13 }
 0x200   : > { %4063 = vrot.lane.b32.xlu1 %v3818_v33, %s7553_s9  ;;  %v5005_v33 = vcombine.low %v4696_v35, %v4698_v16  ;;  %v3765_v23 = vrot.slane %v3751_v17, %v7906_v13  ;;  %v5028_v9 = vcombine.low %v4714_v61, %v4713_v25  ;;  %v4715_v34 = vcombine.high %v4713_v25, %v4713_v25  ;;  %v9532_v16 = vpop.f32.mrb[45].mxu1 }
 0x201   : > { %3849 = vrot.lane.b32.xlu0 %v9411_v52, %s7554_s10  ;;  %v3775_v14 = vrot.slane %v3767_v40, %v7906_v13  ;;  %v9525_v53 = vsel %vm2275_vm2, %v5094_v63, %v5095_v10  ;;  %v9528_v35 = vrot.slane %v5669_v24, %v7906_v13  ;;  %v4716_v0 = vcombine.high %v8737_v28, %v8737_v28  ;;  %v7425_v61 = vpop.f32.mrb[46].mxu1 }
 0x202   : > { %v9512_v46 = vpop.permute.xlu0 %5253  ;;  %v9514_v7 = vpop.permute.xlu1 %5251  ;;  %11239 = vst [vmem:[#allocation78_spill] sm:$0xff] %v9525_v53  ;;  %v3782_v22 = vrot.slane %v3768_v30, %v7906_v13  ;;  %v4723_v17 = vrot.slane %v8737_v28, %v7906_v13  ;;  %v5097_v40 = vrot.slane %v4986_v57, 1  ;;  %v5686_v25 = vcombine.high %v8754_v39, %v8754_v39 }
 0x203   : > { %11237 = vst [vmem:[#allocation76_spill] sm:$0xff] %v9512_v46  ;;  %11238 = vst [vmem:[#allocation77_spill] sm:$0xff] %v9514_v7  ;;  %v9553_v30 = vcombine.high %v9528_v35, %v9528_v35  ;;  %v4730_v28 = vrot.slane %v4716_v0, %v7906_v13  ;;  %v5036_v57 = vrot.slane %v5028_v9, %v7906_v13 }
 0x204   : > { %5271 = vrot.lane.b32.xlu1 %v9431_v42, %s7555_s11  ;;  %v9547_v42 = vrot.slane %v8687_v5, %v7906_v13  ;;  %v5029_v61 = vcombine.low %v4715_v34, %v4723_v17  ;;  %v9564_v5 = vpop.f32.mrb[47].mxu1  ;;  %v5012_v46 = vrot.slane %v5004_v26, %v7906_v13  ;;  %v5019_v7 = vrot.slane %v5005_v33, %v7906_v13 }
 0x205   : > { %4061 = vrot.lane.b32.xlu0 %v9411_v52, %s7553_s9  ;;  %v3790_v52 = vrot.slane %v9470_v2, %v7906_v13  ;;  %v3766_v12 = vcombine.low %v3758_v8, %v3765_v23  ;;  %v4732_v0 = vcombine.high %v4730_v28, %v4730_v28  ;;  %v9574_v9 = vrot.slane %v5686_v25, %v7906_v13 }
 0x206   : > { %v9541_v63 = vpop.permute.xlu0 %3939  ;;  %v9543_v24 = vpop.permute.xlu1 %5323  ;;  %v3783_v34 = vcombine.low %v3775_v14, %v3782_v22  ;;  %v3363_v26 = vcombine.low %v9295_v21, %v9334_v11  ;;  %v5003_v14 = vcombine.low %v4995_v38, %v5002_v3  ;;  %v5027_v21 = vrot.slane %v9486_v6, %v7906_v13 }
 0x207   : > { %11240 = vst [vmem:[#allocation79_spill] sm:$0xff] %v9541_v63  ;;  %11241 = vst [vmem:[#allocation80_spill] sm:$0xff] %v9543_v24  ;;  %v9558_v63 = vsel %vm2275_vm2, %v5095_v10, %v5097_v40  ;;  %v9562_v24 = vrot.slane %v8754_v39, %v7906_v13  ;;  %v5043_v10 = vrot.slane %v5029_v61, %v7906_v13  ;;  %v3829_v61 = vrot.slane %v3790_v52, 1 }
 0x208   : > { %11242 = vst [vmem:[#allocation81_spill] sm:$0xff] %v9558_v63  ;;  %5161 = vrot.lane.b32.xlu1 %v9433_v49, %s7554_s10  ;;  %v5046_v8 = vcombine.low %v4732_v0, %v9547_v42  ;;  %v3364_v40 = vcombine.low %v9308_v58, %v9338_v59  ;;  %v5676_v11 = vrot.slane %v8724_v44, %v7906_v13  ;;  %v3827_v38 = vrot.slane %v3783_v34, 1 }
 0x209   : > { %5269 = vrot.lane.b32.xlu0 %v9426_v18, %s7555_s11  ;;  %v4731_v18 = vcombine.high %v4723_v17, %v4723_v17  ;;  %v9587_v25 = vcombine.low %v5036_v57, %v5043_v10  ;;  %v9597_v22 = vcombine.high %v9562_v24, %v9562_v24  ;;  %v5020_v58 = vcombine.low %v5012_v46, %v5019_v7 }
 0x20a   : > { %v9580_v23 = vpop.permute.xlu0 %5143  ;;  %v9582_v33 = vpop.permute.xlu1 %3937  ;;  %v9603_v59 = vcombine.high %v9574_v9, %v9574_v9  ;;  %v3380_v6 = vcombine.low %v9361_v36, %v9388_v60  ;;  %v5737_v17 = vcombine.high %v8791_v37, %v8791_v37  ;;  %v5703_v52 = vcombine.high %v8801_v56, %v8801_v56 }
 0x20b   : > { %11243 = vst [vmem:[#allocation82_spill] sm:$0xff] %v9582_v33  ;;  %11244 = vst [vmem:[#allocation83_spill] sm:$0xff] %v9587_v25  ;;  %v9617_v46 = vrot.slane %v8801_v56, %v7906_v13  ;;  %v5045_v7 = vcombine.low %v4731_v18, %v4730_v28  ;;  %v9625_v60 = vsel %vm2275_vm2, %v3827_v38, %v3829_v61  ;;  %v5102_v57 = vrot.slane %v5027_v21, 1  ;;  %v11254_v33 = vld [vmem:[#allocation49_spill] sm:$0xff] }
 0x20c   : > { %5339 = vrot.lane.b32.xlu1 %v9433_v49, %s7553_s9  ;;  %v3826_v49 = vrot.slane %v3766_v12, 1  ;;  %v3381_v12 = vcombine.low %v9384_v43, %v9441_v54  ;;  %v5684_v0 = vcombine.high %v5676_v11, %v5676_v11  ;;  %v6754_v10 = vcombine.low %v9562_v24, %v9597_v22 }
 0x20d   : > { %5163 = vrot.lane.b32.xlu0 %v9443_v29, %s7554_s10  ;;  %v9631_v56 = vrot.slane %v5737_v17, %v7906_v13  ;;  %v9636_v43 = vrot.slane %v5703_v52, %v7906_v13  ;;  %v6869_v18 = vcombine.low %v9603_v59, %v9617_v46  ;;  %v5099_v54 = vrot.slane %v5003_v14, 1 }
 0x20e   : > { %v9607_v3 = vpop.permute.xlu0 %5321  ;;  %v9609_v44 = vpop.permute.xlu1 %5141  ;;  %v9622_v36 = vsel %vm2275_vm2, %v3826_v49, %v3827_v38  ;;  %v5100_v28 = vrot.slane %v5020_v58, 1  ;;  %v3371_v34 = vrot.slane %v3363_v26, %v7906_v13  ;;  %v3378_v11 = vrot.slane %v3364_v40, %v7906_v13 }
 0x20f   : > { %11245 = vst [vmem:[#allocation84_spill] sm:$0xff] %v9607_v3  ;;  %v3388_v49 = vrot.slane %v3380_v6, %v7906_v13  ;;  %v5053_v38 = vrot.slane %v5045_v7, %v7906_v13  ;;  %v5060_v17 = vrot.slane %v5046_v8, %v7906_v13  ;;  %v3395_v52 = vrot.slane %v3381_v12, %v7906_v13 }
 0x210   : > { %5165 = vrot.lane.b32.xlu1 %v5003_v14, %s7554_s10  ;;  %v6851_v26 = vcombine.low %v5684_v0, %v9528_v35  ;;  %v5718_v39 = vcombine.high %v9617_v46, %v9617_v46  ;;  %v9657_v40 = vsel %vm2275_vm2, %v5099_v54, %v5100_v28  ;;  %v9661_v6 = vrot.slane %v6754_v10, %v7906_v13  ;;  %v11253_v54 = vld [vmem:[#allocation48_spill] sm:$0xff] }
 0x211   : > { %5341 = vrot.lane.b32.xlu0 %v9443_v29, %s7553_s9  ;;  %v6753_v29 = vcombine.low %v9528_v35, %v9553_v30  ;;  %11248 = vst [vmem:[#allocation87_spill] sm:$0xff] %v9657_v40  ;;  %v9665_v8 = vcombine.high %v9636_v43, %v9636_v43  ;;  %v5753_v35 = vcombine.high %v9631_v56, %v9631_v56 }
 0x212   : > { %v9641_v61 = vpop.permute.xlu0 %3837  ;;  %v9643_v21 = vpop.permute.xlu1 %5319  ;;  %v9676_v0 = vcombine.low %v3371_v34, %v3378_v11  ;;  %v6868_v10 = vcombine.low %v9597_v22, %v9574_v9  ;;  %v9682_v3 = vrot.slane %v11253_v54, %v7906_v13  ;;  %v6859_v22 = vrot.slane %v6851_v26, %v7906_v13 }
 0x213   : > { %11246 = vst [vmem:[#allocation85_spill] sm:$0xff] %v9641_v61  ;;  %11247 = vst [vmem:[#allocation86_spill] sm:$0xff] %v9643_v21  ;;  %v9695_v34 = vrot.slane %v6753_v29, %v7906_v13  ;;  %v6771_v11 = vcombine.low %v9617_v46, %v5718_v39  ;;  %v9728_v61 = vcombine.low %v3388_v49, %v3395_v52 }
 0x214   : > { %5343 = vrot.lane.b32.xlu1 %v5003_v14, %s7553_s9  ;;  %v9668_v14 = vsel %vm2275_vm2, %v5100_v28, %v5102_v57  ;;  %11252 = vst [vmem:[#allocation91_spill] sm:$0xff] %v9676_v0  ;;  %v5720_v57 = vcombine.high %v11254_v33, %v11254_v33  ;;  %v5754_v28 = vcombine.high %v11253_v54, %v11253_v54 }
 0x215   : > { %5167 = vrot.lane.b32.xlu0 %v5020_v58, %s7554_s10  ;;  %11249 = vst [vmem:[#allocation88_spill] sm:$0xff] %v9668_v14  ;;  %v9702_v21 = vcombine.low %v5753_v35, %v9682_v3  ;;  %11259 = vst [vmem:[#allocation93_spill] sm:$0xff] %v9728_v61  ;;  %v6891_v46 = vrot.slane %v5718_v39, %v7906_v13 }
 0x216   : > { %v9672_v12 = vpop.permute.xlu0 %4049  ;;  %v9674_v7 = vpop.permute.xlu1 %3941  ;;  %v5734_v54 = vrot.slane %v5720_v57, %v7906_v13  ;;  %v6876_v57 = vrot.slane %v6868_v10, %v7906_v13 }
 0x217   : > { %11250 = vst [vmem:[#allocation89_spill] sm:$0xff] %v9672_v12  ;;  %11251 = vst [vmem:[#allocation90_spill] sm:$0xff] %v9674_v7  ;;  %v9690_v12 = vrot.slane %v11254_v33, %v7906_v13  ;;  %v9692_v7 = vcombine.low %v5053_v38, %v5060_v17  ;;  %v5744_v33 = vrot.slane %v8791_v37, %v7906_v13 }
 0x218   : > { %3957 = vrot.lane.b32.xlu1 %v9676_v0, %s7555_s11  ;;  %v11258_v37 = vcombine.low %v9553_v30, %v9562_v24  ;;  %v6883_v0 = vrot.slane %v6869_v18, %v7906_v13 }
 0x219   : > { %11255 = vst [vmem:[#allocation48_spill] sm:$0xff] %v9692_v7  ;;  %5345 = vrot.lane.b32.xlu0 %v5020_v58, %s7553_s9  ;;  %v9710_v29 = vcombine.high %v9690_v12, %v9690_v12  ;;  %v6017_v38 = vcombine.low %v9665_v8, %v9690_v12  ;;  %v6770_v58 = vcombine.low %v9574_v9, %v9603_v59 }
 0x21a   : > { %v9716_v17 = vpop.permute.xlu0 %5257  ;;  %v9718_v26 = vpop.permute.xlu1 %3835  ;;  %v6866_v35 = vrot.slane %v11258_v37, %v7906_v13  ;;  %v9737_v9 = vrot.slane %v6771_v11, %v7906_v13  ;;  %v5752_v30 = vcombine.high %v5744_v33, %v5744_v33  ;;  %v6895_v37 = vrot.slane %v6891_v46, 1 }
 0x21b   : > { %11256 = vst [vmem:[#allocation49_spill] sm:$0xff] %v9716_v17  ;;  %11257 = vst [vmem:[#allocation92_spill] sm:$0xff] %v9718_v26  ;;  %v9732_v17 = vrot.slane %v5754_v28, %v7906_v13  ;;  %v5736_v26 = vcombine.high %v5734_v54, %v5734_v54  ;;  %v6018_v24 = vcombine.low %v9710_v29, %v5734_v54 }
 0x21c   : > { %3855 = vrot.lane.b32.xlu1 %v9479_v31, %s7554_s10  ;;  %v6025_v49 = vrot.slane %v6017_v38, %v7906_v13  ;;  %v9748_v52 = vrot.slane %v6770_v58, %v7906_v13  ;;  %v6867_v10 = vcombine.low %v6859_v22, %v6866_v35  ;;  %v6884_v28 = vcombine.low %v6876_v57, %v6883_v0 }
 0x21d   : > { %3959 = vrot.lane.b32.xlu0 %v9728_v61, %s7555_s11  ;;  %v6034_v59 = vcombine.low %v5736_v26, %v5744_v33  ;;  %v9752_v11 = vcombine.high %v9732_v17, %v9732_v17  ;;  %v6032_v38 = vrot.slane %v6018_v24, %v7906_v13  ;;  %v6339_v22 = vcombine.low %v5744_v33, %v5752_v30 }
 0x21e   : > { %v9742_v18 = vpop.permute.xlu0 %5147  ;;  %v9744_v39 = vpop.permute.xlu1 %4047  ;;  %v6338_v0 = vcombine.low %v5734_v54, %v5736_v26  ;;  %v5805_v58 = vcombine.high %v8913_v20, %v8913_v20  ;;  %v5771_v46 = vcombine.high %v8943_v41, %v8943_v41  ;;  %v9779_v54 = vrot.slane %v8943_v41, %v7906_v13 }
 0x21f   : > { %11260 = vst [vmem:[#allocation94_spill] sm:$0xff] %v9742_v18  ;;  %11261 = vst [vmem:[#allocation95_spill] sm:$0xff] %v9744_v39  ;;  %v6892_v18 = vrot.slane %v6867_v10, 1  ;;  %v6893_v39 = vrot.slane %v6884_v28, 1  ;;  %v9775_v10 = vcombine.low %v6025_v49, %v6032_v38  ;;  %v6035_v33 = vcombine.low %v5752_v30, %v9631_v56 }
 0x220   : > { %4067 = vrot.lane.b32.xlu1 %v9479_v31, %s7553_s9  ;;  %v6321_v26 = vcombine.low %v9636_v43, %v9665_v8  ;;  %v6322_v41 = vcombine.low %v9690_v12, %v9710_v29  ;;  %v9798_v49 = vrot.slane %v8913_v20, %v7906_v13  ;;  %v9801_v30 = vrot.slane %v5771_v46, %v7906_v13 }
 0x221   : > { %3857 = vrot.lane.b32.xlu0 %v9482_v4, %s7554_s10  ;;  %v9770_v57 = vsel %vm2275_vm2, %v6892_v18, %v6893_v39  ;;  %v9773_v24 = vsel %vm2275_vm2, %v6893_v39, %v6895_v37  ;;  %11264 = vst [vmem:[#allocation98_spill] sm:$0xff] %v9775_v10  ;;  %v9788_v18 = vcombine.high %v9682_v3, %v9682_v3 }
 0x222   : > { %v9765_v35 = vpop.permute.xlu0 %5325  ;;  %v9767_v31 = vpop.permute.xlu1 %5255  ;;  %v6379_v39 = vcombine.low %v9752_v11, %v9779_v54  ;;  %v9805_v43 = vcombine.high %v9779_v54, %v9779_v54  ;;  %v6346_v37 = vrot.slane %v6338_v0, %v7906_v13  ;;  %v9814_v12 = vrot.slane %v5805_v58, %v7906_v13 }
 0x223   : > { %11262 = vst [vmem:[#allocation96_spill] sm:$0xff] %v9765_v35  ;;  %11263 = vst [vmem:[#allocation97_spill] sm:$0xff] %v9767_v31  ;;  %v6361_v20 = vrot.slane %v9631_v56, %v7906_v13  ;;  %v6042_v29 = vrot.slane %v6034_v59, %v7906_v13  ;;  %v6363_v38 = vcombine.low %v9788_v18, %v9732_v17 }
 0x224   : > { %5275 = vrot.lane.b32.xlu1 %v9525_v53, %s7555_s11  ;;  %v6049_v46 = vrot.slane %v6035_v33, %v7906_v13  ;;  %v6336_v0 = vrot.slane %v6322_v41, %v7906_v13  ;;  %v9830_v56 = vcombine.high %v9798_v49, %v9798_v49  ;;  %v6380_v59 = vcombine.low %v9805_v43, %v9801_v30 }
 0x225   : > { %4069 = vrot.lane.b32.xlu0 %v9482_v4, %s7553_s9  ;;  %v6353_v4 = vrot.slane %v6339_v22, %v7906_v13  ;;  %v6329_v22 = vrot.slane %v6321_v26, %v7906_v13  ;;  %v9840_v33 = vcombine.high %v9814_v12, %v9814_v12  ;;  %v9846_v26 = vrot.slane %v9007_v51, %v7906_v13 }
 0x226   : > { %v9807_v8 = vpop.permute.xlu0 %3947  ;;  %v9809_v28 = vpop.permute.xlu1 %3839  ;;  %v9842_v61 = vcombine.low %v6042_v29, %v6049_v46  ;;  %v6377_v53 = vrot.slane %v6363_v38, %v7906_v13  ;;  %v6387_v29 = vrot.slane %v6379_v39, %v7906_v13 }
 0x227   : > { %11265 = vst [vmem:[#allocation99_spill] sm:$0xff] %v9807_v8  ;;  %11266 = vst [vmem:[#allocation100_spill] sm:$0xff] %v9809_v28  ;;  %v6354_v41 = vcombine.low %v6346_v37, %v6353_v4  ;;  %v6370_v8 = vrot.slane %v9702_v21, %v7906_v13  ;;  %v6103_v46 = vcombine.low %v9840_v33, %v9846_v26 }
 0x228   : > { %3859 = vrot.lane.b32.xlu1 %v9622_v36, %s7554_s10  ;;  %11269 = vst [vmem:[#allocation103_spill] sm:$0xff] %v9842_v61  ;;  %v6394_v4 = vrot.slane %v6380_v59, %v7906_v13  ;;  %v6337_v37 = vcombine.low %v6329_v22, %v6336_v0  ;;  %v9878_v22 = vcombine.high %v9801_v30, %v9801_v30 }
 0x229   : > { %5277 = vrot.lane.b32.xlu0 %v9558_v63, %s7555_s11  ;;  %v6652_v63 = vrot.slane %v6361_v20, 1  ;;  %v6650_v21 = vrot.slane %v6354_v41, 1  ;;  %v11270_v20 = vld [vmem:[#allocation17_spill] sm:$0xff]  ;;  %v5822_v0 = vcombine.high %v9007_v51, %v9007_v51  ;;  %v6051_v51 = vcombine.low %v9682_v3, %v9788_v18 }
 0x22a   : > { %v9834_v36 = vpop.permute.xlu0 %5151  ;;  %v9836_v58 = vpop.permute.xlu1 %4051  ;;  %v6649_v28 = vrot.slane %v6337_v37, 1  ;;  %v6052_v3 = vcombine.low %v9732_v17, %v9752_v11 }
 0x22b   : > { %11267 = vst [vmem:[#allocation101_spill] sm:$0xff] %v9834_v36  ;;  %11268 = vst [vmem:[#allocation102_spill] sm:$0xff] %v9836_v58  ;;  %v6102_v58 = vcombine.low %v9830_v56, %v9814_v12  ;;  %v6117_v36 = vrot.slane %v6103_v46, %v7906_v13  ;;  %v9869_v39 = vsel %vm2275_vm2, %v6650_v21, %v6652_v63 }
 0x22c   : > { %5279 = vrot.lane.b32.xlu1 %v9657_v40, %s7555_s11  ;;  %v5788_v40 = vcombine.high %v11270_v20, %v11270_v20  ;;  %v6378_v63 = vcombine.low %v6370_v8, %v6377_v53  ;;  %v9886_v46 = vsel %vm2275_vm2, %v6649_v28, %v6650_v21  ;;  %v11276_v28 = vcombine.low %v9695_v34, %v9661_v6 }
 0x22d   : > { %3861 = vrot.lane.b32.xlu0 %v9625_v60, %s7554_s10  ;;  %v5795_v60 = vrot.slane %v11270_v20, %v7906_v13  ;;  %v6110_v41 = vrot.slane %v6102_v58, %v7906_v13  ;;  %v6395_v20 = vcombine.low %v6387_v29, %v6394_v4  ;;  %v9902_v58 = vrot.slane %v5822_v0, %v7906_v13 }
 0x22e   : > { %v9863_v35 = vpop.permute.xlu0 %5329  ;;  %v9865_v38 = vpop.permute.xlu1 %5259  ;;  %v5802_v59 = vrot.slane %v5788_v40, %v7906_v13  ;;  %v6654_v31 = vrot.slane %v6378_v63, 1  ;;  %v5873_v4 = vcombine.high %v9132_v19, %v9132_v19  ;;  %v6420_v6 = vcombine.low %v9798_v49, %v9830_v56 }
 0x22f   : > { %11271 = vst [vmem:[#allocation17_spill] sm:$0xff] %v9863_v35  ;;  %11272 = vst [vmem:[#allocation104_spill] sm:$0xff] %v9865_v38  ;;  %v5803_v40 = vcombine.high %v5795_v60, %v5795_v60  ;;  %v9892_v38 = vcombine.low %v6110_v41, %v6117_v36  ;;  %v6655_v29 = vrot.slane %v6395_v20, 1  ;;  %v6402_v36 = vrot.slane %v9878_v22, %v7906_v13 }
 0x230   : > { %5169 = vrot.lane.b32.xlu1 %v9587_v25, %s7554_s10  ;;  %v5804_v37 = vcombine.high %v5802_v59, %v5802_v59  ;;  %v6059_v11 = vrot.slane %v6051_v51, %v7906_v13  ;;  %v9933_v56 = vcombine.high %v9902_v58, %v9902_v58 }
 0x231   : > { %5281 = vrot.lane.b32.xlu0 %v9668_v14, %s7555_s11  ;;  %11275 = vst [vmem:[#allocation107_spill] sm:$0xff] %v9892_v38  ;;  %v6085_v53 = vcombine.low %v5803_v40, %v5802_v59  ;;  %v6403_v18 = vcombine.low %v5795_v60, %v5803_v40  ;;  %v9920_v63 = vsel %vm2275_vm2, %v6654_v31, %v6655_v29  ;;  %v6657_v20 = vrot.slane %v6402_v36, 1 }
 0x232   : > { %v9888_v25 = vpop.permute.xlu0 %3943  ;;  %v9890_v35 = vpop.permute.xlu1 %3945  ;;  %v6086_v8 = vcombine.low %v5804_v37, %v9798_v49  ;;  %v6404_v41 = vcombine.low %v5802_v59, %v5804_v37  ;;  %v9927_v49 = vrot.slane %v5873_v4, %v7906_v13  ;;  %v5839_v59 = vcombine.high %v9145_v15, %v9145_v15 }
 0x233   : > { %11273 = vst [vmem:[#allocation105_spill] sm:$0xff] %v9888_v25  ;;  %11274 = vst [vmem:[#allocation106_spill] sm:$0xff] %v9890_v35  ;;  %v6093_v34 = vrot.slane %v6085_v53, %v7906_v13  ;;  %v9936_v31 = vsel %vm2275_vm2, %v6655_v29, %v6657_v20  ;;  %v11278_v40 = vcombine.low %v9748_v52, %v9737_v9 }
 0x234   : > { %6787 = vrot.lane.b32.xlu1 %v11276_v28, %s7555_s11  ;;  %v6100_v17 = vrot.slane %v6086_v8, %v7906_v13  ;;  %v5837_v28 = vcombine.high %v9846_v26, %v9846_v26  ;;  %v6428_v37 = vrot.slane %v6420_v6, %v7906_v13  ;;  %v6066_v53 = vrot.slane %v6052_v3, %v7906_v13 }
 0x235   : > { %5171 = vrot.lane.b32.xlu0 %v9692_v7, %s7554_s10  ;;  %v6411_v36 = vrot.slane %v6403_v18, %v7906_v13  ;;  %v6418_v4 = vrot.slane %v6404_v41, %v7906_v13  ;;  %v5846_v9 = vrot.slane %v9145_v15, %v7906_v13  ;;  %v5890_v52 = vcombine.high %v9166_v48, %v9166_v48 }
 0x236   : > { %v9915_v21 = vpop.permute.xlu0 %3841  ;;  %v9917_v0 = vpop.permute.xlu1 %5149  ;;  %v9938_v60 = vcombine.low %v6093_v34, %v6100_v17  ;;  %v9967_v3 = vrot.slane %v5839_v59, %v7906_v13  ;;  %v5897_v6 = vrot.slane %v9166_v48, %v7906_v13  ;;  %v9974_v15 = vcombine.low %v5837_v28, %v9902_v58  ;;  %v11281_v17 = vld [vmem:[#allocation12_spill] sm:$0xff] }
 0x237   : > { %v9978_v34 = vrot.slane %v9132_v19, %v7906_v13  ;;  %v6445_v18 = vcombine.low %v9933_v56, %v5846_v9  ;;  %v9985_v48 = vrot.slane %v5890_v52, %v7906_v13  ;;  %v5856_v28 = vcombine.high %v11281_v17, %v11281_v17 }
 0x238   : > { %6897 = vrot.lane.b32.xlu1 %v9770_v57, %s7553_s9  ;;  %11277 = vst [vmem:[#allocation108_spill] sm:$0xff] %v9938_v60  ;;  %v6421_v57 = vcombine.low %v9814_v12, %v9840_v33  ;;  %v6443_v12 = vrot.slane %v9846_v26, %v7906_v13  ;;  %v5889_v33 = vcombine.high %v9927_v49, %v9927_v49 }
 0x239   : > { %6789 = vrot.lane.b32.xlu0 %v11278_v40, %s7555_s11  ;;  %v5854_v26 = vcombine.high %v5846_v9, %v5846_v9  ;;  %v9993_v19 = vcombine.low %v6059_v11, %v6066_v53  ;;  %v6419_v51 = vcombine.low %v6411_v36, %v6418_v4  ;;  %v5905_v14 = vcombine.high %v5897_v6, %v5897_v6 }
 0x23a   : > { %v9952_v8 = vpop.permute.xlu0 %4053  ;;  %v9954_v29 = vpop.permute.xlu1 %5327  ;;  %v6435_v41 = vrot.slane %v6421_v57, %v7906_v13  ;;  %v6170_v20 = vcombine.low %v5889_v33, %v5897_v6  ;;  %v6119_v57 = vcombine.low %v9902_v58, %v9933_v56  ;;  %v6662_v52 = vrot.slane %v6443_v12, 1 }
 0x23b   : > { %11279 = vst [vmem:[#allocation109_spill] sm:$0xff] %v9952_v8  ;;  %11280 = vst [vmem:[#allocation110_spill] sm:$0xff] %v9954_v29  ;;  %v5855_v35 = vcombine.high %v9967_v3, %v9967_v3  ;;  %v6452_v11 = vrot.slane %v9974_v15, %v7906_v13  ;;  %v10007_v53 = vcombine.high %v9978_v34, %v9978_v34 }
 0x23c   : > { %6791 = vrot.lane.b32.xlu1 %v9775_v10, %s7555_s11  ;;  %11282 = vst [vmem:[#allocation12_spill] sm:$0xff] %v9993_v19  ;;  %v6120_v10 = vcombine.low %v5846_v9, %v5854_v26  ;;  %v6502_v36 = vcombine.low %v9927_v49, %v5889_v33  ;;  %v5863_v58 = vrot.slane %v11281_v17, %v7906_v13 }
 0x23d   : > { %6899 = vrot.lane.b32.xlu0 %v9773_v24, %s7553_s9  ;;  %v6069_v24 = vcombine.low %v9801_v30, %v9878_v22  ;;  %v6171_v30 = vcombine.low %v5905_v14, %v9985_v48  ;;  %v6461_v22 = vcombine.low %v5854_v26, %v9967_v3  ;;  %v10017_v56 = vrot.slane %v5856_v28, %v7906_v13 }
 0x23e   : > { %v9989_v59 = vpop.permute.xlu0 %5261  ;;  %v9991_v40 = vpop.permute.xlu1 %5153  ;;  %v6436_v4 = vcombine.low %v6428_v37, %v6435_v41  ;;  %v6134_v12 = vrot.slane %v6120_v10, %v7906_v13  ;;  %v6178_v33 = vrot.slane %v6170_v20, %v7906_v13  ;;  %v6503_v15 = vcombine.low %v5897_v6, %v5905_v14 }
 0x23f   : > { %v10029_v26 = vcombine.high %v10017_v56, %v10017_v56  ;;  %v6462_v17 = vcombine.low %v5855_v35, %v5863_v58  ;;  %v6154_v10 = vcombine.low %v10007_v53, %v9927_v49  ;;  %v6510_v37 = vrot.slane %v6502_v36, %v7906_v13 }
 0x240   : > { %6795 = vrot.lane.b32.xlu1 %v9993_v19, %s7555_s11  ;;  %v6659_v19 = vrot.slane %v6419_v51, 1  ;;  %v6660_v28 = vrot.slane %v6436_v4, 1  ;;  %v6127_v14 = vrot.slane %v6119_v57, %v7906_v13  ;;  %v6185_v51 = vrot.slane %v6171_v30, %v7906_v13 }
 0x241   : > { %6793 = vrot.lane.b32.xlu0 %v9842_v61, %s7555_s11  ;;  %v10025_v61 = vcombine.high %v5863_v58, %v5863_v58  ;;  %v6136_v6 = vcombine.low %v9967_v3, %v5855_v35  ;;  %v6459_v41 = vrot.slane %v6445_v18, %v7906_v13  ;;  %v6153_v4 = vcombine.low %v10029_v26, %v9978_v34 }
 0x242   : > { %v10019_v9 = vpop.permute.xlu1 %5331  ;;  %v6469_v49 = vrot.slane %v6461_v22, %v7906_v13  ;;  %v6476_v57 = vrot.slane %v6462_v17, %v7906_v13  ;;  %v10050_v36 = vsel %vm2275_vm2, %v6659_v19, %v6660_v28  ;;  %v10053_v30 = vsel %vm2275_vm2, %v6660_v28, %v6662_v52 }
 0x243   : > { %11283 = vst [vmem:[#allocation111_spill] sm:$0xff] %v10019_v9  ;;  %v10023_v8 = vpop.permute.xlu0 %3845  ;;  %v6137_v20 = vcombine.low %v5863_v58, %v10025_v61  ;;  %v6517_v3 = vrot.slane %v6503_v15, %v7906_v13  ;;  %v10059_v58 = vcombine.low %v6127_v14, %v6134_v12  ;;  %v10061_v29 = vcombine.low %v6178_v33, %v6185_v51  ;;  %v11290_v51 = vld [vmem:[#allocation20_spill] sm:$0xff] }
 0x244   : > { %6689 = vrot.lane.b32.xlu1 %v9886_v46, %s7554_s10  ;;  %v6525_v19 = vrot.slane %v9985_v48, %v7906_v13  ;;  %v6161_v22 = vrot.slane %v6153_v4, %v7906_v13  ;;  %v6168_v52 = vrot.slane %v6154_v10, %v7906_v13  ;;  %v11287_v15 = vcombine.low %v9779_v54, %v9805_v43 }
 0x245   : > { %6691 = vrot.lane.b32.xlu0 %v9869_v39, %s7554_s10  ;;  %v6151_v18 = vrot.slane %v6137_v20, %v7906_v13  ;;  %11285 = vst [vmem:[#allocation113_spill] sm:$0xff] %v10059_v58  ;;  %11286 = vst [vmem:[#allocation114_spill] sm:$0xff] %v10061_v29  ;;  %v6144_v12 = vrot.slane %v6136_v6, %v7906_v13  ;;  %v6460_v33 = vcombine.low %v6452_v11, %v6459_v41 }
 0x246   : > { %v10045_v9 = vpop.permute.xlu1 %3843  ;;  %v6076_v17 = vrot.slane %v11287_v15, %v7906_v13  ;;  %v6477_v14 = vcombine.low %v6469_v49, %v6476_v57  ;;  %v5941_v20 = vcombine.high %v11290_v51, %v11290_v51  ;;  %v10084_v10 = vrot.slane %v11290_v51, %v7906_v13 }
 0x247   : > { %v10055_v35 = vpop.permute.xlu0 %4057  ;;  %v6083_v43 = vrot.slane %v6069_v24, %v7906_v13  ;;  %v6664_v6 = vrot.slane %v6460_v33, 1  ;;  %v6518_v11 = vcombine.low %v6510_v37, %v6517_v3  ;;  %v6486_v41 = vcombine.low %v9978_v34, %v10007_v53  ;;  %v11293_v37 = vld [vmem:[#allocation28_spill] sm:$0xff] }
 0x248   : > { %11284 = vst [vmem:[#allocation112_spill] sm:$0xff] %v10055_v35  ;;  %6901 = vrot.lane.b32.xlu1 %v9886_v46, %s7553_s9  ;;  %v10078_v46 = vcombine.low %v6161_v22, %v6168_v52  ;;  %v10095_v4 = vrot.slane %v6477_v14, 1  ;;  %v6672_v49 = vrot.slane %v6525_v19, 1  ;;  %v10100_v57 = vrot.slane %v5941_v20, %v7906_v13 }
 0x249   : > { %6903 = vrot.lane.b32.xlu0 %v9869_v39, %s7553_s9  ;;  %v10089_v39 = vcombine.low %v6144_v12, %v6151_v18  ;;  %v6670_v24 = vrot.slane %v6518_v11, 1  ;;  %v5906_v18 = vcombine.high %v9985_v48, %v9985_v48  ;;  %v5907_v3 = vcombine.high %v11293_v37, %v11293_v37 }
 0x24a   : > { %v10076_v28 = vpop.permute.xlu1 %4055  ;;  %11289 = vst [vmem:[#allocation116_spill] sm:$0xff] %v10078_v46  ;;  %v6485_v34 = vcombine.low %v10017_v56, %v10029_v26  ;;  %v10112_v53 = vsel %vm2275_vm2, %v6664_v6, %v10095_v4  ;;  %v5956_v19 = vcombine.high %v10084_v10, %v10084_v10  ;;  %v10118_v52 = vrot.slane %v11293_v37, %v7906_v13 }
 0x24b   : > { %11288 = vst [vmem:[#allocation115_spill] sm:$0xff] %v10076_v28  ;;  %v10086_v54 = vpop.permute.xlu0 %5265  ;;  %11292 = vst [vmem:[#allocation117_spill] sm:$0xff] %v10089_v39  ;;  %v10122_v15 = vcombine.low %v6076_v17, %v6083_v43  ;;  %v10125_v12 = vsel %vm2275_vm2, %v6670_v24, %v6672_v49  ;;  %v10128_v56 = vrot.slane %v5907_v3, %v7906_v13  ;;  %v11297_v43 = vld [vmem:[#allocation64_spill] sm:$0xff] }
 0x24c   : > { %11291 = vst [vmem:[#allocation20_spill] sm:$0xff] %v10086_v54  ;;  %6693 = vrot.lane.b32.xlu1 %v9920_v63, %s7554_s10  ;;  %v10133_v26 = vcombine.low %v5906_v18, %v10118_v52  ;;  %v5957_v33 = vcombine.high %v10100_v57, %v10100_v57  ;;  %v6500_v14 = vrot.slane %v6486_v41, %v7906_v13  ;;  %v11299_v18 = vld [vmem:[#allocation24_spill] sm:$0xff] }
 0x24d   : > { %6801 = vrot.lane.b32.xlu0 %v9892_v38, %s7555_s11  ;;  %11295 = vst [vmem:[#allocation118_spill] sm:$0xff] %v10122_v15  ;;  %v6493_v51 = vrot.slane %v6485_v34, %v7906_v13  ;;  %v6221_v20 = vcombine.low %v5956_v19, %v10100_v57  ;;  %v10150_v11 = vcombine.high %v10128_v56, %v10128_v56 }
 0x24e   : > { %v10106_v22 = vpop.permute.xlu1 %5263  ;;  %v5965_v49 = vrot.slane %v11297_v43, %v7906_v13  ;;  %v5924_v37 = vcombine.high %v11299_v18, %v11299_v18  ;;  %v10162_v3 = vrot.slane %v11299_v18, %v7906_v13 }
 0x24f   : > { %v10120_v48 = vpop.permute.xlu0 %3955 }
 0x250   : > { %11294 = vst [vmem:[#allocation28_spill] sm:$0xff] %v10120_v48  ;;  %6905 = vrot.lane.b32.xlu1 %v9920_v63, %s7553_s9  ;;  %v5958_v63 = vcombine.high %v11297_v43, %v11297_v43  ;;  %v6222_v41 = vcombine.low %v5957_v33, %v5965_v49  ;;  %v10165_v34 = vrot.slane %v5924_v37, %v7906_v13 }
 0x251   : > { %6797 = vrot.lane.b32.xlu0 %v10122_v15, %s7555_s11  ;;  %v6484_v43 = vrot.slane %v10025_v61, %v7906_v13  ;;  %v6229_v15 = vrot.slane %v6221_v20, %v7906_v13  ;;  %v6501_v48 = vcombine.low %v6493_v51, %v6500_v14  ;;  %v10180_v18 = vcombine.high %v10162_v3, %v10162_v3 }
 0x252   : > { %v10139_v17 = vpop.permute.xlu1 %3949  ;;  %v6543_v37 = vcombine.low %v10150_v11, %v10162_v3  ;;  %v10188_v61 = vcombine.high %v10118_v52, %v10118_v52  ;;  %v6567_v14 = vcombine.low %v10084_v10, %v5956_v19  ;;  %v10193_v51 = vcombine.high %v5965_v49, %v5965_v49 }
 0x253   : > { %11296 = vst [vmem:[#allocation119_spill] sm:$0xff] %v10139_v17  ;;  %v10146_v6 = vpop.permute.xlu0 %5159  ;;  %v6236_v17 = vrot.slane %v6222_v41, %v7906_v13  ;;  %v6669_v20 = vrot.slane %v6501_v48, 1  ;;  %v6667_v48 = vrot.slane %v6484_v43, 1  ;;  %v6568_v10 = vcombine.low %v10100_v57, %v5957_v33 }
 0x254   : > { %11298 = vst [vmem:[#allocation64_spill] sm:$0xff] %v10146_v6  ;;  %6799 = vrot.lane.b32.xlu1 %v9938_v60, %s7555_s11  ;;  %v10173_v60 = vrot.slane %v5958_v63, %v7906_v13  ;;  %v6544_v63 = vcombine.low %v10180_v18, %v10165_v34  ;;  %v6551_v41 = vrot.slane %v6543_v37, %v7906_v13 }
 0x255   : > { %6695 = vrot.lane.b32.xlu0 %v9936_v31, %s7554_s10  ;;  %v10203_v28 = vsel %vm2275_vm2, %v6669_v20, %v6670_v24  ;;  %v10205_v6 = vcombine.low %v6229_v15, %v6236_v17  ;;  %v6527_v37 = vcombine.low %v10188_v61, %v10128_v56  ;;  %v10217_v54 = vcombine.high %v10165_v34, %v10165_v34 }
 0x256   : > { %v10167_v38 = vpop.permute.xlu1 %3953  ;;  %v6558_v19 = vrot.slane %v6544_v63, %v7906_v13  ;;  %v10221_v24 = vsel %vm2275_vm2, %v10095_v4, %v6667_v48  ;;  %v10225_v15 = vrot.slane %v9494_v1, %v7906_v13  ;;  %v5975_v57 = vcombine.high %v9532_v16, %v9532_v16 }
 0x257   : > { %11300 = vst [vmem:[#allocation24_spill] sm:$0xff] %v10167_v38  ;;  %v10175_v35 = vpop.permute.xlu0 %5337  ;;  %11303 = vst [vmem:[#allocation122_spill] sm:$0xff] %v10205_v6  ;;  %v5982_v33 = vrot.slane %v9532_v16, %v7906_v13  ;;  %v6575_v4 = vrot.slane %v6567_v14, %v7906_v13  ;;  %v6582_v48 = vrot.slane %v6568_v10, %v7906_v13 }
 0x258   : > { %11301 = vst [vmem:[#allocation120_spill] sm:$0xff] %v10175_v35  ;;  %6697 = vrot.lane.b32.xlu1 %v10050_v36, %s7554_s10  ;;  %v5974_v35 = vcombine.high %v10173_v60, %v10173_v60  ;;  %v6559_v17 = vcombine.low %v6551_v41, %v6558_v19  ;;  %v10240_v1 = vcombine.high %v10225_v15, %v10225_v15 }
 0x259   : > { %6907 = vrot.lane.b32.xlu0 %v9936_v31, %s7553_s9  ;;  %v10248_v16 = vrot.slane %v5975_v57, %v7906_v13  ;;  %v5990_v41 = vcombine.high %v5982_v33, %v5982_v33  ;;  %v6534_v14 = vrot.slane %v10133_v26, %v7906_v13  ;;  %v6607_v57 = vrot.slane %v5982_v33, %v7906_v13 }
 0x25a   : > { %v10198_v38 = vpop.permute.xlu1 %5157  ;;  %v6585_v20 = vcombine.low %v10173_v60, %v5974_v35  ;;  %v6239_v19 = vcombine.low %v5974_v35, %v5982_v33 }
 0x25b   : > { %11302 = vst [vmem:[#allocation121_spill] sm:$0xff] %v10198_v38  ;;  %v10207_v31 = vpop.permute.xlu0 %3951  ;;  %v6675_v38 = vrot.slane %v6559_v17, 1  ;;  %v6608_v26 = vcombine.low %v5990_v41, %v10248_v16  ;;  %v10278_v17 = vrot.slane %v9564_v5, %v7906_v13 }
 0x25c   : > { %11304 = vst [vmem:[#allocation123_spill] sm:$0xff] %v10207_v31  ;;  %6909 = vrot.lane.b32.xlu1 %v10050_v36, %s7553_s9  ;;  %v6584_v36 = vcombine.low %v5965_v49, %v10193_v51  ;;  %v6566_v49 = vrot.slane %v10217_v54, %v7906_v13  ;;  %v5992_v31 = vcombine.high %v9564_v5, %v9564_v5 }
 0x25d   : > { %6699 = vrot.lane.b32.xlu0 %v10053_v30, %s7554_s10  ;;  %v10292_v5 = vcombine.high %v10278_v17, %v10278_v17 }
 0x25e   : > { %v10234_v43 = vpop.permute.xlu1 %5335  ;;  %v6592_v10 = vrot.slane %v6584_v36, %v7906_v13  ;;  %v6677_v35 = vrot.slane %v6566_v49, 1  ;;  %v6583_v36 = vcombine.low %v6575_v4, %v6582_v48  ;;  %v10285_v49 = vrot.slane %v5992_v31, %v7906_v13 }
 0x25f   : > { %11305 = vst [vmem:[#allocation124_spill] sm:$0xff] %v10234_v43  ;;  %v10244_v63 = vpop.permute.xlu0 %5155  ;;  %v6541_v43 = vrot.slane %v6527_v37, %v7906_v13  ;;  %v10267_v37 = vcombine.high %v10248_v16, %v10248_v16  ;;  %v6253_v4 = vrot.slane %v6239_v19, %v7906_v13  ;;  %v6682_v48 = vrot.slane %v6607_v57, 1 }
 0x260   : > { %11306 = vst [vmem:[#allocation125_spill] sm:$0xff] %v10244_v63  ;;  %6803 = vrot.lane.b32.xlu1 %v10059_v58, %s7555_s11  ;;  %v6599_v58 = vrot.slane %v6585_v20, %v7906_v13  ;;  %v10274_v33 = vsel %vm2275_vm2, %v6675_v38, %v6677_v35  ;;  %v6238_v20 = vcombine.low %v10193_v51, %v10173_v60 }
 0x261   : > { %6911 = vrot.lane.b32.xlu0 %v10053_v30, %s7553_s9  ;;  %v6542_v41 = vcombine.low %v6534_v14, %v6541_v43  ;;  %v6609_v35 = vcombine.low %v10267_v37, %v10278_v17  ;;  %v6616_v60 = vrot.slane %v6608_v26, %v7906_v13  ;;  %v10301_v51 = vcombine.high %v10285_v49, %v10285_v49 }
 0x262   : > { %v10261_v63 = vpop.permute.xlu1 %3847  ;;  %v6600_v43 = vcombine.low %v6592_v10, %v6599_v58  ;;  %v6648_v26 = vrot.slane %v10240_v1, %v7906_v13  ;;  %v6246_v19 = vrot.slane %v6238_v20, %v7906_v13  ;;  %v4740_v58 = vcombine.high %v9547_v42, %v9547_v42 }
 0x263   : > { %11307 = vst [vmem:[#allocation126_spill] sm:$0xff] %v10261_v63  ;;  %v10271_v30 = vpop.permute.xlu0 %5333  ;;  %v6674_v31 = vrot.slane %v6542_v41, 1  ;;  %v6623_v57 = vrot.slane %v6609_v35, %v7906_v13  ;;  %v6626_v10 = vcombine.low %v10301_v51, %v10225_v15 }
 0x264   : > { %11308 = vst [vmem:[#allocation127_spill] sm:$0xff] %v10271_v30  ;;  %6807 = vrot.lane.b32.xlu1 %v10078_v46, %s7555_s11  ;;  %v6679_v30 = vrot.slane %v6583_v36, 1  ;;  %v6680_v35 = vrot.slane %v6600_v43, 1  ;;  %v6687_v20 = vrot.slane %v6648_v26, 1 }
 0x265   : > { %6809 = vrot.lane.b32.xlu0 %v10061_v29, %s7555_s11  ;;  %v6625_v29 = vcombine.low %v10292_v5, %v10285_v49  ;;  %v10319_v41 = vsel %vm2275_vm2, %v6674_v31, %v6675_v38  ;;  %v6640_v63 = vrot.slane %v6626_v10, %v7906_v13 }
 0x266   : > { %v10296_v46 = vpop.permute.xlu1 %4059  ;;  %v10333_v38 = vsel %vm2275_vm2, %v6680_v35, %v6682_v48  ;;  %v10336_v31 = vsel %vm2275_vm2, %v6679_v30, %v6680_v35  ;;  %v11312_v48 = vcombine.low %v9281_v47, %v9277_v27  ;;  %v6205_v35 = vcombine.low %v10165_v34, %v10217_v54 }
 0x267   : > { %11309 = vst [vmem:[#allocation128_spill] sm:$0xff] %v10296_v46  ;;  %v10303_v14 = vpop.permute.xlu0 %3853  ;;  %v6633_v36 = vrot.slane %v6625_v29, %v7906_v13  ;;  %v10338_v29 = vcombine.low %v6246_v19, %v6253_v4  ;;  %v5068_v4 = vrot.slane %v4740_v58, %v7906_v13  ;;  %v11318_v58 = vcombine.low %v9349_v50, %v9345_v62  ;;  %v10404_v50 = vld [vmem:[%s11040_s2] ss:$0 sm:$0xff] }
 0x268   : > { %11310 = vst [vmem:[#allocation129_spill] sm:$0xff] %v10303_v14  ;;  %6701 = vrot.lane.b32.xlu1 %v10112_v53, %s7554_s10  ;;  %v6624_v14 = vcombine.low %v6616_v60, %v6623_v57  ;;  %v10350_v30 = vrot.slane %v11312_v48, %v7906_v13  ;;  %v11320_v62 = vld [vmem:[#allocation5_spill] sm:$0xff]  ;;  %v11108_v54 = vrot.slane %v9692_v7, 1  ;;  %v6219_v48 = vrot.slane %v6205_v35, %v7906_v13  ;;  %v11328_v35 = vld [vmem:[#allocation10_spill] sm:$0xff] }
 0x269   : > { %6805 = vrot.lane.b32.xlu0 %v10089_v39, %s7555_s11  ;;  %v6641_v60 = vcombine.low %v6633_v36, %v6640_v63  ;;  %v10389_v10 = vrot.slane %v11318_v58, %v7906_v13  ;;  %v5107_v36 = vrot.slane %v5068_v4, 1  ;;  %v11326_v58 = vld [vmem:[#allocation9_spill] sm:$0xff] }
 0x26a   : > { %v10325_v46 = vpop.permute.xlu1 %5267  ;;  %v6684_v43 = vrot.slane %v6624_v14, 1  ;;  %v11315_v14 = vcombine.low %v9466_v45, %v9470_v2  ;;  %v6188_v45 = vcombine.low %v10128_v56, %v10150_v11  ;;  %v2335_v56 = vadd.f32 %v10404_v50, %v11320_v62  ;;  %v11321_v11 = vld [vmem:[#allocation6_spill] sm:$0xff] }
 0x26b   : > { %v10330_v25 = vpop.permute.xlu0 %4065  ;;  %v6685_v57 = vrot.slane %v6641_v60, 1  ;;  %11319 = vst [vmem:[#allocation134_spill] sm:$0xff] %v10389_v10  ;;  %v10425_v4 = vsel %vm2275_vm2, %v11108_v54, %v5107_v36  ;;  %v11327_v62 = vld [vmem:[#allocation38_spill] sm:$0xff]  ;;  %v2344_v36 = vadd.f32 %v10404_v50, %v11328_v35  ;;  %v11336_v35 = vld [vmem:[#allocation57_spill] sm:$0xff] }
 0x26c   : > { %11311 = vst [vmem:[#allocation130_spill] sm:$0xff] %v10330_v25  ;;  %6913 = vrot.lane.b32.xlu1 %v10112_v53, %s7553_s9  ;;  %v11314_v53 = vcombine.low %v9303_v32, %v9322_v55  ;;  %v10365_v26 = vrot.slane %v11315_v14, %v7906_v13  ;;  %v6187_v32 = vcombine.low %v10118_v52, %v10188_v61  ;;  %v11322_v61 = vld [vmem:[#allocation34_spill] sm:$0xff]  ;;  %11323 = vst [vmem:[#allocation5_spill] sm:$0xff] %v10425_v4  ;;  %v11367_v10 = vld [vmem:[#allocation77_spill] sm:$0xff] }
 0x26d   : > { %6707 = vrot.lane.b32.xlu0 %v10125_v12, %s7554_s10  ;;  %v10370_v27 = vsel %vm2275_vm2, %v6684_v43, %v6685_v57  ;;  %v10373_v47 = vsel %vm2275_vm2, %v6685_v57, %v6687_v20  ;;  %v2399_v60 = vadd.f32 %v11322_v61, %v2335_v56  ;;  %v11337_v4 = vld [vmem:[#allocation58_spill] sm:$0xff] }
 0x26e   : > { %v10344_v42 = vpop.permute.xlu1 %3851  ;;  %v10359_v63 = vrot.slane %v11314_v53, %v7906_v13  ;;  %11316 = vst [vmem:[#allocation132_spill] sm:$0xff] %v10365_v26  ;;  %v11324_v53 = vld [vmem:[#allocation7_spill] sm:$0xff] }
 0x26f   : > { %v10353_v19 = vpop.permute.xlu0 %5273  ;;  %v2337_v14 = vadd.f32 %v10404_v50, %v11324_v53  ;;  %v11330_v53 = vld [vmem:[#allocation42_spill] sm:$0xff] }
 0x270   : > { %11313 = vst [vmem:[#allocation131_spill] sm:$0xff] %v10353_v19  ;;  %6705 = vrot.lane.b32.xlu1 %v10203_v28, %s7554_s10 }
 0x271   : > { %6919 = vrot.lane.b32.xlu0 %v10125_v12, %s7553_s9  ;;  %v6204_v12 = vcombine.low %v10162_v3, %v10180_v18  ;;  %v2334_v3 = vadd.f32 %v10404_v50, %v11321_v11  ;;  %v6202_v18 = vrot.slane %v6188_v45, %v7906_v13  ;;  %v11329_v11 = vld [vmem:[#allocation11_spill] sm:$0xff]  ;;  %v2401_v52 = vadd.f32 %v11330_v53, %v2337_v14  ;;  %v11338_v14 = vld [vmem:[#allocation33_spill] sm:$0xff] }
 0x272   : > { %v10383_v2 = vpop.permute.xlu1 %4063  ;;  %v2345_v61 = vadd.f32 %v10404_v50, %v11329_v11 }
 0x273   : > { %11317 = vst [vmem:[#allocation133_spill] sm:$0xff] %v10383_v2  ;;  %v10395_v20 = vpop.permute.xlu0 %3849  ;;  %v6212_v43 = vrot.slane %v6204_v12, %v7906_v13  ;;  %v2341_v12 = vadd.f32 %v10404_v50, %v11326_v58  ;;  %v2398_v56 = vadd.f32 %v11327_v62, %v2334_v3  ;;  %v11333_v58 = vld [vmem:[#allocation46_spill] sm:$0xff]  ;;  %v11334_v3 = vld [vmem:[#allocation15_spill] sm:$0xff]  ;;  %v2408_v2 = vadd.f32 %v11336_v35, %v2344_v36 }
 0x274   : > { %6917 = vrot.lane.b32.xlu1 %v10203_v28, %s7553_s9  ;;  %v6195_v28 = vrot.slane %v6187_v32, %v7906_v13  ;;  %v11325_v32 = vld [vmem:[#allocation8_spill] sm:$0xff]  ;;  %v2409_v11 = vadd.f32 %v11337_v4, %v2345_v61  ;;  %v11346_v35 = vld [vmem:[#allocation55_spill] sm:$0xff] }
 0x275   : > { %6703 = vrot.lane.b32.xlu0 %v10221_v24, %s7554_s10  ;;  %v2338_v45 = vadd.f32 %v10404_v50, %v11325_v32  ;;  %v11332_v32 = vld [vmem:[#allocation32_spill] sm:$0xff]  ;;  %v2405_v62 = vadd.f32 %v11334_v3, %v2341_v12  ;;  %v11341_v12 = vld [vmem:[#allocation29_spill] sm:$0xff] }
 0x276   : > { %v10414_v34 = vpop.permute.xlu1 %5271  ;;  %v10445_v55 = vcombine.low %v6195_v28, %v6202_v18  ;;  %v2508_v28 = vadd.f32 %v11338_v14, %v2398_v56  ;;  %v11339_v18 = vld [vmem:[#allocation39_spill] sm:$0xff]  ;;  %v11345_v3 = vld [vmem:[#allocation56_spill] sm:$0xff]  ;;  %v2519_v14 = vadd.f32 %v11346_v35, %v2409_v11 }
 0x277   : > { %v10419_v57 = vpop.permute.xlu0 %4061  ;;  %v2402_v39 = vadd.f32 %v11333_v58, %v2338_v45  ;;  %v11344_v58 = vld [vmem:[#allocation14_spill] sm:$0xff]  ;;  %v2518_v56 = vadd.f32 %v11345_v3, %v2408_v2 }
 0x278   : > { %6815 = vrot.lane.b32.xlu1 %v10205_v6, %s7555_s11  ;;  %11331 = vst [vmem:[#allocation6_spill] sm:$0xff] %v10445_v55  ;;  %v2509_v6 = vadd.f32 %v11332_v32, %v2399_v60  ;;  %v2511_v60 = vadd.f32 %v11339_v18, %v2401_v52  ;;  %v11343_v32 = vld [vmem:[#allocation51_spill] sm:$0xff]  ;;  %v3447_v4 = vadd.f32 %v10404_v50, %v11344_v58  ;;  %v11347_v52 = vld [vmem:[#allocation26_spill] sm:$0xff]  ;;  %v11352_v58 = vld [vmem:[#allocation45_spill] sm:$0xff] }
 0x279   : > { %6915 = vrot.lane.b32.xlu0 %v10221_v24, %s7553_s9  ;;  %v10452_v24 = vcombine.low %v6212_v43, %v6219_v48  ;;  %v11342_v43 = vld [vmem:[#allocation44_spill] sm:$0xff]  ;;  %v2515_v36 = vadd.f32 %v11343_v32, %v2405_v62  ;;  %v2572_v18 = vadd.f32 %v11347_v52, %v2508_v28  ;;  %v11351_v32 = vld [vmem:[#allocation35_spill] sm:$0xff] }
 0x27a   : > { %v10443_v54 = vpop.permute.xlu1 %5161  ;;  %v2573_v53 = vadd.f32 %v11341_v12, %v2509_v6  ;;  %v2512_v48 = vadd.f32 %v11342_v43, %v2402_v39  ;;  %v11349_v39 = vld [vmem:[#allocation36_spill] sm:$0xff]  ;;  %v11350_v43 = vld [vmem:[#allocation37_spill] sm:$0xff] }
 0x27b   : > { %v10450_v25 = vpop.permute.xlu0 %5269  ;;  %11335 = vst [vmem:[#allocation34_spill] sm:$0xff] %v10452_v24  ;;  %v2575_v62 = vadd.f32 %v11349_v39, %v2511_v60  ;;  %v5126_v2 = vadd.f32 %v10404_v50, %v11350_v43  ;;  %v2579_v3 = vadd.f32 %v11352_v58, %v2515_v36  ;;  %v11354_v28 = vld [vmem:[#allocation40_spill] sm:$0xff]  ;;  %v11357_v60 = vld [vmem:[#allocation19_spill] sm:$0xff]  ;;  %vm2588_vm14 = vcmp.gt.f32.partialorder %v2572_v18, 0.0 }
 0x27c   : > { %6811 = vrot.lane.b32.xlu1 %v10445_v55, %s7555_s11  ;;  %vm2589_vm13 = vcmp.gt.f32.partialorder %v2573_v53, 0.0  ;;  %v2576_v11 = vadd.f32 %v11351_v32, %v2512_v48  ;;  %v11356_v55 = vld [vmem:[#allocation53_spill] sm:$0xff]  ;;  %v3448_v39 = vadd.f32 %v10404_v50, %v11357_v60  ;;  %v2605_v43 = vmul.f32 0.1, %v2573_v53  ;;  %v11361_v60 = vld [vmem:[#allocation47_spill] sm:$0xff] }
 0x27d   : > { %6813 = vrot.lane.b32.xlu0 %v10452_v24, %s7555_s11  ;;  %v11348_v24 = vld [vmem:[#allocation69_spill] sm:$0xff]  ;;  %v2604_v48 = vmul.f32 0.1, %v2572_v18  ;;  %vm2591_vm15 = vcmp.gt.f32.partialorder %v2575_v62, 0.0  ;;  %v2607_v58 = vmul.f32 0.1, %v2575_v62 }
 0x27e   : > { %v10462_v45 = vpop.permute.xlu1 %5339  ;;  %v3879_v6 = vadd.f32 %v11348_v24, %v3447_v4  ;;  %v5125_v24 = vadd.f32 %v10404_v50, %v11354_v28  ;;  %v11355_v4 = vld [vmem:[#allocation16_spill] sm:$0xff]  ;;  %v11358_v32 = vld [vmem:[#allocation25_spill] sm:$0xff]  ;;  %vm2592_vm0 = vcmp.gt.f32.partialorder %v2576_v11, 0.0  ;;  %vm2595_vm1 = vcmp.gt.f32.partialorder %v2579_v3, 0.0 }
 0x27f   : > { %11340 = vst [vmem:[#allocation7_spill] sm:$0xff] %v10462_v45  ;;  %v10469_v61 = vpop.permute.xlu0 %5163  ;;  %v2582_v52 = vadd.f32 %v11355_v4, %v2518_v56  ;;  %v2583_v45 = vadd.f32 %v11356_v55, %v2519_v14  ;;  %v11359_v28 = vld [vmem:[#allocation72_spill] sm:$0xff]  ;;  %v2608_v4 = vmul.f32 0.1, %v2576_v11 }
 0x280   : > { %6709 = vrot.lane.b32.xlu1 %v10319_v41, %s7554_s10  ;;  %v3977_v36 = vadd.f32 %v11358_v32, %v3879_v6  ;;  %v3880_v56 = vadd.f32 %v11359_v28, %v3448_v39  ;;  %v5189_v55 = vadd.f32 %v9609_v44, %v5125_v24  ;;  %v2611_v6 = vmul.f32 0.1, %v2579_v3  ;;  %v11363_v39 = vld [vmem:[#allocation66_spill] sm:$0xff] }
 0x281   : > { %6711 = vrot.lane.b32.xlu0 %v10274_v33, %s7554_s10  ;;  %vm2598_vm3 = vcmp.gt.f32.partialorder %v2582_v52, 0.0  ;;  %v2614_v32 = vmul.f32 0.1, %v2582_v52  ;;  %vm2599_vm4 = vcmp.gt.f32.partialorder %v2583_v45, 0.0  ;;  %v11364_v24 = vld [vmem:[#allocation30_spill] sm:$0xff] }
 0x282   : > { %v10480_v12 = vpop.permute.xlu1 %5165  ;;  %v4087_v44 = vadd.f32 %v11363_v39, %v3977_v36  ;;  %v3450_v28 = vadd.f32 %v10404_v50, %v11364_v24  ;;  %v5299_v19 = vadd.f32 %v11367_v10, %v5189_v55  ;;  %v6255_v36 = vcombine.low %v10248_v16, %v10267_v37 }
 0x283   : > { %v10486_v35 = vpop.permute.xlu0 %5341  ;;  %v11368_v39 = vcombine.low %v10278_v17, %v10292_v5  ;;  %v11370_v10 = vcombine.low %v10225_v15, %v10240_v1  ;;  %v2621_v37 = vsel %vm2589_vm13, %v2573_v53, %v2605_v43  ;;  %v2620_v17 = vsel %vm2588_vm14, %v2572_v18, %v2604_v48  ;;  %v11371_v5 = vld [vmem:[#allocation75_spill] sm:$0xff]  ;;  %v11373_v18 = vld [vmem:[#allocation92_spill] sm:$0xff] }
 0x284   : > { %11353 = vst [vmem:[#allocation8_spill] sm:$0xff] %v10486_v35  ;;  %6921 = vrot.lane.b32.xlu1 %v10319_v41, %s7553_s9  ;;  %v5127_v41 = vadd.f32 %v10404_v50, %v11361_v60  ;;  %v11366_v60 = vld [vmem:[#allocation22_spill] sm:$0xff]  ;;  %2638 = vst.msk [vmem:[%s8868_s25 + $0x18] sm:$0xff] %vm2634_vm7, %v2621_v37  ;;  %v2623_v15 = vsel %vm2591_vm15, %v2575_v62, %v2607_v58  ;;  %v2624_v1 = vsel %vm2592_vm0, %v2576_v11, %v2608_v4  ;;  %v11381_v37 = vld [vmem:[#allocation13_spill] sm:$0xff] }
 0x285   : > { %6923 = vrot.lane.b32.xlu0 %v10274_v33, %s7553_s9  ;;  %v2615_v33 = vmul.f32 0.1, %v2583_v45  ;;  %v10540_v16 = vrot.slane %v11370_v10, %v7906_v13  ;;  %2637 = vst.msk [vmem:[%s8868_s25 + $0x10] sm:$0xff] %vm2634_vm7, %v2620_v17  ;;  %2640 = vst.msk [vmem:[%s8868_s25 + $0x28] sm:$0xff] %vm2634_vm7, %v2623_v15  ;;  %vm4103_vm5 = vcmp.gt.f32.partialorder %v4087_v44, 0.0 }
 0x286   : > { %v10501_v14 = vpop.permute.xlu1 %5343  ;;  %v5191_v55 = vadd.f32 %v11371_v5, %v5127_v41  ;;  %2641 = vst.msk [vmem:[%s8868_s25 + $0x30] sm:$0xff] %vm2634_vm7, %v2624_v1  ;;  %v11376_v41 = vld [vmem:[#allocation54_spill] sm:$0xff]  ;;  %v11384_v1 = vld [vmem:[#allocation100_spill] sm:$0xff] }
 0x287   : > { %11360 = vst [vmem:[#allocation9_spill] sm:$0xff] %v10501_v14  ;;  %v10505_v35 = vpop.permute.xlu0 %5167  ;;  %v11365_v14 = vld [vmem:[#allocation31_spill] sm:$0xff]  ;;  %v2631_v11 = vsel %vm2599_vm4, %v2583_v45, %v2615_v33  ;;  %v11379_v45 = vld [vmem:[#allocation41_spill] sm:$0xff]  ;;  %v11380_v33 = vld [vmem:[#allocation68_spill] sm:$0xff] }
 0x288   : > { %11362 = vst [vmem:[#allocation38_spill] sm:$0xff] %v10505_v35  ;;  %6713 = vrot.lane.b32.xlu1 %v10336_v31, %s7554_s10  ;;  %v3449_v26 = vadd.f32 %v10404_v50, %v11365_v14  ;;  %v3978_v35 = vadd.f32 %v11366_v60, %v3880_v56  ;;  %v10526_v14 = vrot.slane %v11368_v39, %v7906_v13  ;;  %2648 = vst.msk [vmem:[%s8868_s25 + $0x68] sm:$0xff] %vm2634_vm7, %v2631_v11  ;;  %v11382_v5 = vld [vmem:[#allocation94_spill] sm:$0xff] }
 0x289   : > { %6715 = vrot.lane.b32.xlu0 %v10333_v38, %s7554_s10  ;;  %v11369_v56 = vcombine.low %v10285_v49, %v10301_v51  ;;  %v5190_v39 = vadd.f32 %v9580_v23, %v5126_v2  ;;  %v10549_v49 = vrot.slane %v6255_v36, %v7906_v13  ;;  %v2630_v51 = vsel %vm2598_vm3, %v2582_v52, %v2614_v32  ;;  %v11375_v52 = vld [vmem:[#allocation97_spill] sm:$0xff]  ;;  %v11378_v36 = vld [vmem:[#allocation76_spill] sm:$0xff] }
 0x28a   : > { %v10518_v7 = vpop.permute.xlu1 %3957  ;;  %v3881_v2 = vadd.f32 %v11373_v18, %v3449_v26  ;;  %2647 = vst.msk [vmem:[%s8868_s25 + $0x60] sm:$0xff] %vm2634_vm7, %v2630_v51  ;;  %v5301_v58 = vadd.f32 %v11375_v52, %v5191_v55  ;;  %v4119_v26 = vmul.f32 0.1, %v4087_v44  ;;  %v11377_v32 = vld [vmem:[#allocation65_spill] sm:$0xff]  ;;  %v11385_v18 = vld [vmem:[#allocation23_spill] sm:$0xff] }
 0x28b   : > { %v10528_v24 = vpop.permute.xlu0 %5345  ;;  %v10534_v60 = vrot.slane %v11369_v56, %v7906_v13  ;;  %v2627_v13 = vsel %vm2595_vm1, %v2579_v3, %v2611_v6  ;;  %v6271_v43 = vcombine.low %v10549_v49, %v10526_v14  ;;  %v11374_v3 = vld [vmem:[#allocation27_spill] sm:$0xff]  ;;  %v5128_v6 = vadd.f32 %v10404_v50, %v11376_v41 }
 0x28c   : > { %6925 = vrot.lane.b32.xlu1 %v10336_v31, %s7553_s9  ;;  %v11372_v31 = vld [vmem:[#allocation85_spill] sm:$0xff]  ;;  %2644 = vst.msk [vmem:[%s8868_s25 + $0x48] sm:$0xff] %vm2634_vm7, %v2627_v13  ;;  %v5363_v48 = vadd.f32 %v11374_v3, %v5299_v19  ;;  %v5300_v56 = vadd.f32 %v11378_v36, %v5190_v39  ;;  %v3451_v19 = vadd.f32 %v10404_v50, %v11379_v45  ;;  %v11386_v3 = vld [vmem:[#allocation59_spill] sm:$0xff] }
 0x28d   : > { %6817 = vrot.lane.b32.xlu0 %v10338_v29, %s7555_s11  ;;  %v6288_v23 = vcombine.low %v10534_v60, %v10540_v16  ;;  %v3882_v53 = vadd.f32 %v11372_v31, %v3450_v28  ;;  %v4088_v28 = vadd.f32 %v11377_v32, %v3978_v35  ;;  %v3979_v17 = vadd.f32 %v11381_v37, %v3881_v2  ;;  %v11383_v35 = vld [vmem:[#allocation86_spill] sm:$0xff]  ;;  %v11391_v45 = vld [vmem:[#allocation73_spill] sm:$0xff]  ;;  %s10996_s11 = scalar_lea.sflag [#allocation3], %s161_s20 }
 0x28e   : > { %v10567_v62 = vpop.permute.xlu1 %3855  ;;  %v5192_v55 = vadd.f32 %v11382_v5, %v5128_v6  ;;  %v5365_v39 = vadd.f32 %v11383_v35, %v5301_v58  ;;  %v3883_v13 = vadd.f32 %v11384_v1, %v3451_v19  ;;  %v4135_v51 = vsel %vm4103_vm5, %v4087_v44, %v4119_v26  ;;  %v11387_v2 = vld [vmem:[#allocation18_spill] sm:$0xff]  ;;  %v11389_v26 = vld [vmem:[#allocation49_spill] sm:$0xff]  ;;  %v11390_v6 = vld [vmem:[#allocation52_spill] sm:$0xff] }
 0x28f   : > { %v10580_v4 = vpop.permute.xlu0 %3959  ;;  %v3980_v10 = vadd.f32 %v11380_v33, %v3882_v53  ;;  %v5395_v31 = vmul.f32 0.1, %v5363_v48  ;;  %v5364_v11 = vadd.f32 %v11385_v18, %v5300_v56  ;;  %v4120_v53 = vmul.f32 0.1, %v4088_v28  ;;  %v11388_v58 = vld [vmem:[#allocation74_spill] sm:$0xff]  ;;  %v11393_v1 = vld [vmem:[#allocation101_spill] sm:$0xff] }
 0x290   : > { %6717 = vrot.lane.b32.xlu1 %v10370_v27, %s7554_s10  ;;  %vm5379_vm6 = vcmp.gt.f32.partialorder %v5363_v48, 0.0  ;;  %v5130_v52 = vadd.f32 %v10404_v50, %v11387_v2  ;;  %vm4104_vm7 = vcmp.gt.f32.partialorder %v4088_v28, 0.0  ;;  %v5302_v41 = vadd.f32 %v11389_v26, %v5192_v55  ;;  %v11392_v33 = vld [vmem:[#allocation82_spill] sm:$0xff] }
 0x291   : > { %6927 = vrot.lane.b32.xlu0 %v10333_v38, %s7553_s9  ;;  %v5129_v38 = vadd.f32 %v10404_v50, %v11386_v3  ;;  %v4090_v44 = vadd.f32 %v11388_v58, %v3980_v10  ;;  %v3452_v32 = vadd.f32 %v10404_v50, %v11390_v6  ;;  %v4089_v19 = vadd.f32 %v11391_v45, %v3979_v17  ;;  %v11398_v6 = vld [vmem:[#allocation43_spill] sm:$0xff] }
 0x292   : > { %v10597_v15 = vpop.permute.xlu1 %4067  ;;  %v3981_v37 = vadd.f32 %v11392_v33, %v3883_v13  ;;  %v5411_v35 = vsel %vm5379_vm6, %v5363_v48, %v5395_v31  ;;  %v4136_v10 = vsel %vm4104_vm7, %v4088_v28, %v4120_v53  ;;  %v5396_v55 = vmul.f32 0.1, %v5364_v11  ;;  %v11395_v13 = vld [vmem:[#allocation104_spill] sm:$0xff]  ;;  %v11397_v53 = vld [vmem:[#allocation21_spill] sm:$0xff]  ;;  %v11400_v33 = vld [vmem:[#allocation79_spill] sm:$0xff] }
 0x293   : > { %v10601_v27 = vpop.permute.xlu0 %3857  ;;  %v5193_v36 = vadd.f32 %v9917_v0, %v5129_v38  ;;  %vm5381_vm8 = vcmp.gt.f32.partialorder %v5365_v39, 0.0  ;;  %vm5380_vm9 = vcmp.gt.f32.partialorder %v5364_v11, 0.0  ;;  %v11394_v0 = vld [vmem:[#allocation84_spill] sm:$0xff]  ;;  %v3884_v17 = vadd.f32 %v9915_v21, %v3452_v32  ;;  %v11396_v38 = vld [vmem:[#allocation95_spill] sm:$0xff]  ;;  %v11399_v32 = vld [vmem:[#allocation50_spill] sm:$0xff] }
 0x294   : > { %4167 = vrot.lane.b32.xlu1 %v4135_v51, %s7556_s28  ;;  %v5194_v51 = vadd.f32 %v11393_v1, %v5130_v52  ;;  %v5366_v18 = vadd.f32 %v11394_v0, %v5302_v41  ;;  %v4091_v28 = vadd.f32 %v11396_v38, %v3981_v37  ;;  %v5131_v2 = vadd.f32 %v10404_v50, %v11397_v53  ;;  %v11403_v38 = vld [vmem:[#allocation70_spill] sm:$0xff] }
 0x295   : > { %6719 = vrot.lane.b32.xlu0 %v10373_v47, %s7554_s10  ;;  %v5397_v47 = vmul.f32 0.1, %v5365_v39  ;;  %v5303_v3 = vadd.f32 %v11395_v13, %v5193_v36  ;;  %v4121_v26 = vmul.f32 0.1, %v4089_v19  ;;  %v3454_v41 = vadd.f32 %v10404_v50, %v11398_v6  ;;  %s10988_s10 = scalar_lea.hbm %s11041_s3, %s7269_s6 }
 0x296   : > { %v10616_v56 = vpop.permute.xlu1 %5275  ;;  %v5304_v48 = vadd.f32 %v9989_v59, %v5194_v51  ;;  %v5412_v45 = vsel %vm5380_vm9, %v5364_v11, %v5396_v55  ;;  %v4122_v21 = vmul.f32 0.1, %v4090_v44  ;;  %vm4105_vm10 = vcmp.gt.f32.partialorder %v4089_v19, 0.0 }
 0x297   : > { %v10620_v5 = vpop.permute.xlu0 %4069  ;;  %v5413_v58 = vsel %vm5381_vm8, %v5365_v39, %v5397_v47  ;;  %v5195_v59 = vadd.f32 %v9991_v40, %v5131_v2  ;;  %v3453_v36 = vadd.f32 %v10404_v50, %v11399_v32  ;;  %vm4106_vm11 = vcmp.gt.f32.partialorder %v4090_v44, 0.0  ;;  %v11401_v39 = vld [vmem:[#allocation80_spill] sm:$0xff] }
 0x298   : > { %5443 = vrot.lane.b32.xlu1 %v5411_v35, %s7557_s29  ;;  %v3982_v37 = vadd.f32 %v11400_v33, %v3884_v17  ;;  %v5367_v35 = vadd.f32 %v11401_v39, %v5303_v3  ;;  %v11402_v47 = vld [vmem:[#allocation96_spill] sm:$0xff]  ;;  %v3886_v11 = vadd.f32 %v10023_v8, %v3454_v41  ;;  %v4137_v0 = vsel %vm4105_vm10, %v4089_v19, %v4121_v26  ;;  %v11404_v8 = vld [vmem:[#allocation89_spill] sm:$0xff]  ;;  %v11408_v41 = vld [vmem:[#allocation90_spill] sm:$0xff] }
 0x299   : > { %4169 = vrot.lane.b32.xlu0 %v4136_v10, %s7556_s28  ;;  %v5368_v1 = vadd.f32 %v11402_v47, %v5304_v48  ;;  %v3885_v10 = vadd.f32 %v10045_v9, %v3453_v36  ;;  %v5305_v40 = vadd.f32 %v10106_v22, %v5195_v59  ;;  %v4123_v13 = vmul.f32 0.1, %v4091_v28  ;;  %v11405_v9 = vld [vmem:[#allocation105_spill] sm:$0xff]  ;;  %v11406_v22 = vld [vmem:[#allocation71_spill] sm:$0xff] }
 0x29a   : > { %v10629_v31 = vpop.permute.xlu1 %3859  ;;  %v5132_v53 = vadd.f32 %v10404_v50, %v11403_v38  ;;  %v4138_v17 = vsel %vm4106_vm11, %v4090_v44, %v4122_v21  ;;  %v5398_v3 = vmul.f32 0.1, %v5366_v18  ;;  %vm4107_vm12 = vcmp.gt.f32.partialorder %v4091_v28, 0.0  ;;  %v11407_v19 = vld [vmem:[#allocation125_spill] sm:$0xff] }
 0x29b   : > { %v10634_v52 = vpop.permute.xlu0 %5277  ;;  %vm5382_vm13 = vcmp.gt.f32.partialorder %v5366_v18, 0.0  ;;  %v4092_v48 = vadd.f32 %v11404_v8, %v3982_v37  ;;  %v3984_v2 = vadd.f32 %v11405_v9, %v3886_v11  ;;  %v3983_v44 = vadd.f32 %v11408_v41, %v3885_v10  ;;  %v11410_v33 = vld [vmem:[#allocation61_spill] sm:$0xff] }
 0x29c   : > { %5447 = vrot.lane.b32.xlu1 %v5413_v58, %s7557_s29  ;;  %v5133_v58 = vadd.f32 %v10404_v50, %v11406_v22  ;;  %v5196_v26 = vadd.f32 %v11407_v19, %v5132_v53  ;;  %v4139_v32 = vsel %vm4107_vm12, %v4091_v28, %v4123_v13  ;;  %v5399_v36 = vmul.f32 0.1, %v5367_v35  ;;  %v11411_v11 = vld [vmem:[#allocation121_spill] sm:$0xff]  ;;  %v11414_v28 = vld [vmem:[#allocation20_spill] sm:$0xff] }
 0x29d   : > { %5445 = vrot.lane.b32.xlu0 %v5412_v45, %s7557_s29  ;;  %v11409_v45 = vld [vmem:[#allocation110_spill] sm:$0xff]  ;;  %v3455_v37 = vadd.f32 %v10404_v50, %v11410_v33  ;;  %v5414_v39 = vsel %vm5382_vm13, %v5366_v18, %v5398_v3  ;;  %v5400_v47 = vmul.f32 0.1, %v5368_v1  ;;  %vm5383_vm14 = vcmp.gt.f32.partialorder %v5367_v35, 0.0  ;;  %v11412_v10 = vld [vmem:[#allocation109_spill] sm:$0xff] }
 0x29e   : > { %v10647_v51 = vpop.permute.xlu1 %5279  ;;  %v5369_v21 = vadd.f32 %v11409_v45, %v5305_v40  ;;  %vm5384_vm15 = vcmp.gt.f32.partialorder %v5368_v1, 0.0  ;;  %v4094_v38 = vadd.f32 %v11412_v10, %v3984_v2  ;;  %v11413_v40 = vld [vmem:[#allocation67_spill] sm:$0xff]  ;;  %v5306_v13 = vadd.f32 %v11414_v28, %v5196_v26  ;;  %v11416_v18 = vld [vmem:[#allocation102_spill] sm:$0xff]  ;;  %v11417_v45 = vld [vmem:[#allocation60_spill] sm:$0xff] }
 0x29f   : > { %v10651_v55 = vpop.permute.xlu0 %3861  ;;  %v5134_v53 = vadd.f32 %v10404_v50, %v11413_v40  ;;  %v4093_v3 = vadd.f32 %v11416_v18, %v3983_v44  ;;  %v3458_v2 = vadd.f32 %v10404_v50, %v11417_v45  ;;  %v4124_v33 = vmul.f32 0.1, %v4092_v48  ;;  %v11418_v26 = vld [vmem:[#allocation64_spill] sm:$0xff]  ;;  %v11423_v40 = vld [vmem:[#allocation78_spill] sm:$0xff]  ;;  %v11424_v28 = vld [vmem:[#allocation111_spill] sm:$0xff] }
 0x2a0   : > { %4171 = vrot.lane.b32.xlu1 %v4137_v0, %s7556_s28  ;;  %v5197_v0 = vadd.f32 %v11411_v11, %v5133_v58  ;;  %v5415_v58 = vsel %vm5383_vm14, %v5367_v35, %v5399_v36  ;;  %v5401_v41 = vmul.f32 0.1, %v5369_v21  ;;  %vm5385_vm0 = vcmp.gt.f32.partialorder %v5369_v21, 0.0  ;;  %v11421_v35 = vld [vmem:[#allocation106_spill] sm:$0xff] }
 0x2a1   : > { %4173 = vrot.lane.b32.xlu0 %v4138_v17, %s7556_s28  ;;  %v11415_v17 = vld [vmem:[#allocation126_spill] sm:$0xff]  ;;  %vm4108_vm1 = vcmp.gt.f32.partialorder %v4092_v48, 0.0  ;;  %v4125_v45 = vmul.f32 0.1, %v4093_v3  ;;  %vm4109_vm3 = vcmp.gt.f32.partialorder %v4093_v3, 0.0  ;;  %vm4110_vm4 = vcmp.gt.f32.partialorder %v4094_v38, 0.0 }
 0x2a2   : > { %v10662_v6 = vpop.permute.xlu1 %5169  ;;  %v3887_v8 = vadd.f32 %v11415_v17, %v3455_v37  ;;  %v5307_v22 = vadd.f32 %v10325_v46, %v5197_v0  ;;  %v5198_v37 = vadd.f32 %v11418_v26, %v5134_v53  ;;  %v11420_v46 = vld [vmem:[#allocation17_spill] sm:$0xff] }
 0x2a3   : > { %v10666_v59 = vpop.permute.xlu0 %5281  ;;  %v5370_v44 = vadd.f32 %v11420_v46, %v5306_v13  ;;  %v11422_v0 = vld [vmem:[#allocation129_spill] sm:$0xff]  ;;  %v4140_v13 = vsel %vm4108_vm1, %v4092_v48, %v4124_v33  ;;  %v11429_v33 = vld [vmem:[#allocation119_spill] sm:$0xff] }
 0x2a4   : > { %4175 = vrot.lane.b32.xlu1 %v4139_v32, %s7556_s28  ;;  %v5416_v32 = vsel %vm5384_vm15, %v5368_v1, %v5400_v47  ;;  %v3985_v36 = vadd.f32 %v11421_v35, %v3887_v8  ;;  %v3890_v10 = vadd.f32 %v11422_v0, %v3458_v2  ;;  %v5135_v1 = vadd.f32 %v10404_v50, %v11423_v40  ;;  %v11425_v2 = vld [vmem:[#allocation63_spill] sm:$0xff] }
 0x2a5   : > { %5449 = vrot.lane.b32.xlu0 %v5414_v39, %s7557_s29  ;;  %v11419_v39 = vld [vmem:[#allocation62_spill] sm:$0xff]  ;;  %v5371_v17 = vadd.f32 %v11424_v28, %v5307_v22  ;;  %v4126_v8 = vmul.f32 0.1, %v4094_v38  ;;  %v3456_v26 = vadd.f32 %v10404_v50, %v11425_v2  ;;  %v11426_v22 = vld [vmem:[#allocation115_spill] sm:$0xff]  ;;  %v4141_v0 = vsel %vm4109_vm3, %v4093_v3, %v4125_v45 }
 0x2a6   : > { %v10678_v9 = vpop.permute.xlu1 %6787  ;;  %v3457_v11 = vadd.f32 %v10404_v50, %v11419_v39  ;;  %v4095_v39 = vadd.f32 %v11426_v22, %v3985_v36  ;;  %v11430_v28 = vld [vmem:[#allocation127_spill] sm:$0xff]  ;;  %vm5386_vm6 = vcmp.gt.f32.partialorder %v5370_v44, 0.0 }
 0x2a7   : > { %v10682_v19 = vpop.permute.xlu0 %5171  ;;  %v3888_v46 = vadd.f32 %v10395_v20, %v3456_v26  ;;  %v5403_v40 = vmul.f32 0.1, %v5371_v17  ;;  %v4142_v36 = vsel %vm4110_vm4, %v4094_v38, %v4126_v8  ;;  %vm5387_vm5 = vcmp.gt.f32.partialorder %v5371_v17, 0.0  ;;  %v11432_v3 = vld [vmem:[#allocation87_spill] sm:$0xff]  ;;  %v11433_v38 = vld [vmem:[#allocation128_spill] sm:$0xff] }
 0x2a8   : > { %5451 = vrot.lane.b32.xlu1 %v5415_v58, %s7557_s29  ;;  %v3889_v53 = vadd.f32 %v10344_v42, %v3457_v11  ;;  %v5417_v58 = vsel %vm5385_vm0, %v5369_v21, %v5401_v41  ;;  %v11427_v42 = vld [vmem:[#allocation123_spill] sm:$0xff]  ;;  %v5199_v21 = vadd.f32 %v10443_v54, %v5135_v1  ;;  %v11428_v41 = vld [vmem:[#allocation81_spill] sm:$0xff]  ;;  %v5137_v45 = vadd.f32 %v10404_v50, %v11432_v3 }
 0x2a9   : > { %5453 = vrot.lane.b32.xlu0 %v5416_v32, %s7557_s29  ;;  %v5308_v32 = vadd.f32 %v10450_v25, %v5198_v37  ;;  %v3988_v11 = vadd.f32 %v11427_v42, %v3890_v10  ;;  %v5136_v25 = vadd.f32 %v10404_v50, %v11428_v41  ;;  %v5402_v10 = vmul.f32 0.1, %v5370_v44  ;;  %v11431_v54 = vld [vmem:[#allocation83_spill] sm:$0xff] }
 0x2aa   : > { %v10696_v47 = vpop.permute.xlu1 %6897  ;;  %v3987_v37 = vadd.f32 %v11429_v33, %v3889_v53  ;;  %v5104_v1 = vrot.slane %v11431_v54, 1  ;;  %v5309_v20 = vadd.f32 %v10414_v34, %v5199_v21  ;;  %v11434_v2 = vld [vmem:[#allocation91_spill] sm:$0xff]  ;;  %v5419_v42 = vsel %vm5387_vm5, %v5371_v17, %v5403_v40 }
 0x2ab   : > { %v10700_v18 = vpop.permute.xlu0 %6789  ;;  %v4098_v53 = vadd.f32 %v10419_v57, %v3988_v11  ;;  %v3459_v26 = vadd.f32 %v10404_v50, %v11434_v2  ;;  %v4127_v41 = vmul.f32 0.1, %v4095_v39  ;;  %v11435_v33 = vld [vmem:[#allocation99_spill] sm:$0xff]  ;;  %v5418_v11 = vsel %vm5386_vm6, %v5370_v44, %v5402_v10  ;;  %v11439_v44 = vld [vmem:[#allocation124_spill] sm:$0xff] }
 0x2ac   : > { %5455 = vrot.lane.b32.xlu1 %v5417_v58, %s7557_s29  ;;  %v5372_v58 = vadd.f32 %v11430_v28, %v5308_v32  ;;  %v4097_v8 = vadd.f32 %v11433_v38, %v3987_v37  ;;  %v3986_v57 = vadd.f32 %v11435_v33, %v3888_v46  ;;  %vm4111_vm7 = vcmp.gt.f32.partialorder %v4095_v39, 0.0  ;;  %v11437_v37 = vld [vmem:[#allocation48_spill] sm:$0xff]  ;;  %v11440_v40 = vld [vmem:[#allocation131_spill] sm:$0xff] }
 0x2ad   : > { %4177 = vrot.lane.b32.xlu0 %v4140_v13, %s7556_s28  ;;  %v5200_v13 = vadd.f32 %v10469_v61, %v5136_v25  ;;  %v5201_v61 = vadd.f32 %v10480_v12, %v5137_v45  ;;  %v11436_v21 = vcombine.low %v10350_v30, %v10359_v63  ;;  %v4130_v17 = vmul.f32 0.1, %v4098_v53  ;;  %v11441_v45 = vld [vmem:[#allocation112_spill] sm:$0xff] }
 0x2ae   : > { %v10712_v48 = vpop.permute.xlu1 %6791  ;;  %v5404_v34 = vmul.f32 0.1, %v5372_v58  ;;  %vm5388_vm8 = vcmp.gt.f32.partialorder %v5372_v58, 0.0  ;;  %v5373_v46 = vadd.f32 %v11439_v44, %v5309_v20  ;;  %vm4114_vm9 = vcmp.gt.f32.partialorder %v4098_v53, 0.0  ;;  %v11442_v38 = vld [vmem:[#allocation88_spill] sm:$0xff]  ;;  %v11443_v20 = vld [vmem:[#allocation93_spill] sm:$0xff] }
 0x2af   : > { %v10716_v35 = vpop.permute.xlu0 %6899  ;;  %v3461_v25 = vadd.f32 %v10404_v50, %v11436_v21  ;;  %v3891_v12 = vadd.f32 %v10567_v62, %v3459_v26  ;;  %v5311_v30 = vadd.f32 %v10616_v56, %v5201_v61  ;;  %v4143_v54 = vsel %vm4111_vm7, %v4095_v39, %v4127_v41  ;;  %v11444_v26 = vld [vmem:[#allocation134_spill] sm:$0xff]  ;;  %v11445_v56 = vld [vmem:[#allocation132_spill] sm:$0xff] }
 0x2b0   : > { %4179 = vrot.lane.b32.xlu1 %v4141_v0, %s7556_s28  ;;  %v11438_v0 = vrot.slane %v11437_v37, 1  ;;  %v4129_v3 = vmul.f32 0.1, %v4097_v8  ;;  %v5138_v2 = vadd.f32 %v10404_v50, %v11442_v38  ;;  %v11446_v33 = vcombine.low %v11444_v26, %v11445_v56  ;;  %v11447_v41 = vld [vmem:[#allocation120_spill] sm:$0xff] }
 0x2b1   : > { %4181 = vrot.lane.b32.xlu0 %v4142_v36, %s7556_s28  ;;  %v5310_v36 = vadd.f32 %v11440_v40, %v5200_v13  ;;  %v3460_v13 = vadd.f32 %v10404_v50, %v11443_v20  ;;  %v3893_v62 = vadd.f32 %v10629_v31, %v3461_v25  ;;  %v4146_v21 = vsel %vm4114_vm9, %v4098_v53, %v4130_v17  ;;  %v11449_v37 = vld [vmem:[#allocation24_spill] sm:$0xff]  ;;  %v11450_v31 = vld [vmem:[#allocation7_spill] sm:$0xff] }
 0x2b2   : > { %v10727_v32 = vpop.permute.xlu1 %6795  ;;  %v5106_v28 = vsel %vm2275_vm2, %v5104_v1, %v11438_v0  ;;  %v4096_v1 = vadd.f32 %v11441_v45, %v3986_v57  ;;  %vm4113_vm2 = vcmp.gt.f32.partialorder %v4097_v8, 0.0  ;;  %v3462_v39 = vadd.f32 %v10404_v50, %v11446_v33 }
 0x2b3   : > { %v10732_v22 = vpop.permute.xlu0 %6793  ;;  %v5374_v57 = vadd.f32 %v11447_v41, %v5310_v36  ;;  %v3989_v0 = vadd.f32 %v11449_v37, %v3891_v12  ;;  %v5375_v25 = vadd.f32 %v11450_v31, %v5311_v30  ;;  %v4145_v40 = vsel %vm4113_vm2, %v4097_v8, %v4129_v3  ;;  %v11451_v12 = vld [vmem:[#allocation5_spill] sm:$0xff] }
 0x2b4   : > { %5459 = vrot.lane.b32.xlu1 %v5419_v42, %s7557_s29  ;;  %v5420_v42 = vsel %vm5388_vm8, %v5372_v58, %v5404_v34  ;;  %v5139_v58 = vadd.f32 %v10404_v50, %v5106_v28  ;;  %v3892_v45 = vadd.f32 %v10601_v27, %v3460_v13  ;;  %v4128_v38 = vmul.f32 0.1, %v4096_v1  ;;  %v11452_v27 = vld [vmem:[#allocation133_spill] sm:$0xff]  ;;  %v11453_v13 = vld [vmem:[#allocation28_spill] sm:$0xff] }
 0x2b5   : > { %5457 = vrot.lane.b32.xlu0 %v5418_v11, %s7557_s29  ;;  %v11448_v11 = vld [vmem:[#allocation38_spill] sm:$0xff]  ;;  %vm5389_vm10 = vcmp.gt.f32.partialorder %v5373_v46, 0.0  ;;  %v3991_v28 = vadd.f32 %v10518_v7, %v3893_v62  ;;  %vm4112_vm11 = vcmp.gt.f32.partialorder %v4096_v1, 0.0  ;;  %v3894_v53 = vadd.f32 %v10651_v55, %v3462_v39  ;;  %v11454_v62 = vld [vmem:[#allocation8_spill] sm:$0xff] }
 0x2b6   : > { %v6690_v10 = vpop.permute.xlu1 %6689  ;;  %v5202_v61 = vadd.f32 %v11448_v11, %v5138_v2  ;;  %v5203_v17 = vadd.f32 %v10662_v6, %v5139_v58  ;;  %v5140_v8 = vadd.f32 %v10404_v50, %v11451_v12  ;;  %v4099_v3 = vadd.f32 %v11452_v27, %v3989_v0  ;;  %v11455_v6 = vld [vmem:[#allocation98_spill] sm:$0xff] }
 0x2b7   : > { %v10749_v63 = vpop.permute.xlu0 %6691  ;;  %v5407_v20 = vmul.f32 0.1, %v5375_v25  ;;  %v3990_v7 = vadd.f32 %v11453_v13, %v3892_v45  ;;  %v4144_v56 = vsel %vm4112_vm11, %v4096_v1, %v4128_v38  ;;  %vm5391_vm12 = vcmp.gt.f32.partialorder %v5375_v25, 0.0 }
 0x2b8   : > { %4183 = vrot.lane.b32.xlu1 %v4143_v54, %s7556_s28  ;;  %v5405_v54 = vmul.f32 0.1, %v5373_v46  ;;  %v5312_v36 = vadd.f32 %v10634_v52, %v5202_v61  ;;  %v4101_v55 = vadd.f32 %v10597_v15, %v3991_v28  ;;  %v6305_v33 = vadd.f32 %v10404_v50, %v11455_v6  ;;  %v11456_v15 = vld [vmem:[#allocation130_spill] sm:$0xff] }
 0x2b9   : > { %5461 = vrot.lane.b32.xlu0 %v5420_v42, %s7557_s29  ;;  %v5406_v42 = vmul.f32 0.1, %v5374_v57  ;;  %vm5390_vm13 = vcmp.gt.f32.partialorder %v5374_v57, 0.0  ;;  %v5313_v39 = vadd.f32 %v10647_v51, %v5203_v17  ;;  %v5204_v41 = vadd.f32 %v10682_v19, %v5140_v8  ;;  %v11458_v51 = vld [vmem:[#allocation12_spill] sm:$0xff] }
 0x2ba   : > { %v10766_v34 = vpop.permute.xlu1 %6901  ;;  %v5421_v2 = vsel %vm5389_vm10, %v5373_v46, %v5405_v54  ;;  %v5376_v26 = vadd.f32 %v11454_v62, %v5312_v36  ;;  %v3992_v46 = vadd.f32 %v10580_v4, %v3894_v53  ;;  %v6737_v1 = vadd.f32 %v6690_v10, %v6305_v33  ;;  %v11459_v54 = vld [vmem:[#allocation9_spill] sm:$0xff] }
 0x2bb   : > { %v10771_v44 = vpop.permute.xlu0 %6903  ;;  %v5423_v58 = vsel %vm5391_vm12, %v5375_v25, %v5407_v20  ;;  %v4100_v37 = vadd.f32 %v11456_v15, %v3990_v7  ;;  %v5422_v0 = vsel %vm5390_vm13, %v5374_v57, %v5406_v42  ;;  %vm4115_vm14 = vcmp.gt.f32.partialorder %v4099_v3, 0.0 }
 0x2bc   : > { %4187 = vrot.lane.b32.xlu1 %v4145_v40, %s7556_s28  ;;  %v5408_v31 = vmul.f32 0.1, %v5376_v26  ;;  %v11457_v40 = vld [vmem:[#allocation103_spill] sm:$0xff]  ;;  %v6307_v19 = vadd.f32 %v10404_v50, %v11458_v51  ;;  %vm5392_vm15 = vcmp.gt.f32.partialorder %v5376_v26, 0.0  ;;  %v4133_v10 = vmul.f32 0.1, %v4101_v55 }
 0x2bd   : > { %4189 = vrot.lane.b32.xlu0 %v4146_v21, %s7556_s28  ;;  %v4131_v21 = vmul.f32 0.1, %v4099_v3  ;;  %v6306_v4 = vadd.f32 %v10404_v50, %v11457_v40  ;;  %v4102_v25 = vadd.f32 %v10620_v5, %v3992_v46  ;;  %v5377_v45 = vadd.f32 %v11459_v54, %v5313_v39 }
 0x2be   : > { %v6694_v30 = vpop.permute.xlu1 %6693  ;;  %v5314_v57 = vadd.f32 %v10666_v59, %v5204_v41  ;;  %vm4117_vm0 = vcmp.gt.f32.partialorder %v4101_v55, 0.0  ;;  %v6835_v38 = vadd.f32 %v10678_v9, %v6737_v1  ;;  %v5424_v8 = vsel %vm5392_vm15, %v5376_v26, %v5408_v31  ;;  %v11461_v59 = vld [vmem:[#allocation108_spill] sm:$0xff] }
 0x2bf   : > { %v10783_v52 = vpop.permute.xlu0 %6801  ;;  %v6739_v28 = vadd.f32 %v6694_v30, %v6307_v19  ;;  %v4147_v17 = vsel %vm4115_vm14, %v4099_v3, %v4131_v21  ;;  %v6738_v12 = vadd.f32 %v10749_v63, %v6306_v4  ;;  %v4132_v27 = vmul.f32 0.1, %v4100_v37 }
 0x2c0   : > { %5463 = vrot.lane.b32.xlu1 %v5421_v2, %s7557_s29  ;;  %v11460_v2 = vld [vmem:[#allocation118_spill] sm:$0xff]  ;;  %v6309_v42 = vadd.f32 %v10404_v50, %v11461_v59  ;;  %vm4116_vm1 = vcmp.gt.f32.partialorder %v4100_v37, 0.0  ;;  %v4149_v20 = vsel %vm4117_vm0, %v4101_v55, %v4133_v10  ;;  %v5378_v9 = vadd.f32 %v10528_v24, %v5314_v57  ;;  %v11462_v24 = vld [vmem:[#allocation107_spill] sm:$0xff] }
 0x2c1   : > { %4185 = vrot.lane.b32.xlu0 %v4144_v56, %s7556_s28  ;;  %v6308_v5 = vadd.f32 %v10404_v50, %v11460_v2  ;;  %vm4118_vm3 = vcmp.gt.f32.partialorder %v4102_v25, 0.0  ;;  %v4134_v3 = vmul.f32 0.1, %v4102_v25  ;;  %v5409_v63 = vmul.f32 0.1, %v5377_v45 }
 0x2c2   : > { %v10795_v11 = vpop.permute.xlu1 %6905  ;;  %v6945_v13 = vadd.f32 %v10696_v47, %v6835_v38  ;;  %v6837_v7 = vadd.f32 %v10712_v48, %v6739_v28  ;;  %vm5393_vm4 = vcmp.gt.f32.partialorder %v5377_v45, 0.0  ;;  %v6836_v56 = vadd.f32 %v10700_v18, %v6738_v12 }
 0x2c3   : > { %v10797_v61 = vpop.permute.xlu0 %6797  ;;  %v4148_v33 = vsel %vm4116_vm1, %v4100_v37, %v4132_v27  ;;  %v6310_v55 = vadd.f32 %v10404_v50, %v11462_v24  ;;  %v4150_v39 = vsel %vm4118_vm3, %v4102_v25, %v4134_v3  ;;  %v5425_v41 = vsel %vm5393_vm4, %v5377_v45, %v5409_v63 }
 0x2c4   : > { %5467 = vrot.lane.b32.xlu1 %v5423_v58, %s7557_s29  ;;  %vm5394_vm5 = vcmp.gt.f32.partialorder %v5378_v9, 0.0  ;;  %v6947_v47 = vadd.f32 %v10766_v34, %v6837_v7  ;;  %v5410_v58 = vmul.f32 0.1, %v5378_v9  ;;  %v6977_v18 = vmul.f32 0.1, %v6945_v13 }
 0x2c5   : > { %5465 = vrot.lane.b32.xlu0 %v5422_v0, %s7557_s29  ;;  %v6946_v21 = vadd.f32 %v10716_v35, %v6836_v56  ;;  %vm6961_vm6 = vcmp.gt.f32.partialorder %v6945_v13, 0.0  ;;  %vm4215_vm4 = vcmask 130112  }
 0x2c6   : > { %v10809_v36 = vpop.permute.xlu1 %6799  ;;  %v5426_v34 = vsel %vm5394_vm5, %v5378_v9, %v5410_v58  ;;  %v6979_v4 = vmul.f32 0.1, %v6947_v47  ;;  %vm6963_vm7 = vcmp.gt.f32.partialorder %v6947_v47, 0.0  ;;  %vm5491_vm5 = vcmask 195712  }
 0x2c7   : > { %v6696_v53 = vpop.permute.xlu0 %6695  ;;  %vm6962_vm8 = vcmp.gt.f32.partialorder %v6946_v21, 0.0 }
 0x2c8   : > { %4191 = vrot.lane.b32.xlu1 %v4147_v17, %s7556_s28  ;;  %v6740_v6 = vadd.f32 %v6696_v53, %v6308_v5  ;;  %v6995_v10 = vsel %vm6963_vm7, %v6947_v47, %v6979_v4  ;;  %v11467_v4 = vld [vmem:[#allocation6_spill] sm:$0xff] }
 0x2c9   : > { %5469 = vrot.lane.b32.xlu0 %v5424_v8, %s7557_s29 }
 0x2ca   : > { %v6698_v30 = vpop.permute.xlu1 %6697  ;;  %v6838_v15 = vadd.f32 %v10732_v22, %v6740_v6  ;;  %v6978_v22 = vmul.f32 0.1, %v6946_v21  ;;  %v11466_v6 = vld [vmem:[#allocation117_spill] sm:$0xff] }
 0x2cb   : > { %v6908_v62 = vpop.permute.xlu0 %6907  ;;  %v6741_v26 = vadd.f32 %v6698_v30, %v6309_v42 }
 0x2cc   : > { %4195 = vrot.lane.b32.xlu1 %v4149_v20, %s7556_s28  ;;  %v6948_v51 = vadd.f32 %v10771_v44, %v6838_v15  ;;  %v6994_v45 = vsel %vm6962_vm8, %v6946_v21, %v6978_v22  ;;  %v11464_v20 = vld [vmem:[#allocation116_spill] sm:$0xff]  ;;  %vm7073_vm8 = vcmask 261312  }
 0x2cd   : > { %4193 = vrot.lane.b32.xlu0 %v4148_v33, %s7556_s28  ;;  %v6839_v48 = vadd.f32 %v10727_v32, %v6741_v26  ;;  %v6993_v32 = vsel %vm6961_vm6, %v6945_v13, %v6977_v18  ;;  %v6313_v9 = vadd.f32 %v10404_v50, %v11464_v20  ;;  %v6312_v33 = vadd.f32 %v10404_v50, %v11466_v6 }
 0x2ce   : > { %v6910_v46 = vpop.permute.xlu1 %6909  ;;  %v6980_v44 = vmul.f32 0.1, %v6948_v51  ;;  %vm6964_vm2 = vcmp.gt.f32.partialorder %v6948_v51, 0.0 }
 0x2cf   : > { %v6700_v1 = vpop.permute.xlu0 %6699  ;;  %v6949_v31 = vadd.f32 %v10795_v11, %v6839_v48 }
 0x2d0   : > { %v6742_v37 = vadd.f32 %v6700_v1, %v6310_v55  ;;  %5471 = vrot.lane.b32.xlu1 %v5425_v41, %s7557_s29  ;;  %v6996_v12 = vsel %vm6964_vm2, %v6948_v51, %v6980_v44  ;;  %v11468_v51 = vld [vmem:[#allocation34_spill] sm:$0xff] }
 0x2d1   : > { %4197 = vrot.lane.b32.xlu0 %v4150_v39, %s7556_s28  ;;  %v6981_v25 = vmul.f32 0.1, %v6949_v31  ;;  %vm6965_vm9 = vcmp.gt.f32.partialorder %v6949_v31, 0.0 }
 0x2d2   : > { %v6804_v0 = vpop.permute.xlu1 %6803  ;;  %v6840_v35 = vadd.f32 %v10797_v61, %v6742_v37  ;;  %v11463_v61 = vld [vmem:[#allocation113_spill] sm:$0xff] }
 0x2d3   : > { %v10834_v40 = vpop.permute.xlu0 %6911  ;;  %v6311_v57 = vadd.f32 %v10404_v50, %v11463_v61  ;;  %v6997_v17 = vsel %vm6965_vm9, %v6949_v31, %v6981_v25 }
 0x2d4   : > { %7025 = vrot.lane.b32.xlu1 %v6993_v32, %s7558_s30  ;;  %v6950_v54 = vadd.f32 %v6908_v62, %v6840_v35  ;;  %v11465_v62 = vld [vmem:[#allocation114_spill] sm:$0xff]  ;;  %v6316_v35 = vadd.f32 %v10404_v50, %v11468_v51 }
 0x2d5   : > { %5473 = vrot.lane.b32.xlu0 %v5426_v34, %s7557_s29 }
 0x2d6   : > { %v10840_v19 = vpop.permute.xlu1 %6807  ;;  %v6982_v8 = vmul.f32 0.1, %v6950_v54  ;;  %vm6966_vm10 = vcmp.gt.f32.partialorder %v6950_v54, 0.0 }
 0x2d7   : > { %v10842_v11 = vpop.permute.xlu0 %6809 }
 0x2d8   : > { %7029 = vrot.lane.b32.xlu1 %v6995_v10, %s7558_s30  ;;  %v6998_v42 = vsel %vm6966_vm10, %v6950_v54, %v6982_v8  ;;  %v6318_v8 = vadd.f32 %v10404_v50, %v10338_v29  ;;  %v7483_v29 = vld [vmem:[%s11040_s2] ss:$0 sm:$0xff] }
 0x2d9   : > { %7027 = vrot.lane.b32.xlu0 %v6994_v45, %s7558_s30  ;;  %v6320_v14 = vadd.f32 %v7483_v29, %v6288_v23 }
 0x2da   : > { %v6702_v38 = vpop.permute.xlu1 %6701 }
 0x2db   : > { %v6806_v28 = vpop.permute.xlu0 %6805  ;;  %v6743_v53 = vadd.f32 %v6702_v38, %v6311_v57 }
 0x2dc   : > { %7033 = vrot.lane.b32.xlu1 %v6997_v17, %s7558_s30 }
 0x2dd   : > { %v6841_v27 = vadd.f32 %v10809_v36, %v6743_v53  ;;  %7031 = vrot.lane.b32.xlu0 %v6996_v12, %s7558_s30  ;;  %v6314_v36 = vadd.f32 %v10404_v50, %v11465_v62  ;;  %v11469_v53 = vld [vmem:[#allocation122_spill] sm:$0xff] }
 0x2de   : > { %v6914_v2 = vpop.permute.xlu1 %6913  ;;  %v6317_v17 = vadd.f32 %v10404_v50, %v11469_v53 }
 0x2df   : > { %v6951_v5 = vadd.f32 %v6910_v46, %v6841_v27  ;;  %v6708_v59 = vpop.permute.xlu0 %6707 }
 0x2e0   : > { %v6746_v56 = vadd.f32 %v6708_v59, %v6314_v36 }
 0x2e1   : > { %7035 = vrot.lane.b32.xlu0 %v6998_v42, %s7558_s30  ;;  %vm6967_vm11 = vcmp.gt.f32.partialorder %v6951_v5, 0.0  ;;  %v6983_v30 = vmul.f32 0.1, %v6951_v5 }
 0x2e2   : > { %v6706_v3 = vpop.permute.xlu1 %6705  ;;  %v6844_v48 = vadd.f32 %v6806_v28, %v6746_v56 }
 0x2e3   : > { %v6920_v63 = vpop.permute.xlu0 %6919  ;;  %v6745_v13 = vadd.f32 %v6706_v3, %v6313_v9  ;;  %v6999_v7 = vsel %vm6967_vm11, %v6951_v5, %v6983_v30 }
 0x2e4   : > { %7037 = vrot.lane.b32.xlu1 %v6999_v7, %s7558_s30 }
 0x2e5   : > { %v6843_v26 = vadd.f32 %v6804_v0, %v6745_v13 }
 0x2e6   : > { %v6918_v24 = vpop.permute.xlu1 %6917 }
 0x2e7   : > { %v6953_v55 = vadd.f32 %v6914_v2, %v6843_v26  ;;  %v6704_v46 = vpop.permute.xlu0 %6703 }
 0x2e8   : > { %v6744_v39 = vadd.f32 %v6704_v46, %v6312_v33 }
 0x2e9   : > { %vm6969_vm12 = vcmp.gt.f32.partialorder %v6953_v55, 0.0  ;;  %v6985_v41 = vmul.f32 0.1, %v6953_v55 }
 0x2ea   : > { %v6842_v47 = vadd.f32 %v10783_v52, %v6744_v39  ;;  %v6816_v1 = vpop.permute.xlu1 %6815  ;;  %v6315_v52 = vadd.f32 %v10404_v50, %v11467_v4  ;;  %v6319_v50 = vadd.f32 %v7483_v29, %v6271_v43 }
 0x2eb   : > { %v6916_v58 = vpop.permute.xlu0 %6915  ;;  %v7001_v18 = vsel %vm6969_vm12, %v6953_v55, %v6985_v41 }
 0x2ec   : > { %v6952_v21 = vadd.f32 %v10834_v40, %v6842_v47  ;;  %v6954_v15 = vadd.f32 %v6916_v58, %v6844_v48  ;;  %7041 = vrot.lane.b32.xlu1 %v7001_v18, %s7558_s30 }
 0x2ee   : > { %vm6970_vm13 = vcmp.gt.f32.partialorder %v6954_v15, 0.0  ;;  %v6986_v37 = vmul.f32 0.1, %v6954_v15  ;;  %v6812_v0 = vpop.permute.xlu1 %6811  ;;  %v6984_v32 = vmul.f32 0.1, %v6952_v21  ;;  %vm6968_vm14 = vcmp.gt.f32.partialorder %v6952_v21, 0.0 }
 0x2ef   : > { %v6814_v31 = vpop.permute.xlu0 %6813 }
 0x2f0   : > { %v7002_v34 = vsel %vm6970_vm13, %v6954_v15, %v6986_v37  ;;  %v7000_v54 = vsel %vm6968_vm14, %v6952_v21, %v6984_v32 }
 0x2f1   : > { %7043 = vrot.lane.b32.xlu0 %v7002_v34, %s7558_s30 }
 0x2f2   : > { %v6710_v22 = vpop.permute.xlu1 %6709 }
 0x2f3   : > { %v6712_v40 = vpop.permute.xlu0 %6711  ;;  %v6747_v10 = vadd.f32 %v6710_v22, %v6315_v52 }
 0x2f4   : > { %v6748_v25 = vadd.f32 %v6712_v40, %v6316_v35 }
 0x2f5   : > { %v6845_v45 = vadd.f32 %v10840_v19, %v6747_v10  ;;  %7039 = vrot.lane.b32.xlu0 %v7000_v54, %s7558_s30 }
 0x2f6   : > { %v6846_v44 = vadd.f32 %v10842_v11, %v6748_v25  ;;  %v6922_v61 = vpop.permute.xlu1 %6921 }
 0x2f7   : > { %v6955_v57 = vadd.f32 %v6918_v24, %v6845_v45  ;;  %v6924_v38 = vpop.permute.xlu0 %6923 }
 0x2f8   : > { %v6956_v28 = vadd.f32 %v6920_v63, %v6846_v44 }
 0x2f9   : > { %vm6971_vm15 = vcmp.gt.f32.partialorder %v6955_v57, 0.0  ;;  %v6987_v12 = vmul.f32 0.1, %v6955_v57 }
 0x2fa   : > { %v6714_v27 = vpop.permute.xlu1 %6713  ;;  %vm6972_vm0 = vcmp.gt.f32.partialorder %v6956_v28, 0.0  ;;  %v6988_v2 = vmul.f32 0.1, %v6956_v28 }
 0x2fb   : > { %v6716_v19 = vpop.permute.xlu0 %6715  ;;  %v6749_v5 = vadd.f32 %v6714_v27, %v6317_v17  ;;  %v7003_v59 = vsel %vm6971_vm15, %v6955_v57, %v6987_v12 }
 0x2fc   : > { %v6750_v42 = vadd.f32 %v6716_v19, %v6318_v8  ;;  %v7004_v11 = vsel %vm6972_vm0, %v6956_v28, %v6988_v2  ;;  %7045 = vrot.lane.b32.xlu1 %v7003_v59, %s7558_s30 }
 0x2fd   : > { %v6847_v20 = vadd.f32 %v6812_v0, %v6749_v5  ;;  %7047 = vrot.lane.b32.xlu0 %v7004_v11, %s7558_s30 }
 0x2fe   : > { %v6848_v9 = vadd.f32 %v6814_v31, %v6750_v42  ;;  %v6926_v30 = vpop.permute.xlu1 %6925 }
 0x2ff   : > { %v6957_v3 = vadd.f32 %v6922_v61, %v6847_v20  ;;  %v6818_v63 = vpop.permute.xlu0 %6817 }
 0x300   : > { %v6958_v13 = vadd.f32 %v6924_v38, %v6848_v9 }
 0x301   : > { %vm6973_vm1 = vcmp.gt.f32.partialorder %v6957_v3, 0.0  ;;  %v6989_v7 = vmul.f32 0.1, %v6957_v3 }
 0x302   : > { %v6718_v62 = vpop.permute.xlu1 %6717  ;;  %vm6974_vm3 = vcmp.gt.f32.partialorder %v6958_v13, 0.0  ;;  %v6990_v36 = vmul.f32 0.1, %v6958_v13 }
 0x303   : > { %v6928_v26 = vpop.permute.xlu0 %6927  ;;  %v6751_v56 = vadd.f32 %v6718_v62, %v6319_v50  ;;  %v7005_v6 = vsel %vm6973_vm1, %v6957_v3, %v6989_v7 }
 0x304   : > { %v7006_v33 = vsel %vm6974_vm3, %v6958_v13, %v6990_v36  ;;  %7049 = vrot.lane.b32.xlu1 %v7005_v6, %s7558_s30 }
 0x305   : > { %v6849_v24 = vadd.f32 %v6816_v1, %v6751_v56  ;;  %7051 = vrot.lane.b32.xlu0 %v7006_v33, %s7558_s30 }
 0x306   : > { %v4168_v49 = vpop.permute.xlu1 %4167 }
 0x307   : > { %v6959_v43 = vadd.f32 %v6926_v30, %v6849_v24  ;;  %v6720_v55 = vpop.permute.xlu0 %6719  ;;  %4216 = vst.msk [vmem:[%s8868_s25] sm:$0xff] %vm4215_vm4, %v4168_v49 }
 0x308   : > { %v6752_v46 = vadd.f32 %v6720_v55, %v6320_v14 }
 0x309   : > { %vm6975_vm6 = vcmp.gt.f32.partialorder %v6959_v43, 0.0  ;;  %v6991_v39 = vmul.f32 0.1, %v6959_v43 }
 0x30a   : > { %v6850_v41 = vadd.f32 %v6818_v63, %v6752_v46  ;;  %v5444_v47 = vpop.permute.xlu1 %5443 }
 0x30b   : > { %v4170_v48 = vpop.permute.xlu0 %4169  ;;  %5492 = vst.msk [vmem:[%s8868_s25] sm:$0xff] %vm5491_vm5, %v5444_v47  ;;  %v7007_v60 = vsel %vm6975_vm6, %v6959_v43, %v6991_v39 }
 0x30c   : > { %v6960_v16 = vadd.f32 %v6928_v26, %v6850_v41  ;;  %4217 = vst.msk [vmem:[%s8868_s25 + $0x8] sm:$0xff] %vm4215_vm4, %v4170_v48  ;;  %7053 = vrot.lane.b32.xlu1 %v7007_v60, %s7558_s30 }
 0x30e   : > { %v5448_v23 = vpop.permute.xlu1 %5447  ;;  %vm6976_vm7 = vcmp.gt.f32.partialorder %v6960_v16, 0.0  ;;  %v6992_v1 = vmul.f32 0.1, %v6960_v16 }
 0x30f   : > { %v5446_v58 = vpop.permute.xlu0 %5445 }
 0x310   : > { %5493 = vst.msk [vmem:[%s8868_s25 + $0x8] sm:$0xff] %vm5491_vm5, %v5446_v58  ;;  %v7008_v18 = vsel %vm6976_vm7, %v6960_v16, %v6992_v1 }
 0x311   : > { %7055 = vrot.lane.b32.xlu0 %v7008_v18, %s7558_s30 }
 0x312   : > { %v4172_v21 = vpop.permute.xlu1 %4171 }
 0x313   : > { %v4174_v15 = vpop.permute.xlu0 %4173  ;;  %4218 = vst.msk [vmem:[%s8868_s25 + $0x10] sm:$0xff] %vm4215_vm4, %v4172_v21 }
 0x314   : > { %4219 = vst.msk [vmem:[%s8868_s25 + $0x18] sm:$0xff] %vm4215_vm4, %v4174_v15 }
 0x315   : > { %5494 = vst.msk [vmem:[%s8868_s25 + $0x10] sm:$0xff] %vm5491_vm5, %v5448_v23 }
 0x316   : > { %v4176_v37 = vpop.permute.xlu1 %4175 }
 0x317   : > { %v5450_v0 = vpop.permute.xlu0 %5449  ;;  %4220 = vst.msk [vmem:[%s8868_s25 + $0x20] sm:$0xff] %vm4215_vm4, %v4176_v37 }
 0x318   : > { %5495 = vst.msk [vmem:[%s8868_s25 + $0x18] sm:$0xff] %vm5491_vm5, %v5450_v0 }
 0x31a   : > { %v5452_v31 = vpop.permute.xlu1 %5451 }
 0x31b   : > { %v5454_v34 = vpop.permute.xlu0 %5453  ;;  %5496 = vst.msk [vmem:[%s8868_s25 + $0x20] sm:$0xff] %vm5491_vm5, %v5452_v31 }
 0x31e   : > { %v5456_v32 = vpop.permute.xlu1 %5455 }
 0x31f   : > { %v4178_v4 = vpop.permute.xlu0 %4177 }
 0x320   : > { %4221 = vst.msk [vmem:[%s8868_s25 + $0x28] sm:$0xff] %vm4215_vm4, %v4178_v4 }
 0x321   : > { %5497 = vst.msk [vmem:[%s8868_s25 + $0x28] sm:$0xff] %vm5491_vm5, %v5454_v34 }
 0x322   : > { %v4180_v52 = vpop.permute.xlu1 %4179 }
 0x323   : > { %v4182_v51 = vpop.permute.xlu0 %4181  ;;  %4222 = vst.msk [vmem:[%s8868_s25 + $0x30] sm:$0xff] %vm4215_vm4, %v4180_v52 }
 0x324   : > { %4223 = vst.msk [vmem:[%s8868_s25 + $0x38] sm:$0xff] %vm4215_vm4, %v4182_v51 }
 0x325   : > { %5498 = vst.msk [vmem:[%s8868_s25 + $0x30] sm:$0xff] %vm5491_vm5, %v5456_v32 }
 0x326   : > { %v5460_v35 = vpop.permute.xlu1 %5459 }
 0x327   : > { %v5458_v22 = vpop.permute.xlu0 %5457 }
 0x328   : > { %5499 = vst.msk [vmem:[%s8868_s25 + $0x38] sm:$0xff] %vm5491_vm5, %v5458_v22 }
 0x32a   : > { %v4184_v40 = vpop.permute.xlu1 %4183 }
 0x32b   : > { %v5462_v10 = vpop.permute.xlu0 %5461  ;;  %4224 = vst.msk [vmem:[%s8868_s25 + $0x40] sm:$0xff] %vm4215_vm4, %v4184_v40 }
 0x32c   : > { %5500 = vst.msk [vmem:[%s8868_s25 + $0x40] sm:$0xff] %vm5491_vm5, %v5460_v35 }
 0x32e   : > { %v4188_v25 = vpop.permute.xlu1 %4187 }
 0x32f   : > { %v4190_v54 = vpop.permute.xlu0 %4189  ;;  %4226 = vst.msk [vmem:[%s8868_s25 + $0x50] sm:$0xff] %vm4215_vm4, %v4188_v25 }
 0x330   : > { %4227 = vst.msk [vmem:[%s8868_s25 + $0x58] sm:$0xff] %vm4215_vm4, %v4190_v54 }
 0x332   : > { %v5464_v45 = vpop.permute.xlu1 %5463 }
 0x333   : > { %v4186_v44 = vpop.permute.xlu0 %4185  ;;  %5502 = vst.msk [vmem:[%s8868_s25 + $0x50] sm:$0xff] %vm5491_vm5, %v5464_v45 }
 0x334   : > { %4225 = vst.msk [vmem:[%s8868_s25 + $0x48] sm:$0xff] %vm4215_vm4, %v4186_v44 }
 0x335   : > { %5501 = vst.msk [vmem:[%s8868_s25 + $0x48] sm:$0xff] %vm5491_vm5, %v5462_v10 }
 0x336   : > { %v5468_v61 = vpop.permute.xlu1 %5467 }
 0x337   : > { %v5466_v57 = vpop.permute.xlu0 %5465 }
 0x338   : > { %5503 = vst.msk [vmem:[%s8868_s25 + $0x58] sm:$0xff] %vm5491_vm5, %v5466_v57 }
 0x33a   : > { %v4192_v38 = vpop.permute.xlu1 %4191 }
 0x33b   : > { %v5470_v28 = vpop.permute.xlu0 %5469  ;;  %4228 = vst.msk [vmem:[%s8868_s25 + $0x60] sm:$0xff] %vm4215_vm4, %v4192_v38 }
 0x33c   : > { %5504 = vst.msk [vmem:[%s8868_s25 + $0x60] sm:$0xff] %vm5491_vm5, %v5468_v61 }
 0x33e   : > { %v4196_v53 = vpop.permute.xlu1 %4195 }
 0x33f   : > { %v4194_v17 = vpop.permute.xlu0 %4193  ;;  %4230 = vst.msk [vmem:[%s8868_s25 + $0x70] sm:$0xff] %vm4215_vm4, %v4196_v53 }
 0x340   : > { %4229 = vst.msk [vmem:[%s8868_s25 + $0x68] sm:$0xff] %vm4215_vm4, %v4194_v17 }
 0x341   : > { %5505 = vst.msk [vmem:[%s8868_s25 + $0x68] sm:$0xff] %vm5491_vm5, %v5470_v28 }
 0x342   : > { %v5472_v12 = vpop.permute.xlu1 %5471 }
 0x343   : > { %v4198_v8 = vpop.permute.xlu0 %4197  ;;  %5506 = vst.msk [vmem:[%s8868_s25 + $0x70] sm:$0xff] %vm5491_vm5, %v5472_v12 }
 0x344   : > { %4231 = vst.msk [vmem:[%s8868_s25 + $0x78] sm:$0xff] %vm4215_vm4, %v4198_v8 }
 0x346   : > { %v7026_v27 = vpop.permute.xlu1 %7025 }
 0x347   : > { %v5474_v2 = vpop.permute.xlu0 %5473  ;;  %7074 = vst.msk [vmem:[%s8868_s25] sm:$0xff] %vm7073_vm8, %v7026_v27 }
 0x348   : > { %5507 = vst.msk [vmem:[%s8868_s25 + $0x78] sm:$0xff] %vm5491_vm5, %v5474_v2 }
 0x34a   : > { %v7030_v19 = vpop.permute.xlu1 %7029 }
 0x34b   : > { %v7028_v5 = vpop.permute.xlu0 %7027  ;;  %7076 = vst.msk [vmem:[%s8868_s25 + $0x10] sm:$0xff] %vm7073_vm8, %v7030_v19 }
 0x34c   : > { %7075 = vst.msk [vmem:[%s8868_s25 + $0x8] sm:$0xff] %vm7073_vm8, %v7028_v5 }
 0x34e   : > { %v7034_v59 = vpop.permute.xlu1 %7033 }
 0x34f   : > { %v7032_v42 = vpop.permute.xlu0 %7031  ;;  %7078 = vst.msk [vmem:[%s8868_s25 + $0x20] sm:$0xff] %vm7073_vm8, %v7034_v59 }
 0x350   : > { %7077 = vst.msk [vmem:[%s8868_s25 + $0x18] sm:$0xff] %vm7073_vm8, %v7032_v42 }
 0x353   : > { %v7036_v11 = vpop.permute.xlu0 %7035 }
 0x354   : > { %7079 = vst.msk [vmem:[%s8868_s25 + $0x28] sm:$0xff] %vm7073_vm8, %v7036_v11 }
 0x356   : > { %v7038_v20 = vpop.permute.xlu1 %7037 }
 0x357   : > { %7080 = vst.msk [vmem:[%s8868_s25 + $0x30] sm:$0xff] %vm7073_vm8, %v7038_v20 }
 0x35e   : > { %v7042_v9 = vpop.permute.xlu1 %7041 }
 0x35f   : > { %7082 = vst.msk [vmem:[%s8868_s25 + $0x40] sm:$0xff] %vm7073_vm8, %v7042_v9 }
 0x363   : > { %v7044_v30 = vpop.permute.xlu0 %7043 }
 0x364   : > { %7083 = vst.msk [vmem:[%s8868_s25 + $0x48] sm:$0xff] %vm7073_vm8, %v7044_v30 }
 0x367   : > { %v7040_v3 = vpop.permute.xlu0 %7039 }
 0x368   : > { %7081 = vst.msk [vmem:[%s8868_s25 + $0x38] sm:$0xff] %vm7073_vm8, %v7040_v3 }
 0x36e   : > { %v7046_v63 = vpop.permute.xlu1 %7045 }
 0x36f   : > { %v7048_v13 = vpop.permute.xlu0 %7047  ;;  %7084 = vst.msk [vmem:[%s8868_s25 + $0x50] sm:$0xff] %vm7073_vm8, %v7046_v63 }
 0x370   : > { %7085 = vst.msk [vmem:[%s8868_s25 + $0x58] sm:$0xff] %vm7073_vm8, %v7048_v13 }
 0x376   : > { %v7050_v29 = vpop.permute.xlu1 %7049 }
 0x377   : > { %v7052_v50 = vpop.permute.xlu0 %7051  ;;  %7086 = vst.msk [vmem:[%s8868_s25 + $0x60] sm:$0xff] %vm7073_vm8, %v7050_v29 }
 0x378   : > { %7087 = vst.msk [vmem:[%s8868_s25 + $0x68] sm:$0xff] %vm7073_vm8, %v7052_v50 }
 0x37e   : > { %v7054_v7 = vpop.permute.xlu1 %7053 }
 0x37f   : > { %7088 = vst.msk [vmem:[%s8868_s25 + $0x70] sm:$0xff] %vm7073_vm8, %v7054_v7 }
 0x383   : > { %v7056_v62 = vpop.permute.xlu0 %7055 }
 0x384   : > { %7089 = vst.msk [vmem:[%s8868_s25 + $0x78] sm:$0xff] %vm7073_vm8, %v7056_v62 }
 0x385   : > { %7497 = shalt.err (!%p7494_p3)
}
 0x386   : > { %s7498_s20 = scalar_lea.hbm %s10988_s10, 2048  ;;  %s7502_s27 = scalar_lea.hbm %s11041_s3, 8192 }
 0x387   : > { %p7499_p4 = scmp.ne.s32.totalorder %s10988_s10, %s7498_s20  ;;  %p7503_p9 = scmp.lt.u32.totalorder %s10988_s10, %s11041_s3 }
 0x388   : > { %p7504_p10 = scmp.lt.u32.totalorder %s7502_s27, %s7498_s20  ;;  %p7506_p12 = scmp.lt.u32.totalorder %s7498_s20, %s10988_s10 }
 0x389   : > { %p7500_p7 = pnand %p7499_p4, %p7619_p5 }
 0x38a   : > { %p7505_p11 = por %p7504_p10, %p7503_p9 }
 0x38b   : > { %p7501_p8 = pneg %p7500_p7 }
 0x38c   : > { %p7507_p13 = por %p7506_p12, %p7505_p11 }
 0x38e   : > { %p7508_p0 = pnand %p7507_p13, %p7501_p8 }
 0x390   : > { %7511 = shalt.err (!%p7508_p0)
}
 0x391   : > { %s7560_s4 = smov 128  }
 0x392   : > { %7431 = dma.vmem_to_hbm [thread:$0]  (%p7619_p5), %s10990_s7, 2048, %s10988_s10, %s10996_s11, %s7560_s4, %s7560_s4, %s7556_s28  }
 0x393 PF: > { %p7437_p1 = scmp.ge.s32.totalorder %s7546_s15, 2  ;;  %s7119_s5 = sand.u32 1, %s7534_s12  }
 0x394   : > { %s7120_s6 = scalar_lea.sflag [#allocation3], %s7119_s5 }
 0x395   : > { %p7434_p2 = pnand %p7437_p1, %p7623_p6 }
 0x397   : > { %7529 = dma.done.wait (!%p7434_p2), %s7120_s6, 2048  }
 0x398   : > { %7531 = vsyncadd (!%p7434_p2), %s7120_s6, 4294965248  ;;  %p13_p3 = scmp.ge.s32.totalorder %s7606_s18, 6   ;;  %s11470_s12 = smov %s7538_s13 }
 0x399   : > { %s11471_s13 = smov %s7542_s14  ;;  %s11472_s14 = smov %s7617_s21 }
 0x39a   : > { %s11473_s15 = smov %s7606_s18  ;;  %15 = sbr.rel (!%p13_p3) target bundleno = 3 (0x3), region = 67 }
 0x3a1   :  { %7125 = vsyncpa [#allocation3], 1 }
 0x3a2   :  { %7127 = vsyncpa [#allocation3 + $0x1], 1 }

</bundles_post_ra>
